<compile_context>
chip_gen: v7x
topology: tpu7x:2x2x1
jax: 0.10.0
libtpu: 0.0.40
codegen_flags: <defaults>
</compile_context>

<pallas_src>
import math
import functools

import jax
import jax.numpy as jnp
from jax.experimental import pallas as pl
from jax.experimental.pallas import tpu as pltpu


def cross_attention_kernel(x_ref, ctx_ref,
                           wq_ref, bq_ref, wk_ref, bk_ref,
                           wv_ref, bv_ref, wo_ref, bo_ref,
                           y_ref, attm_ref,
                           *, n_head: int, head_dim: int):
    """One grid step handles a block of `bb` batch elements entirely in VMEM."""
    bb, tx, c = x_ref.shape
    tc = ctx_ref.shape[1]

    # Flatten the batch block into the matmul M dimension (bb*tx rows).
    xf = x_ref[...].reshape(bb * tx, c).astype(jnp.bfloat16)
    cf = ctx_ref[...].reshape(bb * tc, c).astype(jnp.bfloat16)

    # QKV projections: bf16 operands, f32 accumulation, f32 bias add.
    q = jnp.dot(xf, wq_ref[...], preferred_element_type=jnp.float32) + bq_ref[...]
    k = jnp.dot(cf, wk_ref[...], preferred_element_type=jnp.float32) + bk_ref[...]
    v = jnp.dot(cf, wv_ref[...], preferred_element_type=jnp.float32) + bv_ref[...]

    # Fold the attention scale into Q once (applies to every head at once).
    q = q * (1.0 / math.sqrt(head_dim))

    q3 = q.reshape(bb, tx, c).astype(jnp.bfloat16)
    k3 = k.reshape(bb, tc, c).astype(jnp.bfloat16)
    v3 = v.reshape(bb, tc, c).astype(jnp.bfloat16)

    att_sum = jnp.zeros((bb, tx, tc), jnp.float32)
    acc = jnp.zeros((bb * tx, c), jnp.float32)        # fused out_proj accumulator

    # Static per-head loop (n_head is small and compile-time constant).
    # TODO(synk): if Tx/Tc grow large, switch to an online-softmax (flash)
    # structure with a Tc grid axis instead of materializing (Tx, Tc) per head.
    for h in range(n_head):
        lo = h * head_dim
        qh = q3[:, :, lo:lo + head_dim]               # (bb, tx, hd)
        kh = k3[:, :, lo:lo + head_dim]               # (bb, tc, hd)
        vh = v3[:, :, lo:lo + head_dim]               # (bb, tc, hd)

        # Contract trailing dims directly — no explicit transpose of kh.
        att = jnp.einsum('bqd,bkd->bqk', qh, kh,
                         preferred_element_type=jnp.float32)
        # Numerically-stable softmax over the key axis, kept in f32.
        att = att - jnp.max(att, axis=-1, keepdims=True)
        att = jnp.exp(att)
        att = att * pl.reciprocal(jnp.sum(att, axis=-1, keepdims=True),
                                  approx=True)
        att_sum = att_sum + att

        yh = jnp.einsum('bqk,bkd->bqd', att.astype(jnp.bfloat16), vh,
                        preferred_element_type=jnp.float32)   # (bb, tx, hd)

        # Fuse the output projection per head: no head concat / relayout.
        acc = acc + jnp.dot(
            yh.reshape(bb * tx, head_dim).astype(jnp.bfloat16),
            wo_ref[lo:lo + head_dim, :],
            preferred_element_type=jnp.float32)

    y_out = acc + bo_ref[...]
    y_ref[...] = y_out.reshape(bb, tx, c).astype(y_ref.dtype)
    attm_ref[...] = (att_sum * (1.0 / n_head)).astype(attm_ref.dtype)


def cross_attention(x, context, params, *, n_head: int, batch_block=None):
    """x: (B, Tx, C), context: (B, Tc, C).  Returns (y, att_mean).

    params["w*"] are stored in (in, out) layout; params["b*"] are (C,).
    """
    B, Tx, C = x.shape
    Tc = context.shape[1]
    assert C % n_head == 0
    head_dim = C // n_head

    if batch_block is None:
        # Fill the MXU M dimension to ~128 rows per grid step; bb must divide B.
        target = max(1, 128 // max(Tx, 1))
        batch_block = 1
        for d in range(1, B + 1):
            if B % d == 0 and d <= target:
                batch_block = d
    bb = batch_block
    assert B % bb == 0

    # Weights are already (in, out) — no per-call HBM transpose.  Cast once to
    # bf16 (MXU-native); biases stay f32 and are kept 2-D for broadcasting.
    wq = params["wq"].astype(jnp.bfloat16)
    wk = params["wk"].astype(jnp.bfloat16)
    wv = params["wv"].astype(jnp.bfloat16)
    wo = params["wo"].astype(jnp.bfloat16)
    bq = params["bq"].reshape(1, C).astype(jnp.float32)
    bk = params["bk"].reshape(1, C).astype(jnp.float32)
    bv = params["bv"].reshape(1, C).astype(jnp.float32)
    bo = params["bo"].reshape(1, C).astype(jnp.float32)

    kernel = functools.partial(cross_attention_kernel,
                               n_head=n_head, head_dim=head_dim)

    weight_spec = pl.BlockSpec((C, C), lambda b: (0, 0))
    bias_spec = pl.BlockSpec((1, C), lambda b: (0, 0))

    y, att_mean = pl.pallas_call(
        kernel,
        out_shape=(
            jax.ShapeDtypeStruct((B, Tx, C), x.dtype),
            jax.ShapeDtypeStruct((B, Tx, Tc), jnp.float32),
        ),
        grid_spec=pltpu.PrefetchScalarGridSpec(
            num_scalar_prefetch=0,
            grid=(B // bb,),
            in_specs=[
                pl.BlockSpec((bb, Tx, C), lambda b: (b, 0, 0)),   # x
                pl.BlockSpec((bb, Tc, C), lambda b: (b, 0, 0)),   # context
                weight_spec, bias_spec,                            # q_proj
                weight_spec, bias_spec,                            # k_proj
                weight_spec, bias_spec,                            # v_proj
                weight_spec, bias_spec,                            # out_proj
            ],
            out_specs=[
                pl.BlockSpec((bb, Tx, C), lambda b: (b, 0, 0)),
                pl.BlockSpec((bb, Tx, Tc), lambda b: (b, 0, 0)),
            ],
        ),
        compiler_params=pltpu.CompilerParams(
            dimension_semantics=("parallel",)),
    )(x, context, wq, bq, wk, bk, wv, bv, wo, bo)
    return y, att_mean


def reference(x, context, params, *, n_head: int):
    """Pure-JAX f32 reference mirroring the PyTorch forward (weights (in,out))."""
    B, Tx, C = x.shape
    Tc = context.shape[1]
    hd = C // n_head

    def lin(a, w, b):
        return a @ w + b

    q = lin(x, params["wq"], params["bq"]).reshape(B, Tx, n_head, hd).transpose(0, 2, 1, 3)
    k = lin(context, params["wk"], params["bk"]).reshape(B, Tc, n_head, hd).transpose(0, 2, 1, 3)
    v = lin(context, params["wv"], params["bv"]).reshape(B, Tc, n_head, hd).transpose(0, 2, 1, 3)

    att = jnp.einsum("bhqd,bhkd->bhqk", q, k) * (1.0 / math.sqrt(hd))
    att = jax.nn.softmax(att, axis=-1)
    y = jnp.einsum("bhqk,bhkd->bhqd", att, v)
    y = y.transpose(0, 2, 1, 3).reshape(B, Tx, C)
    att_mean = att.mean(axis=1)
    y = lin(y, params["wo"], params["bo"])
    return y, att_mean


if __name__ == "__main__":
    # Small, config-consistent shapes: n_head=8 (as in Config), C divisible by
    # n_head and lane-aligned (C = 128, Tc = 128 → lane-dense outputs).
    B, Tx, Tc, C, n_head = 4, 8, 128, 128, 8

    key = jax.random.PRNGKey(0)
    ks = jax.random.split(key, 10)
    scale = 1.0 / math.sqrt(C)

    params = {
        # (in, out) layout — equivalent to torch weight.T stored once at init.
        "wq": jax.random.normal(ks[0], (C, C), jnp.float32) * scale,
        "bq": jax.random.normal(ks[1], (C,), jnp.float32) * 0.01,
        "wk": jax.random.normal(ks[2], (C, C), jnp.float32) * scale,
        "bk": jax.random.normal(ks[3], (C,), jnp.float32) * 0.01,
        "wv": jax.random.normal(ks[4], (C, C), jnp.float32) * scale,
        "bv": jax.random.normal(ks[5], (C,), jnp.float32) * 0.01,
        "wo": jax.random.normal(ks[6], (C, C), jnp.float32) * scale,
        "bo": jax.random.normal(ks[7], (C,), jnp.float32) * 0.01,
    }
    x = jax.random.normal(ks[8], (B, Tx, C), jnp.float32)
    context = jax.random.normal(ks[9], (B, Tc, C), jnp.float32)

    # batch_block=2 -> grid=(2,): exercises both intra-step batching and the
    # grid index_maps.
    y, att_mean = cross_attention(x, context, params, n_head=n_head,
                                  batch_block=2)
    jax.block_until_ready((y, att_mean))

    y_ref, att_ref = reference(x, context, params, n_head=n_head)
    # Tolerances loosened vs. the f32 reference: kernel uses bf16 matmul
    # operands (f32 accumulation) and an approx reciprocal in the softmax.
    assert jnp.allclose(y, y_ref, atol=7e-2, rtol=5e-2), "y mismatch"
    assert jnp.allclose(att_mean, att_ref, atol=2e-2, rtol=5e-2), "att_mean mismatch"

    print("KERNEL_OK")
</pallas_src>

<mosaic_0001>
module attributes {stable_mosaic.version = 11 : i64} {
  func.func @cross_attention_kernel(%arg0: i32, %arg1: memref<2x8x128xf32, #tpu.memory_space<vmem>>, %arg2: memref<2x128x128xf32, #tpu.memory_space<vmem>>, %arg3: memref<128x128xbf16, #tpu.memory_space<vmem>>, %arg4: memref<1x128xf32, #tpu.memory_space<vmem>>, %arg5: memref<128x128xbf16, #tpu.memory_space<vmem>>, %arg6: memref<1x128xf32, #tpu.memory_space<vmem>>, %arg7: memref<128x128xbf16, #tpu.memory_space<vmem>>, %arg8: memref<1x128xf32, #tpu.memory_space<vmem>>, %arg9: memref<128x128xbf16, #tpu.memory_space<vmem>>, %arg10: memref<1x128xf32, #tpu.memory_space<vmem>>, %arg11: memref<2x8x128xf32, #tpu.memory_space<vmem>>, %arg12: memref<2x8x128xf32, #tpu.memory_space<vmem>>) attributes {dimension_semantics = [#tpu.dimension_semantics<parallel>], iteration_bounds = array<i64: 2>, scalar_prefetch = 0 : i64, scratch_operands = 0 : i64, tpu.core_type = #tpu.core_type<tc>, window_params = [{transform_indices = @transform_0, window_bounds = array<i64: 2, 8, 128>}, {transform_indices = @transform_1, window_bounds = array<i64: 2, 128, 128>}, {pipeline_mode = #tpu.pipeline_mode<synchronous>, transform_indices = @transform_2, window_bounds = array<i64: 128, 128>}, {pipeline_mode = #tpu.pipeline_mode<synchronous>, transform_indices = @transform_3, window_bounds = array<i64: 1, 128>}, {pipeline_mode = #tpu.pipeline_mode<synchronous>, transform_indices = @transform_4, window_bounds = array<i64: 128, 128>}, {pipeline_mode = #tpu.pipeline_mode<synchronous>, transform_indices = @transform_5, window_bounds = array<i64: 1, 128>}, {pipeline_mode = #tpu.pipeline_mode<synchronous>, transform_indices = @transform_6, window_bounds = array<i64: 128, 128>}, {pipeline_mode = #tpu.pipeline_mode<synchronous>, transform_indices = @transform_7, window_bounds = array<i64: 1, 128>}, {pipeline_mode = #tpu.pipeline_mode<synchronous>, transform_indices = @transform_8, window_bounds = array<i64: 128, 128>}, {pipeline_mode = #tpu.pipeline_mode<synchronous>, transform_indices = @transform_9, window_bounds = array<i64: 1, 128>}, {transform_indices = @transform_10, window_bounds = array<i64: 2, 8, 128>}, {transform_indices = @transform_11, window_bounds = array<i64: 2, 8, 128>}]} {
    %c0 = arith.constant 0 : index
    %c0_0 = arith.constant 0 : index
    %c0_1 = arith.constant 0 : index
    %0 = vector.load %arg1[%c0, %c0_0, %c0_1] : memref<2x8x128xf32, #tpu.memory_space<vmem>>, vector<2x8x128xf32>
    %1 = vector.shape_cast %0 : vector<2x8x128xf32> to vector<16x128xf32>
    %2 = arith.truncf %1 : vector<16x128xf32> to vector<16x128xbf16>
    %c0_2 = arith.constant 0 : index
    %c0_3 = arith.constant 0 : index
    %c0_4 = arith.constant 0 : index
    %3 = vector.load %arg2[%c0_2, %c0_3, %c0_4] : memref<2x128x128xf32, #tpu.memory_space<vmem>>, vector<2x128x128xf32>
    %4 = vector.shape_cast %3 : vector<2x128x128xf32> to vector<256x128xf32>
    %5 = arith.truncf %4 : vector<256x128xf32> to vector<256x128xbf16>
    %c0_5 = arith.constant 0 : index
    %c0_6 = arith.constant 0 : index
    %6 = vector.load %arg3[%c0_5, %c0_6] : memref<128x128xbf16, #tpu.memory_space<vmem>>, vector<128x128xbf16>
    %cst = arith.constant dense<0.000000e+00> : vector<16x128xf32>
    %7 = tpu.matmul %2, %6, %cst {dimension_numbers = #tpu.dot_dimension_numbers<[1], [0], [0], [1], [0, 0, 1, 1], [], []>} : vector<16x128xbf16>, vector<128x128xbf16>, vector<16x128xf32> -> vector<16x128xf32>
    %c0_7 = arith.constant 0 : index
    %c0_8 = arith.constant 0 : index
    %8 = vector.load %arg4[%c0_7, %c0_8] : memref<1x128xf32, #tpu.memory_space<vmem>>, vector<1x128xf32>
    %9 = vector.broadcast %8 : vector<1x128xf32> to vector<16x128xf32>
    %10 = arith.addf %7, %9 : vector<16x128xf32>
    %c0_9 = arith.constant 0 : index
    %c0_10 = arith.constant 0 : index
    %11 = vector.load %arg5[%c0_9, %c0_10] : memref<128x128xbf16, #tpu.memory_space<vmem>>, vector<128x128xbf16>
    %cst_11 = arith.constant dense<0.000000e+00> : vector<256x128xf32>
    %12 = tpu.matmul %5, %11, %cst_11 {dimension_numbers = #tpu.dot_dimension_numbers<[1], [0], [0], [1], [0, 0, 1, 1], [], []>} : vector<256x128xbf16>, vector<128x128xbf16>, vector<256x128xf32> -> vector<256x128xf32>
    %c0_12 = arith.constant 0 : index
    %c0_13 = arith.constant 0 : index
    %13 = vector.load %arg6[%c0_12, %c0_13] : memref<1x128xf32, #tpu.memory_space<vmem>>, vector<1x128xf32>
    %14 = vector.broadcast %13 : vector<1x128xf32> to vector<256x128xf32>
    %15 = arith.addf %12, %14 : vector<256x128xf32>
    %c0_14 = arith.constant 0 : index
    %c0_15 = arith.constant 0 : index
    %16 = vector.load %arg7[%c0_14, %c0_15] : memref<128x128xbf16, #tpu.memory_space<vmem>>, vector<128x128xbf16>
    %cst_16 = arith.constant dense<0.000000e+00> : vector<256x128xf32>
    %17 = tpu.matmul %5, %16, %cst_16 {dimension_numbers = #tpu.dot_dimension_numbers<[1], [0], [0], [1], [0, 0, 1, 1], [], []>} : vector<256x128xbf16>, vector<128x128xbf16>, vector<256x128xf32> -> vector<256x128xf32>
    %c0_17 = arith.constant 0 : index
    %c0_18 = arith.constant 0 : index
    %18 = vector.load %arg8[%c0_17, %c0_18] : memref<1x128xf32, #tpu.memory_space<vmem>>, vector<1x128xf32>
    %19 = vector.broadcast %18 : vector<1x128xf32> to vector<256x128xf32>
    %20 = arith.addf %17, %19 : vector<256x128xf32>
    %cst_19 = arith.constant 2.500000e-01 : f32
    %21 = vector.broadcast %cst_19 : f32 to vector<16x128xf32>
    %22 = arith.mulf %10, %21 : vector<16x128xf32>
    %23 = vector.shape_cast %22 : vector<16x128xf32> to vector<2x8x128xf32>
    %24 = arith.truncf %23 : vector<2x8x128xf32> to vector<2x8x128xbf16>
    %25 = vector.shape_cast %15 : vector<256x128xf32> to vector<2x128x128xf32>
    %26 = arith.truncf %25 : vector<2x128x128xf32> to vector<2x128x128xbf16>
    %27 = vector.shape_cast %20 : vector<256x128xf32> to vector<2x128x128xf32>
    %28 = arith.truncf %27 : vector<2x128x128xf32> to vector<2x128x128xbf16>
    %cst_20 = arith.constant 0.000000e+00 : f32
    %29 = vector.broadcast %cst_20 : f32 to vector<2x8x128xf32>
    %cst_21 = arith.constant 0.000000e+00 : f32
    %30 = vector.broadcast %cst_21 : f32 to vector<16x128xf32>
    %31 = vector.extract_strided_slice %24 {offsets = [0, 0, 0], sizes = [2, 8, 16], strides = [1, 1, 1]} : vector<2x8x128xbf16> to vector<2x8x16xbf16>
    %32 = vector.extract_strided_slice %26 {offsets = [0, 0, 0], sizes = [2, 128, 16], strides = [1, 1, 1]} : vector<2x128x128xbf16> to vector<2x128x16xbf16>
    %33 = vector.extract_strided_slice %28 {offsets = [0, 0, 0], sizes = [2, 128, 16], strides = [1, 1, 1]} : vector<2x128x128xbf16> to vector<2x128x16xbf16>
    "tpu.trace_start"() <{level = 10 : i32, message = "bqd,bkd->bqk"}> : () -> ()
    %cst_22 = arith.constant dense<0.000000e+00> : vector<2x8x128xf32>
    %34 = tpu.matmul %31, %32, %cst_22 {dimension_numbers = #tpu.dot_dimension_numbers<[2], [2], [1], [1], [0, 0, 0, 1, 1, 1], [0], [0]>} : vector<2x8x16xbf16>, vector<2x128x16xbf16>, vector<2x8x128xf32> -> vector<2x8x128xf32>
    "tpu.trace_stop"() : () -> ()
    %cst_23 = arith.constant dense<0xFF800000> : vector<2x8xf32>
    %35 = vector.multi_reduction <maximumf>, %34, %cst_23 [2] : vector<2x8x128xf32> to vector<2x8xf32>
    %36 = vector.shape_cast %35 : vector<2x8xf32> to vector<2x8x1xf32>
    %37 = vector.broadcast %36 : vector<2x8x1xf32> to vector<2x8x128xf32>
    %38 = arith.subf %34, %37 : vector<2x8x128xf32>
    %39 = math.exp %38 : vector<2x8x128xf32>
    %cst_24 = arith.constant dense<0.000000e+00> : vector<2x8xf32>
    %40 = vector.multi_reduction <add>, %39, %cst_24 [2] : vector<2x8x128xf32> to vector<2x8xf32>
    %41 = vector.shape_cast %40 : vector<2x8xf32> to vector<2x8x1xf32>
    %42 = tpu.reciprocal %41 {approx = true} : vector<2x8x1xf32> -> vector<2x8x1xf32>
    %43 = vector.broadcast %42 : vector<2x8x1xf32> to vector<2x8x128xf32>
    %44 = arith.mulf %39, %43 : vector<2x8x128xf32>
    %45 = arith.addf %29, %44 : vector<2x8x128xf32>
    %46 = arith.truncf %44 : vector<2x8x128xf32> to vector<2x8x128xbf16>
    "tpu.trace_start"() <{level = 10 : i32, message = "bqk,bkd->bqd"}> : () -> ()
    %cst_25 = arith.constant dense<0.000000e+00> : vector<2x8x16xf32>
    %47 = tpu.matmul %46, %33, %cst_25 {dimension_numbers = #tpu.dot_dimension_numbers<[2], [1], [1], [2], [0, 0, 0, 1, 1, 2], [0], [0]>} : vector<2x8x128xbf16>, vector<2x128x16xbf16>, vector<2x8x16xf32> -> vector<2x8x16xf32>
    "tpu.trace_stop"() : () -> ()
    %48 = vector.shape_cast %47 : vector<2x8x16xf32> to vector<16x16xf32>
    %49 = arith.truncf %48 : vector<16x16xf32> to vector<16x16xbf16>
    %c0_26 = arith.constant 0 : index
    %c0_27 = arith.constant 0 : index
    %50 = vector.load %arg9[%c0_26, %c0_27] : memref<128x128xbf16, #tpu.memory_space<vmem>>, vector<16x128xbf16>
    %cst_28 = arith.constant dense<0.000000e+00> : vector<16x128xf32>
    %51 = tpu.matmul %49, %50, %cst_28 {dimension_numbers = #tpu.dot_dimension_numbers<[1], [0], [0], [1], [0, 0, 1, 1], [], []>} : vector<16x16xbf16>, vector<16x128xbf16>, vector<16x128xf32> -> vector<16x128xf32>
    %52 = arith.addf %30, %51 : vector<16x128xf32>
    %53 = vector.extract_strided_slice %24 {offsets = [0, 0, 16], sizes = [2, 8, 16], strides = [1, 1, 1]} : vector<2x8x128xbf16> to vector<2x8x16xbf16>
    %54 = vector.extract_strided_slice %26 {offsets = [0, 0, 16], sizes = [2, 128, 16], strides = [1, 1, 1]} : vector<2x128x128xbf16> to vector<2x128x16xbf16>
    %55 = vector.extract_strided_slice %28 {offsets = [0, 0, 16], sizes = [2, 128, 16], strides = [1, 1, 1]} : vector<2x128x128xbf16> to vector<2x128x16xbf16>
    "tpu.trace_start"() <{level = 10 : i32, message = "bqd,bkd->bqk"}> : () -> ()
    %cst_29 = arith.constant dense<0.000000e+00> : vector<2x8x128xf32>
    %56 = tpu.matmul %53, %54, %cst_29 {dimension_numbers = #tpu.dot_dimension_numbers<[2], [2], [1], [1], [0, 0, 0, 1, 1, 1], [0], [0]>} : vector<2x8x16xbf16>, vector<2x128x16xbf16>, vector<2x8x128xf32> -> vector<2x8x128xf32>
    "tpu.trace_stop"() : () -> ()
    %cst_30 = arith.constant dense<0xFF800000> : vector<2x8xf32>
    %57 = vector.multi_reduction <maximumf>, %56, %cst_30 [2] : vector<2x8x128xf32> to vector<2x8xf32>
    %58 = vector.shape_cast %57 : vector<2x8xf32> to vector<2x8x1xf32>
    %59 = vector.broadcast %58 : vector<2x8x1xf32> to vector<2x8x128xf32>
    %60 = arith.subf %56, %59 : vector<2x8x128xf32>
    %61 = math.exp %60 : vector<2x8x128xf32>
    %cst_31 = arith.constant dense<0.000000e+00> : vector<2x8xf32>
    %62 = vector.multi_reduction <add>, %61, %cst_31 [2] : vector<2x8x128xf32> to vector<2x8xf32>
    %63 = vector.shape_cast %62 : vector<2x8xf32> to vector<2x8x1xf32>
    %64 = tpu.reciprocal %63 {approx = true} : vector<2x8x1xf32> -> vector<2x8x1xf32>
    %65 = vector.broadcast %64 : vector<2x8x1xf32> to vector<2x8x128xf32>
    %66 = arith.mulf %61, %65 : vector<2x8x128xf32>
    %67 = arith.addf %45, %66 : vector<2x8x128xf32>
    %68 = arith.truncf %66 : vector<2x8x128xf32> to vector<2x8x128xbf16>
    "tpu.trace_start"() <{level = 10 : i32, message = "bqk,bkd->bqd"}> : () -> ()
    %cst_32 = arith.constant dense<0.000000e+00> : vector<2x8x16xf32>
    %69 = tpu.matmul %68, %55, %cst_32 {dimension_numbers = #tpu.dot_dimension_numbers<[2], [1], [1], [2], [0, 0, 0, 1, 1, 2], [0], [0]>} : vector<2x8x128xbf16>, vector<2x128x16xbf16>, vector<2x8x16xf32> -> vector<2x8x16xf32>
    "tpu.trace_stop"() : () -> ()
    %70 = vector.shape_cast %69 : vector<2x8x16xf32> to vector<16x16xf32>
    %71 = arith.truncf %70 : vector<16x16xf32> to vector<16x16xbf16>
    %c16 = arith.constant 16 : index
    %c0_33 = arith.constant 0 : index
    %72 = vector.load %arg9[%c16, %c0_33] : memref<128x128xbf16, #tpu.memory_space<vmem>>, vector<16x128xbf16>
    %cst_34 = arith.constant dense<0.000000e+00> : vector<16x128xf32>
    %73 = tpu.matmul %71, %72, %cst_34 {dimension_numbers = #tpu.dot_dimension_numbers<[1], [0], [0], [1], [0, 0, 1, 1], [], []>} : vector<16x16xbf16>, vector<16x128xbf16>, vector<16x128xf32> -> vector<16x128xf32>
    %74 = arith.addf %52, %73 : vector<16x128xf32>
    %75 = vector.extract_strided_slice %24 {offsets = [0, 0, 32], sizes = [2, 8, 16], strides = [1, 1, 1]} : vector<2x8x128xbf16> to vector<2x8x16xbf16>
    %76 = vector.extract_strided_slice %26 {offsets = [0, 0, 32], sizes = [2, 128, 16], strides = [1, 1, 1]} : vector<2x128x128xbf16> to vector<2x128x16xbf16>
    %77 = vector.extract_strided_slice %28 {offsets = [0, 0, 32], sizes = [2, 128, 16], strides = [1, 1, 1]} : vector<2x128x128xbf16> to vector<2x128x16xbf16>
    "tpu.trace_start"() <{level = 10 : i32, message = "bqd,bkd->bqk"}> : () -> ()
    %cst_35 = arith.constant dense<0.000000e+00> : vector<2x8x128xf32>
    %78 = tpu.matmul %75, %76, %cst_35 {dimension_numbers = #tpu.dot_dimension_numbers<[2], [2], [1], [1], [0, 0, 0, 1, 1, 1], [0], [0]>} : vector<2x8x16xbf16>, vector<2x128x16xbf16>, vector<2x8x128xf32> -> vector<2x8x128xf32>
    "tpu.trace_stop"() : () -> ()
    %cst_36 = arith.constant dense<0xFF800000> : vector<2x8xf32>
    %79 = vector.multi_reduction <maximumf>, %78, %cst_36 [2] : vector<2x8x128xf32> to vector<2x8xf32>
    %80 = vector.shape_cast %79 : vector<2x8xf32> to vector<2x8x1xf32>
    %81 = vector.broadcast %80 : vector<2x8x1xf32> to vector<2x8x128xf32>
    %82 = arith.subf %78, %81 : vector<2x8x128xf32>
    %83 = math.exp %82 : vector<2x8x128xf32>
    %cst_37 = arith.constant dense<0.000000e+00> : vector<2x8xf32>
    %84 = vector.multi_reduction <add>, %83, %cst_37 [2] : vector<2x8x128xf32> to vector<2x8xf32>
    %85 = vector.shape_cast %84 : vector<2x8xf32> to vector<2x8x1xf32>
    %86 = tpu.reciprocal %85 {approx = true} : vector<2x8x1xf32> -> vector<2x8x1xf32>
    %87 = vector.broadcast %86 : vector<2x8x1xf32> to vector<2x8x128xf32>
    %88 = arith.mulf %83, %87 : vector<2x8x128xf32>
    %89 = arith.addf %67, %88 : vector<2x8x128xf32>
    %90 = arith.truncf %88 : vector<2x8x128xf32> to vector<2x8x128xbf16>
    "tpu.trace_start"() <{level = 10 : i32, message = "bqk,bkd->bqd"}> : () -> ()
    %cst_38 = arith.constant dense<0.000000e+00> : vector<2x8x16xf32>
    %91 = tpu.matmul %90, %77, %cst_38 {dimension_numbers = #tpu.dot_dimension_numbers<[2], [1], [1], [2], [0, 0, 0, 1, 1, 2], [0], [0]>} : vector<2x8x128xbf16>, vector<2x128x16xbf16>, vector<2x8x16xf32> -> vector<2x8x16xf32>
    "tpu.trace_stop"() : () -> ()
    %92 = vector.shape_cast %91 : vector<2x8x16xf32> to vector<16x16xf32>
    %93 = arith.truncf %92 : vector<16x16xf32> to vector<16x16xbf16>
    %c32 = arith.constant 32 : index
    %c0_39 = arith.constant 0 : index
    %94 = vector.load %arg9[%c32, %c0_39] : memref<128x128xbf16, #tpu.memory_space<vmem>>, vector<16x128xbf16>
    %cst_40 = arith.constant dense<0.000000e+00> : vector<16x128xf32>
    %95 = tpu.matmul %93, %94, %cst_40 {dimension_numbers = #tpu.dot_dimension_numbers<[1], [0], [0], [1], [0, 0, 1, 1], [], []>} : vector<16x16xbf16>, vector<16x128xbf16>, vector<16x128xf32> -> vector<16x128xf32>
    %96 = arith.addf %74, %95 : vector<16x128xf32>
    %97 = vector.extract_strided_slice %24 {offsets = [0, 0, 48], sizes = [2, 8, 16], strides = [1, 1, 1]} : vector<2x8x128xbf16> to vector<2x8x16xbf16>
    %98 = vector.extract_strided_slice %26 {offsets = [0, 0, 48], sizes = [2, 128, 16], strides = [1, 1, 1]} : vector<2x128x128xbf16> to vector<2x128x16xbf16>
    %99 = vector.extract_strided_slice %28 {offsets = [0, 0, 48], sizes = [2, 128, 16], strides = [1, 1, 1]} : vector<2x128x128xbf16> to vector<2x128x16xbf16>
    "tpu.trace_start"() <{level = 10 : i32, message = "bqd,bkd->bqk"}> : () -> ()
    %cst_41 = arith.constant dense<0.000000e+00> : vector<2x8x128xf32>
    %100 = tpu.matmul %97, %98, %cst_41 {dimension_numbers = #tpu.dot_dimension_numbers<[2], [2], [1], [1], [0, 0, 0, 1, 1, 1], [0], [0]>} : vector<2x8x16xbf16>, vector<2x128x16xbf16>, vector<2x8x128xf32> -> vector<2x8x128xf32>
    "tpu.trace_stop"() : () -> ()
    %cst_42 = arith.constant dense<0xFF800000> : vector<2x8xf32>
    %101 = vector.multi_reduction <maximumf>, %100, %cst_42 [2] : vector<2x8x128xf32> to vector<2x8xf32>
    %102 = vector.shape_cast %101 : vector<2x8xf32> to vector<2x8x1xf32>
    %103 = vector.broadcast %102 : vector<2x8x1xf32> to vector<2x8x128xf32>
    %104 = arith.subf %100, %103 : vector<2x8x128xf32>
    %105 = math.exp %104 : vector<2x8x128xf32>
    %cst_43 = arith.constant dense<0.000000e+00> : vector<2x8xf32>
    %106 = vector.multi_reduction <add>, %105, %cst_43 [2] : vector<2x8x128xf32> to vector<2x8xf32>
    %107 = vector.shape_cast %106 : vector<2x8xf32> to vector<2x8x1xf32>
    %108 = tpu.reciprocal %107 {approx = true} : vector<2x8x1xf32> -> vector<2x8x1xf32>
    %109 = vector.broadcast %108 : vector<2x8x1xf32> to vector<2x8x128xf32>
    %110 = arith.mulf %105, %109 : vector<2x8x128xf32>
    %111 = arith.addf %89, %110 : vector<2x8x128xf32>
    %112 = arith.truncf %110 : vector<2x8x128xf32> to vector<2x8x128xbf16>
    "tpu.trace_start"() <{level = 10 : i32, message = "bqk,bkd->bqd"}> : () -> ()
    %cst_44 = arith.constant dense<0.000000e+00> : vector<2x8x16xf32>
    %113 = tpu.matmul %112, %99, %cst_44 {dimension_numbers = #tpu.dot_dimension_numbers<[2], [1], [1], [2], [0, 0, 0, 1, 1, 2], [0], [0]>} : vector<2x8x128xbf16>, vector<2x128x16xbf16>, vector<2x8x16xf32> -> vector<2x8x16xf32>
    "tpu.trace_stop"() : () -> ()
    %114 = vector.shape_cast %113 : vector<2x8x16xf32> to vector<16x16xf32>
    %115 = arith.truncf %114 : vector<16x16xf32> to vector<16x16xbf16>
    %c48 = arith.constant 48 : index
    %c0_45 = arith.constant 0 : index
    %116 = vector.load %arg9[%c48, %c0_45] : memref<128x128xbf16, #tpu.memory_space<vmem>>, vector<16x128xbf16>
    %cst_46 = arith.constant dense<0.000000e+00> : vector<16x128xf32>
    %117 = tpu.matmul %115, %116, %cst_46 {dimension_numbers = #tpu.dot_dimension_numbers<[1], [0], [0], [1], [0, 0, 1, 1], [], []>} : vector<16x16xbf16>, vector<16x128xbf16>, vector<16x128xf32> -> vector<16x128xf32>
    %118 = arith.addf %96, %117 : vector<16x128xf32>
    %119 = vector.extract_strided_slice %24 {offsets = [0, 0, 64], sizes = [2, 8, 16], strides = [1, 1, 1]} : vector<2x8x128xbf16> to vector<2x8x16xbf16>
    %120 = vector.extract_strided_slice %26 {offsets = [0, 0, 64], sizes = [2, 128, 16], strides = [1, 1, 1]} : vector<2x128x128xbf16> to vector<2x128x16xbf16>
    %121 = vector.extract_strided_slice %28 {offsets = [0, 0, 64], sizes = [2, 128, 16], strides = [1, 1, 1]} : vector<2x128x128xbf16> to vector<2x128x16xbf16>
    "tpu.trace_start"() <{level = 10 : i32, message = "bqd,bkd->bqk"}> : () -> ()
    %cst_47 = arith.constant dense<0.000000e+00> : vector<2x8x128xf32>
    %122 = tpu.matmul %119, %120, %cst_47 {dimension_numbers = #tpu.dot_dimension_numbers<[2], [2], [1], [1], [0, 0, 0, 1, 1, 1], [0], [0]>} : vector<2x8x16xbf16>, vector<2x128x16xbf16>, vector<2x8x128xf32> -> vector<2x8x128xf32>
    "tpu.trace_stop"() : () -> ()
    %cst_48 = arith.constant dense<0xFF800000> : vector<2x8xf32>
    %123 = vector.multi_reduction <maximumf>, %122, %cst_48 [2] : vector<2x8x128xf32> to vector<2x8xf32>
    %124 = vector.shape_cast %123 : vector<2x8xf32> to vector<2x8x1xf32>
    %125 = vector.broadcast %124 : vector<2x8x1xf32> to vector<2x8x128xf32>
    %126 = arith.subf %122, %125 : vector<2x8x128xf32>
    %127 = math.exp %126 : vector<2x8x128xf32>
    %cst_49 = arith.constant dense<0.000000e+00> : vector<2x8xf32>
    %128 = vector.multi_reduction <add>, %127, %cst_49 [2] : vector<2x8x128xf32> to vector<2x8xf32>
    %129 = vector.shape_cast %128 : vector<2x8xf32> to vector<2x8x1xf32>
    %130 = tpu.reciprocal %129 {approx = true} : vector<2x8x1xf32> -> vector<2x8x1xf32>
    %131 = vector.broadcast %130 : vector<2x8x1xf32> to vector<2x8x128xf32>
    %132 = arith.mulf %127, %131 : vector<2x8x128xf32>
    %133 = arith.addf %111, %132 : vector<2x8x128xf32>
    %134 = arith.truncf %132 : vector<2x8x128xf32> to vector<2x8x128xbf16>
    "tpu.trace_start"() <{level = 10 : i32, message = "bqk,bkd->bqd"}> : () -> ()
    %cst_50 = arith.constant dense<0.000000e+00> : vector<2x8x16xf32>
    %135 = tpu.matmul %134, %121, %cst_50 {dimension_numbers = #tpu.dot_dimension_numbers<[2], [1], [1], [2], [0, 0, 0, 1, 1, 2], [0], [0]>} : vector<2x8x128xbf16>, vector<2x128x16xbf16>, vector<2x8x16xf32> -> vector<2x8x16xf32>
    "tpu.trace_stop"() : () -> ()
    %136 = vector.shape_cast %135 : vector<2x8x16xf32> to vector<16x16xf32>
    %137 = arith.truncf %136 : vector<16x16xf32> to vector<16x16xbf16>
    %c64 = arith.constant 64 : index
    %c0_51 = arith.constant 0 : index
    %138 = vector.load %arg9[%c64, %c0_51] : memref<128x128xbf16, #tpu.memory_space<vmem>>, vector<16x128xbf16>
    %cst_52 = arith.constant dense<0.000000e+00> : vector<16x128xf32>
    %139 = tpu.matmul %137, %138, %cst_52 {dimension_numbers = #tpu.dot_dimension_numbers<[1], [0], [0], [1], [0, 0, 1, 1], [], []>} : vector<16x16xbf16>, vector<16x128xbf16>, vector<16x128xf32> -> vector<16x128xf32>
    %140 = arith.addf %118, %139 : vector<16x128xf32>
    %141 = vector.extract_strided_slice %24 {offsets = [0, 0, 80], sizes = [2, 8, 16], strides = [1, 1, 1]} : vector<2x8x128xbf16> to vector<2x8x16xbf16>
    %142 = vector.extract_strided_slice %26 {offsets = [0, 0, 80], sizes = [2, 128, 16], strides = [1, 1, 1]} : vector<2x128x128xbf16> to vector<2x128x16xbf16>
    %143 = vector.extract_strided_slice %28 {offsets = [0, 0, 80], sizes = [2, 128, 16], strides = [1, 1, 1]} : vector<2x128x128xbf16> to vector<2x128x16xbf16>
    "tpu.trace_start"() <{level = 10 : i32, message = "bqd,bkd->bqk"}> : () -> ()
    %cst_53 = arith.constant dense<0.000000e+00> : vector<2x8x128xf32>
    %144 = tpu.matmul %141, %142, %cst_53 {dimension_numbers = #tpu.dot_dimension_numbers<[2], [2], [1], [1], [0, 0, 0, 1, 1, 1], [0], [0]>} : vector<2x8x16xbf16>, vector<2x128x16xbf16>, vector<2x8x128xf32> -> vector<2x8x128xf32>
    "tpu.trace_stop"() : () -> ()
    %cst_54 = arith.constant dense<0xFF800000> : vector<2x8xf32>
    %145 = vector.multi_reduction <maximumf>, %144, %cst_54 [2] : vector<2x8x128xf32> to vector<2x8xf32>
    %146 = vector.shape_cast %145 : vector<2x8xf32> to vector<2x8x1xf32>
    %147 = vector.broadcast %146 : vector<2x8x1xf32> to vector<2x8x128xf32>
    %148 = arith.subf %144, %147 : vector<2x8x128xf32>
    %149 = math.exp %148 : vector<2x8x128xf32>
    %cst_55 = arith.constant dense<0.000000e+00> : vector<2x8xf32>
    %150 = vector.multi_reduction <add>, %149, %cst_55 [2] : vector<2x8x128xf32> to vector<2x8xf32>
    %151 = vector.shape_cast %150 : vector<2x8xf32> to vector<2x8x1xf32>
    %152 = tpu.reciprocal %151 {approx = true} : vector<2x8x1xf32> -> vector<2x8x1xf32>
    %153 = vector.broadcast %152 : vector<2x8x1xf32> to vector<2x8x128xf32>
    %154 = arith.mulf %149, %153 : vector<2x8x128xf32>
    %155 = arith.addf %133, %154 : vector<2x8x128xf32>
    %156 = arith.truncf %154 : vector<2x8x128xf32> to vector<2x8x128xbf16>
    "tpu.trace_start"() <{level = 10 : i32, message = "bqk,bkd->bqd"}> : () -> ()
    %cst_56 = arith.constant dense<0.000000e+00> : vector<2x8x16xf32>
    %157 = tpu.matmul %156, %143, %cst_56 {dimension_numbers = #tpu.dot_dimension_numbers<[2], [1], [1], [2], [0, 0, 0, 1, 1, 2], [0], [0]>} : vector<2x8x128xbf16>, vector<2x128x16xbf16>, vector<2x8x16xf32> -> vector<2x8x16xf32>
    "tpu.trace_stop"() : () -> ()
    %158 = vector.shape_cast %157 : vector<2x8x16xf32> to vector<16x16xf32>
    %159 = arith.truncf %158 : vector<16x16xf32> to vector<16x16xbf16>
    %c80 = arith.constant 80 : index
    %c0_57 = arith.constant 0 : index
    %160 = vector.load %arg9[%c80, %c0_57] : memref<128x128xbf16, #tpu.memory_space<vmem>>, vector<16x128xbf16>
    %cst_58 = arith.constant dense<0.000000e+00> : vector<16x128xf32>
    %161 = tpu.matmul %159, %160, %cst_58 {dimension_numbers = #tpu.dot_dimension_numbers<[1], [0], [0], [1], [0, 0, 1, 1], [], []>} : vector<16x16xbf16>, vector<16x128xbf16>, vector<16x128xf32> -> vector<16x128xf32>
    %162 = arith.addf %140, %161 : vector<16x128xf32>
    %163 = vector.extract_strided_slice %24 {offsets = [0, 0, 96], sizes = [2, 8, 16], strides = [1, 1, 1]} : vector<2x8x128xbf16> to vector<2x8x16xbf16>
    %164 = vector.extract_strided_slice %26 {offsets = [0, 0, 96], sizes = [2, 128, 16], strides = [1, 1, 1]} : vector<2x128x128xbf16> to vector<2x128x16xbf16>
    %165 = vector.extract_strided_slice %28 {offsets = [0, 0, 96], sizes = [2, 128, 16], strides = [1, 1, 1]} : vector<2x128x128xbf16> to vector<2x128x16xbf16>
    "tpu.trace_start"() <{level = 10 : i32, message = "bqd,bkd->bqk"}> : () -> ()
    %cst_59 = arith.constant dense<0.000000e+00> : vector<2x8x128xf32>
    %166 = tpu.matmul %163, %164, %cst_59 {dimension_numbers = #tpu.dot_dimension_numbers<[2], [2], [1], [1], [0, 0, 0, 1, 1, 1], [0], [0]>} : vector<2x8x16xbf16>, vector<2x128x16xbf16>, vector<2x8x128xf32> -> vector<2x8x128xf32>
    "tpu.trace_stop"() : () -> ()
    %cst_60 = arith.constant dense<0xFF800000> : vector<2x8xf32>
    %167 = vector.multi_reduction <maximumf>, %166, %cst_60 [2] : vector<2x8x128xf32> to vector<2x8xf32>
    %168 = vector.shape_cast %167 : vector<2x8xf32> to vector<2x8x1xf32>
    %169 = vector.broadcast %168 : vector<2x8x1xf32> to vector<2x8x128xf32>
    %170 = arith.subf %166, %169 : vector<2x8x128xf32>
    %171 = math.exp %170 : vector<2x8x128xf32>
    %cst_61 = arith.constant dense<0.000000e+00> : vector<2x8xf32>
    %172 = vector.multi_reduction <add>, %171, %cst_61 [2] : vector<2x8x128xf32> to vector<2x8xf32>
    %173 = vector.shape_cast %172 : vector<2x8xf32> to vector<2x8x1xf32>
    %174 = tpu.reciprocal %173 {approx = true} : vector<2x8x1xf32> -> vector<2x8x1xf32>
    %175 = vector.broadcast %174 : vector<2x8x1xf32> to vector<2x8x128xf32>
    %176 = arith.mulf %171, %175 : vector<2x8x128xf32>
    %177 = arith.addf %155, %176 : vector<2x8x128xf32>
    %178 = arith.truncf %176 : vector<2x8x128xf32> to vector<2x8x128xbf16>
    "tpu.trace_start"() <{level = 10 : i32, message = "bqk,bkd->bqd"}> : () -> ()
    %cst_62 = arith.constant dense<0.000000e+00> : vector<2x8x16xf32>
    %179 = tpu.matmul %178, %165, %cst_62 {dimension_numbers = #tpu.dot_dimension_numbers<[2], [1], [1], [2], [0, 0, 0, 1, 1, 2], [0], [0]>} : vector<2x8x128xbf16>, vector<2x128x16xbf16>, vector<2x8x16xf32> -> vector<2x8x16xf32>
    "tpu.trace_stop"() : () -> ()
    %180 = vector.shape_cast %179 : vector<2x8x16xf32> to vector<16x16xf32>
    %181 = arith.truncf %180 : vector<16x16xf32> to vector<16x16xbf16>
    %c96 = arith.constant 96 : index
    %c0_63 = arith.constant 0 : index
    %182 = vector.load %arg9[%c96, %c0_63] : memref<128x128xbf16, #tpu.memory_space<vmem>>, vector<16x128xbf16>
    %cst_64 = arith.constant dense<0.000000e+00> : vector<16x128xf32>
    %183 = tpu.matmul %181, %182, %cst_64 {dimension_numbers = #tpu.dot_dimension_numbers<[1], [0], [0], [1], [0, 0, 1, 1], [], []>} : vector<16x16xbf16>, vector<16x128xbf16>, vector<16x128xf32> -> vector<16x128xf32>
    %184 = arith.addf %162, %183 : vector<16x128xf32>
    %185 = vector.extract_strided_slice %24 {offsets = [0, 0, 112], sizes = [2, 8, 16], strides = [1, 1, 1]} : vector<2x8x128xbf16> to vector<2x8x16xbf16>
    %186 = vector.extract_strided_slice %26 {offsets = [0, 0, 112], sizes = [2, 128, 16], strides = [1, 1, 1]} : vector<2x128x128xbf16> to vector<2x128x16xbf16>
    %187 = vector.extract_strided_slice %28 {offsets = [0, 0, 112], sizes = [2, 128, 16], strides = [1, 1, 1]} : vector<2x128x128xbf16> to vector<2x128x16xbf16>
    "tpu.trace_start"() <{level = 10 : i32, message = "bqd,bkd->bqk"}> : () -> ()
    %cst_65 = arith.constant dense<0.000000e+00> : vector<2x8x128xf32>
    %188 = tpu.matmul %185, %186, %cst_65 {dimension_numbers = #tpu.dot_dimension_numbers<[2], [2], [1], [1], [0, 0, 0, 1, 1, 1], [0], [0]>} : vector<2x8x16xbf16>, vector<2x128x16xbf16>, vector<2x8x128xf32> -> vector<2x8x128xf32>
    "tpu.trace_stop"() : () -> ()
    %cst_66 = arith.constant dense<0xFF800000> : vector<2x8xf32>
    %189 = vector.multi_reduction <maximumf>, %188, %cst_66 [2] : vector<2x8x128xf32> to vector<2x8xf32>
    %190 = vector.shape_cast %189 : vector<2x8xf32> to vector<2x8x1xf32>
    %191 = vector.broadcast %190 : vector<2x8x1xf32> to vector<2x8x128xf32>
    %192 = arith.subf %188, %191 : vector<2x8x128xf32>
    %193 = math.exp %192 : vector<2x8x128xf32>
    %cst_67 = arith.constant dense<0.000000e+00> : vector<2x8xf32>
    %194 = vector.multi_reduction <add>, %193, %cst_67 [2] : vector<2x8x128xf32> to vector<2x8xf32>
    %195 = vector.shape_cast %194 : vector<2x8xf32> to vector<2x8x1xf32>
    %196 = tpu.reciprocal %195 {approx = true} : vector<2x8x1xf32> -> vector<2x8x1xf32>
    %197 = vector.broadcast %196 : vector<2x8x1xf32> to vector<2x8x128xf32>
    %198 = arith.mulf %193, %197 : vector<2x8x128xf32>
    %199 = arith.addf %177, %198 : vector<2x8x128xf32>
    %200 = arith.truncf %198 : vector<2x8x128xf32> to vector<2x8x128xbf16>
    "tpu.trace_start"() <{level = 10 : i32, message = "bqk,bkd->bqd"}> : () -> ()
    %cst_68 = arith.constant dense<0.000000e+00> : vector<2x8x16xf32>
    %201 = tpu.matmul %200, %187, %cst_68 {dimension_numbers = #tpu.dot_dimension_numbers<[2], [1], [1], [2], [0, 0, 0, 1, 1, 2], [0], [0]>} : vector<2x8x128xbf16>, vector<2x128x16xbf16>, vector<2x8x16xf32> -> vector<2x8x16xf32>
    "tpu.trace_stop"() : () -> ()
    %202 = vector.shape_cast %201 : vector<2x8x16xf32> to vector<16x16xf32>
    %203 = arith.truncf %202 : vector<16x16xf32> to vector<16x16xbf16>
    %c112 = arith.constant 112 : index
    %c0_69 = arith.constant 0 : index
    %204 = vector.load %arg9[%c112, %c0_69] : memref<128x128xbf16, #tpu.memory_space<vmem>>, vector<16x128xbf16>
    %cst_70 = arith.constant dense<0.000000e+00> : vector<16x128xf32>
    %205 = tpu.matmul %203, %204, %cst_70 {dimension_numbers = #tpu.dot_dimension_numbers<[1], [0], [0], [1], [0, 0, 1, 1], [], []>} : vector<16x16xbf16>, vector<16x128xbf16>, vector<16x128xf32> -> vector<16x128xf32>
    %206 = arith.addf %184, %205 : vector<16x128xf32>
    %c0_71 = arith.constant 0 : index
    %c0_72 = arith.constant 0 : index
    %207 = vector.load %arg10[%c0_71, %c0_72] : memref<1x128xf32, #tpu.memory_space<vmem>>, vector<1x128xf32>
    %208 = vector.broadcast %207 : vector<1x128xf32> to vector<16x128xf32>
    %209 = arith.addf %206, %208 : vector<16x128xf32>
    %210 = vector.shape_cast %209 : vector<16x128xf32> to vector<2x8x128xf32>
    %c0_73 = arith.constant 0 : index
    %c0_74 = arith.constant 0 : index
    %c0_75 = arith.constant 0 : index
    %211 = vector.load %arg11[%c0_73, %c0_74, %c0_75] : memref<2x8x128xf32, #tpu.memory_space<vmem>>, vector<2x8x128xf32>
    tpu.vector_store %arg11[%c0_73, %c0_74, %c0_75], %210 {strides = array<i32>} : memref<2x8x128xf32, #tpu.memory_space<vmem>>, vector<2x8x128xf32>,
    %cst_76 = arith.constant 1.250000e-01 : f32
    %212 = vector.broadcast %cst_76 : f32 to vector<2x8x128xf32>
    %213 = arith.mulf %199, %212 : vector<2x8x128xf32>
    %c0_77 = arith.constant 0 : index
    %c0_78 = arith.constant 0 : index
    %c0_79 = arith.constant 0 : index
    %214 = vector.load %arg12[%c0_77, %c0_78, %c0_79] : memref<2x8x128xf32, #tpu.memory_space<vmem>>, vector<2x8x128xf32>
    tpu.vector_store %arg12[%c0_77, %c0_78, %c0_79], %213 {strides = array<i32>} : memref<2x8x128xf32, #tpu.memory_space<vmem>>, vector<2x8x128xf32>,
    return
  }
  func.func @transform_0(%arg0: i32) -> (i32, i32, i32) {
    %c0_i32 = arith.constant 0 : i32
    %c0_i32_0 = arith.constant 0 : i32
    %c0_i32_1 = arith.constant 0 : i32
    return %arg0, %c0_i32, %c0_i32_0 : i32, i32, i32
  }
  func.func @transform_1(%arg0: i32) -> (i32, i32, i32) {
    %c0_i32 = arith.constant 0 : i32
    %c0_i32_0 = arith.constant 0 : i32
    %c0_i32_1 = arith.constant 0 : i32
    return %arg0, %c0_i32, %c0_i32_0 : i32, i32, i32
  }
  func.func @transform_2(%arg0: i32) -> (i32, i32) {
    %c0_i32 = arith.constant 0 : i32
    %c0_i32_0 = arith.constant 0 : i32
    %c0_i32_1 = arith.constant 0 : i32
    return %c0_i32, %c0_i32_0 : i32, i32
  }
  func.func @transform_3(%arg0: i32) -> (i32, i32) {
    %c0_i32 = arith.constant 0 : i32
    %c0_i32_0 = arith.constant 0 : i32
    %c0_i32_1 = arith.constant 0 : i32
    return %c0_i32, %c0_i32_0 : i32, i32
  }
  func.func @transform_4(%arg0: i32) -> (i32, i32) {
    %c0_i32 = arith.constant 0 : i32
    %c0_i32_0 = arith.constant 0 : i32
    %c0_i32_1 = arith.constant 0 : i32
    return %c0_i32, %c0_i32_0 : i32, i32
  }
  func.func @transform_5(%arg0: i32) -> (i32, i32) {
    %c0_i32 = arith.constant 0 : i32
    %c0_i32_0 = arith.constant 0 : i32
    %c0_i32_1 = arith.constant 0 : i32
    return %c0_i32, %c0_i32_0 : i32, i32
  }
  func.func @transform_6(%arg0: i32) -> (i32, i32) {
    %c0_i32 = arith.constant 0 : i32
    %c0_i32_0 = arith.constant 0 : i32
    %c0_i32_1 = arith.constant 0 : i32
    return %c0_i32, %c0_i32_0 : i32, i32
  }
  func.func @transform_7(%arg0: i32) -> (i32, i32) {
    %c0_i32 = arith.constant 0 : i32
    %c0_i32_0 = arith.constant 0 : i32
    %c0_i32_1 = arith.constant 0 : i32
    return %c0_i32, %c0_i32_0 : i32, i32
  }
  func.func @transform_8(%arg0: i32) -> (i32, i32) {
    %c0_i32 = arith.constant 0 : i32
    %c0_i32_0 = arith.constant 0 : i32
    %c0_i32_1 = arith.constant 0 : i32
    return %c0_i32, %c0_i32_0 : i32, i32
  }
  func.func @transform_9(%arg0: i32) -> (i32, i32) {
    %c0_i32 = arith.constant 0 : i32
    %c0_i32_0 = arith.constant 0 : i32
    %c0_i32_1 = arith.constant 0 : i32
    return %c0_i32, %c0_i32_0 : i32, i32
  }
  func.func @transform_10(%arg0: i32) -> (i32, i32, i32) {
    %c0_i32 = arith.constant 0 : i32
    %c0_i32_0 = arith.constant 0 : i32
    %c0_i32_1 = arith.constant 0 : i32
    return %arg0, %c0_i32, %c0_i32_0 : i32, i32, i32
  }
  func.func @transform_11(%arg0: i32) -> (i32, i32, i32) {
    %c0_i32 = arith.constant 0 : i32
    %c0_i32_0 = arith.constant 0 : i32
    %c0_i32_1 = arith.constant 0 : i32
    return %arg0, %c0_i32, %c0_i32_0 : i32, i32, i32
  }
}

</mosaic_0001>

<bundles_post_ra>
// kernel: tpu_custom_call.1
= control target key start
LH: loop header
LB: loop body
LE: loop exit
PB: predicated region body
PF: predicated region fallthrough
CT: control target
= control target key end

     0   :  { %s7933_s0 = inlined_call_operand.hbm [shape: f32[4,8,128], index: 0, kind: input, shape index: {}]   ;;  %s7934_s1 = inlined_call_operand.hbm [shape: f32[4,128,128], index: 1, kind: input, shape index: {}]   ;;  %s7935_s2 = inlined_call_operand.hbm [shape: bf16[128,128], index: 2, kind: input, shape index: {}]   ;;  %s7936_s3 = inlined_call_operand.vmem [shape: f32[1,128], index: 3, kind: input, shape index: {}]   ;;  %s7937_s4 = inlined_call_operand.hbm [shape: bf16[128,128], index: 4, kind: input, shape index: {}]   ;;  %s7938_s5 = inlined_call_operand.vmem [shape: f32[1,128], index: 5, kind: input, shape index: {}]   ;;  %s7939_s6 = inlined_call_operand.hbm [shape: bf16[128,128], index: 6, kind: input, shape index: {}]   ;;  %s7940_s7 = inlined_call_operand.vmem [shape: f32[1,128], index: 7, kind: input, shape index: {}]   ;;  %s7941_s8 = inlined_call_operand.hbm [shape: bf16[128,128], index: 8, kind: input, shape index: {}]   ;;  %s7942_s9 = inlined_call_operand.vmem [shape: f32[1,128], index: 9, kind: input, shape index: {}]   ;;  %s7943_s10 = inlined_call_operand.hbm [shape: f32[4,8,128], index: 10, kind: output, shape index: {0}]   ;;  %s7944_s11 = inlined_call_operand.hbm [shape: f32[4,8,128], index: 11, kind: output, shape index: {1}]  }
   0x1   :  { %7952 = sst [smem:[#allocation25_spill]] %s7933_s0 }
   0x2   :  { %7953 = sst [smem:[#allocation26_spill]] %s7935_s2 }
   0x3   :  { %7954 = sst [smem:[#allocation27_spill]] %s7937_s4 }
   0x4   :  { %7955 = sst [smem:[#allocation28_spill]] %s7939_s6 }
   0x5   :  { %7956 = sst [smem:[#allocation29_spill]] %s7942_s9 }
   0x6   :  { %7957 = sst [smem:[#allocation30_spill]] %s7943_s10 }
   0x7   :  { %7958 = sst [smem:[#allocation31_spill]] %s7944_s11 }
   0x8   :  { %17 = vsyncpa [#allocation3], 0 }
   0x9   :  { %19 = vsyncpa [#allocation3 + $0x1], 0 }
   0xa   :  { %20 = vsyncpa [#allocation6], 0 }
   0xb   :  { %22 = vsyncpa [#allocation6 + $0x1], 0 }
   0xc   :  { %23 = vsyncpa [#allocation9], 0 }
   0xd   :  { %24 = vsyncpa [#allocation12], 0 }
   0xe   :  { %25 = vsyncpa [#allocation4], 0 }
   0xf   :  { %27 = vsyncpa [#allocation4 + $0x1], 0 }
  0x10   :  { %28 = vsyncpa [#allocation15], 0 }
  0x11   :  { %30 = vsyncpa [#allocation15 + $0x1], 0  ;;  %s6186_s17 = smov 0   ;;  %s6188_s18 = smov 0  }
  0x12   :  { %s6190_s19 = smov 0   ;;  %s6192_s20 = smov 0  }
  0x13 LB: > { %7959 = sst [smem:[#allocation23_spill]] %s6089_s17  ;;  %s6207_s21 = sadd.s32 4294967295, %s6101_s20   ;;  %s6101_s20 = sphi %s6192_s20, %s7992_s20   ;;  %s6097_s19 = sphi %s6190_s19, %s7991_s19   ;;  %s6093_s18 = sphi %s6188_s18, %s7990_s18   ;;  %s6089_s17 = sphi %s6186_s17, %s7989_s17  }
  0x14   : > { %s4346_s22 = sadd.s32 4294967294, %s6101_s20   ;;  %p56_p0 = scmp.ne.s32.totalorder %s6093_s18, %s6089_s17 }
  0x15   : > { %p7946_p1 = scmp.eq.s32.totalorder %s6207_s21, 0  ;;  %p280_p3 = scmp.eq.s32.totalorder %s4346_s22, 1 }
  0x16   : > { %p4347_p5 = scmp.ge.s32.totalorder %s6101_s20, 1  ;;  %p313_p7 = scmp.lt.s32.totalorder %s6101_s20, 3 }
  0x17   : > { %p6216_p4 = por %p7946_p1, %p56_p0  ;;  %p6221_p6 = por %p280_p3, %p56_p0 }
  0x18   : > { %p6226_p8 = pnand %p4347_p5, %p313_p7  ;;  %s6103_s26 = smov [#allocation7]  }
  0x19   : > { %s7960_s23 = scalar_select %p6216_p4, 1, 0 }
  0x1a   : > { %s7961_s24 = scalar_select %p6221_p6, 1, 0 }
  0x1b   : > { %s7963_s25 = scalar_select %p6226_p8, 1, 0 }
  0x1c   : > { %7962 = sst [smem:[#allocation24_spill]] %s7961_s24  ;;  %s325_s27 = sshll.u32 %s6103_s26, 4  ;;  %s6230_s27 = int_to_ptr.vmem [resolvable:$true] %s325_s27 }
  0x1d   : > { %p5631_p9 = pneg %p6226_p8  ;;  %s6104_s29 = smov [#allocation8]  }
  0x1e   : > { %s341_s30 = sshll.u32 %s6104_s29, 4  ;;  %s6105_s12 = smov [#allocation10]   ;;  %s6241_s30 = int_to_ptr.vmem [resolvable:$true] %s341_s30 }
  0x1f   : > { %p6237_p11 = pnand %p5631_p9, %p7946_p1  ;;  %s6243_s13 = sshll.u32 %s6105_s12, 4  ;;  %s358_s13 = int_to_ptr.vmem [resolvable:$true] %s6243_s13 }
  0x20   : > { %s7965_s2 = sld [smem:[#allocation26_spill]] }
  0x21   : > { %p6253_p13 = pneg %p6237_p11 }
  0x26   : > { %s5815_s16 = scalar_lea.hbm %s7965_s2, 1024 }
  0x27   : > { %p5816_p12 = scmp.ne.s32.totalorder %s7965_s2, %s5815_s16  ;;  %p5822_p5 = scmp.lt.u32.totalorder %s5815_s16, %s7965_s2 }
  0x29   : > { %p5818_p0 = pnand %p6253_p13, %p5816_p12 }
  0x2b   : > { %p5819_p3 = pneg %p5818_p0 }
  0x2d   : > { %p5824_p7 = pnand %p5822_p5, %p5819_p3 }
  0x2f   : > { %5827 = shalt.err (!%p5824_p7)
}
  0x30   : > { %s5828_s14 = scalar_lea.vmem %s6230_s27, 1024  ;;  %p5836_p2 = scmp.lt.s32.totalorder %s6230_s27, %s6230_s27 }
  0x31   : > { %p5829_p9 = scmp.ne.s32.totalorder %s6230_s27, %s5828_s14  ;;  %p5837_p6 = scmp.lt.s32.totalorder %s5828_s14, %s5828_s14 }
  0x33   : > { %p5831_p10 = pnand %p5829_p9, %p6253_p13  ;;  %p5838_p12 = por %p5837_p6, %p5836_p2 }
  0x35   : > { %p5832_p1 = pneg %p5831_p10 }
  0x37   : > { %p5839_p0 = pnand %p5838_p12, %p5832_p1 }
  0x39   : > { %5842 = shalt.err (!%p5839_p0)
}
  0x3a   : > { %s6106_s15 = smov 64   ;;  %s6107_s16 = smov 4  }
  0x3b   : > { %5634 = dma.hbm_to_vmem [thread:$0]  (!%p6237_p11), %s7965_s2, 1024, %s6230_s27, [#allocation6], %s6106_s15, %s6106_s15, %s6107_s16  }
  0x3c   : > { %s7967_s4 = sld [smem:[#allocation27_spill]] }
  0x42   : > { %s5843_s14 = scalar_lea.hbm %s7967_s4, 1024 }
  0x43   : > { %p5844_p1 = scmp.ne.s32.totalorder %s7967_s4, %s5843_s14  ;;  %p5850_p10 = scmp.lt.u32.totalorder %s5843_s14, %s7967_s4 }
  0x45   : > { %p5846_p2 = pnand %p5844_p1, %p6253_p13 }
  0x47   : > { %p5847_p6 = pneg %p5846_p2 }
  0x49   : > { %p5852_p3 = pnand %p5850_p10, %p5847_p6 }
  0x4b   : > { %5855 = shalt.err (!%p5852_p3)
}
  0x4c   : > { %s5856_s27 = scalar_lea.vmem %s6241_s30, 1024  ;;  %p5864_p12 = scmp.lt.s32.totalorder %s6241_s30, %s6241_s30 }
  0x4d   : > { %p5857_p5 = scmp.ne.s32.totalorder %s6241_s30, %s5856_s27  ;;  %p5865_p0 = scmp.lt.s32.totalorder %s5856_s27, %s5856_s27 }
  0x4f   : > { %p5859_p7 = pnand %p5857_p5, %p6253_p13  ;;  %p5866_p1 = por %p5865_p0, %p5864_p12 }
  0x51   : > { %p5860_p9 = pneg %p5859_p7 }
  0x53   : > { %p5867_p2 = pnand %p5866_p1, %p5860_p9 }
  0x55   : > { %5870 = shalt.err (!%p5867_p2)
}
  0x56   : > { %5637 = dma.hbm_to_vmem [thread:$0]  (!%p6237_p11), %s7967_s4, 1024, %s6241_s30, [#allocation9], %s6106_s15, %s6106_s15, %s6107_s16  }
  0x57   : > { %s7968_s6 = sld [smem:[#allocation28_spill]] }
  0x5d   : > { %s5871_s22 = scalar_lea.hbm %s7968_s6, 1024 }
  0x5e   : > { %p5872_p6 = scmp.ne.s32.totalorder %s7968_s6, %s5871_s22  ;;  %p5878_p5 = scmp.lt.u32.totalorder %s5871_s22, %s7968_s6 }
  0x60   : > { %p5874_p10 = pnand %p5872_p6, %p6253_p13 }
  0x62   : > { %p5875_p3 = pneg %p5874_p10 }
  0x64   : > { %p5880_p7 = pnand %p5878_p5, %p5875_p3 }
  0x66   : > { %5883 = shalt.err (!%p5880_p7)
}
  0x67   : > { %s5884_s27 = scalar_lea.vmem %s358_s13, 1024  ;;  %p5892_p1 = scmp.lt.s32.totalorder %s358_s13, %s358_s13 }
  0x68   : > { %p5885_p9 = scmp.ne.s32.totalorder %s358_s13, %s5884_s27  ;;  %p5893_p2 = scmp.lt.s32.totalorder %s5884_s27, %s5884_s27 }
  0x6a   : > { %p5887_p12 = pnand %p5885_p9, %p6253_p13  ;;  %p5894_p4 = por %p5893_p2, %p5892_p1 }
  0x6c   : > { %p5888_p0 = pneg %p5887_p12 }
  0x6e   : > { %p5895_p8 = pnand %p5894_p4, %p5888_p0 }
  0x70   : > { %5898 = shalt.err (!%p5895_p8)
}
  0x71   : > { %5640 = dma.hbm_to_vmem [thread:$0]  (!%p6237_p11), %s7968_s6, 1024, %s358_s13, [#allocation9], %s6106_s15, %s6106_s15, %s6107_s16  }
  0x72   : > { %s6108_s10 = smov [#allocation11]   ;;  %s5899_s26 = scalar_lea.hbm %s7941_s8, 1024 }
  0x73   : > { %s373_s11 = sshll.u32 %s6108_s10, 4  ;;  %p5900_p4 = scmp.ne.s32.totalorder %s7941_s8, %s5899_s26  ;;  %s374_s11 = int_to_ptr.vmem [resolvable:$true] %s373_s11 }
  0x74   : > { %p5906_p10 = scmp.lt.u32.totalorder %s5899_s26, %s7941_s8 }
  0x75   : > { %p5902_p8 = pnand %p5900_p4, %p6253_p13 }
  0x77   : > { %p5903_p6 = pneg %p5902_p8 }
  0x79   : > { %p5908_p3 = pnand %p5906_p10, %p5903_p6 }
  0x7b   : > { %5911 = shalt.err (!%p5908_p3)
}
  0x7c   : > { %s5912_s13 = scalar_lea.vmem %s374_s11, 1024  ;;  %p5920_p12 = scmp.lt.s32.totalorder %s374_s11, %s374_s11 }
  0x7d   : > { %p5913_p5 = scmp.ne.s32.totalorder %s374_s11, %s5912_s13  ;;  %p5921_p0 = scmp.lt.s32.totalorder %s5912_s13, %s5912_s13 }
  0x7f   : > { %p5915_p7 = pnand %p5913_p5, %p6253_p13  ;;  %p5922_p1 = por %p5921_p0, %p5920_p12 }
  0x81   : > { %p5916_p9 = pneg %p5915_p7 }
  0x83   : > { %p5923_p2 = pnand %p5922_p1, %p5916_p9 }
  0x85   : > { %5926 = shalt.err (!%p5923_p2)
}
  0x86   : > { %5643 = dma.hbm_to_vmem [thread:$0]  (!%p6237_p11), %s7941_s8, 1024, %s374_s11, [#allocation12], %s6106_s15, %s6106_s15, %s6107_s16  }
  0x87   : > { %s6347_s24 = sadd.s32 1, %s6101_s20   ;;  %s43_s28 = sadd.s32 1, %s6097_s19 }
  0x88   : > { %s40_s10 = ssub.s32 %s6101_s20, %s6347_s24  ;;  %p50_p13 = scmp.ne.s32.totalorder %s6097_s19, %s6093_s18 }
  0x89   : > { %p41_p4 = scmp.eq.s32.totalorder %s40_s10, 0  ;;  %p51_p8 = scmp.eq.s32.totalorder %s6101_s20, 0 }
  0x8a   : > { %p7969_p6 = scmp.eq.s32.totalorder %s6207_s21, 1  ;;  %p5662_p3 = scmp.lt.s32.totalorder %s6101_s20, 2 }
  0x8b   : > { %s6363_s22 = scalar_select %p41_p4, %s6097_s19, %s43_s28  }
  0x8c   : > { %p6357_p10 = por %p7969_p6, %p50_p13  ;;  %p52_p5 = por %p51_p8, %p50_p13 }
  0x8d   : > { %s6366_s26 = sand.u32 1, %s6097_s19   ;;  %s4437_s16 = sshll.u32 %s6101_s20, 8 }
  0x8e   : > { %s4353_s15 = sshll.u32 %s6366_s26, 4  ;;  %s7971_s0 = sld [smem:[#allocation25_spill]] }
  0x8f   : > { %s394_s14 = scalar_lea.vmem [#allocation2], %s4353_s15  ;;  %p6377_p11 = pnand %p5662_p3, %p52_p5 }
  0x90   : > { %s401_s27 = sshll.u32 %s394_s14, 4  ;;  %s391_s9 = scalar_lea.sflag [#allocation3], %s6366_s26  ;;  %s6375_s27 = int_to_ptr.vmem [resolvable:$true] %s401_s27 }
  0x91   : > { %p5929_p9 = pneg %p6377_p11 }
  0x94   : > { %s6373_s12 = scalar_lea.hbm %s7971_s0, %s4437_s16  ;;  %s5932_s16 = scalar_lea.hbm %s7971_s0, 512 }
  0x95   : > { %s5927_s28 = scalar_lea.hbm %s6373_s12, 256  ;;  %p5933_p1 = scmp.lt.u32.totalorder %s6373_s12, %s7971_s0 }
  0x96   : > { %p5928_p7 = scmp.ne.s32.totalorder %s6373_s12, %s5927_s28  ;;  %p5934_p2 = scmp.lt.u32.totalorder %s5932_s16, %s5927_s28 }
  0x97   : > { %p5936_p4 = scmp.lt.u32.totalorder %s5927_s28, %s6373_s12 }
  0x98   : > { %p5930_p12 = pnand %p5929_p9, %p5928_p7  ;;  %p5935_p13 = por %p5934_p2, %p5933_p1 }
  0x9a   : > { %p5931_p0 = pneg %p5930_p12  ;;  %p5937_p8 = por %p5936_p4, %p5935_p13 }
  0x9c   : > { %p5938_p6 = pnand %p5937_p8, %p5931_p0 }
  0x9e   : > { %5941 = shalt.err (!%p5938_p6)
}
  0x9f   : > { %s5942_s14 = scalar_lea.vmem %s6375_s27, 256  ;;  %s6109_s10 = smov [#allocation2]  }
  0xa0   : > { %p5943_p3 = scmp.ne.s32.totalorder %s6375_s27, %s5942_s14  ;;  %s5947_s15 = sshll.u32 %s6109_s10, 4  ;;  %s5948_s15 = int_to_ptr.vmem [resolvable:$false] %s5947_s15 }
  0xa1   : > { %s5949_s11 = scalar_lea.vmem %s5948_s15, 512  ;;  %p5950_p12 = scmp.lt.s32.totalorder %s6375_s27, %s5948_s15 }
  0xa2   : > { %p5945_p5 = pnand %p5943_p3, %p5929_p9  ;;  %p5951_p1 = scmp.lt.s32.totalorder %s5949_s11, %s5942_s14 }
  0xa4   : > { %p5946_p7 = pneg %p5945_p5  ;;  %p5952_p2 = por %p5951_p1, %p5950_p12 }
  0xa6   : > { %p5953_p13 = pnand %p5952_p2, %p5946_p7 }
  0xa8   : > { %5956 = shalt.err (!%p5953_p13)
}
  0xa9   : > { %s6110_s28 = smov 128   ;;  %s6111_s16 = smov 8  }
  0xaa   : > { %5647 = dma.hbm_to_vmem [thread:$0]  (!%p6377_p11), %s6373_s12, 256, %s6375_s27, %s391_s9, %s6110_s28, %s6110_s28, %s6111_s16  }
  0xab   : > { %s4356_s29 = sshll.u32 %s6366_s26, 8  ;;  %s4439_s14 = sshll.u32 %s6101_s20, 12 }
  0xac   : > { %s6418_s11 = scalar_lea.hbm %s7934_s1, %s4439_s14  ;;  %s415_s30 = scalar_lea.vmem [#allocation5], %s4356_s29 }
  0xad   : > { %s423_s0 = sshll.u32 %s415_s30, 4  ;;  %s7973_s2 = sand.u32 1, %s6101_s20   ;;  %s6420_s0 = int_to_ptr.vmem [resolvable:$true] %s423_s0 }
  0xae   : > { %s6424_s4 = scalar_lea.sflag [#allocation6], %s7973_s2  ;;  %s5957_s6 = scalar_lea.hbm %s6418_s11, 4096 }
  0xaf   : > { %p5958_p0 = scmp.ne.s32.totalorder %s6418_s11, %s5957_s6  ;;  %s5962_s27 = scalar_lea.hbm %s7934_s1, 8192 }
  0xb0   : > { %p5963_p6 = scmp.lt.u32.totalorder %s6418_s11, %s7934_s1  ;;  %p5964_p3 = scmp.lt.u32.totalorder %s5962_s27, %s5957_s6 }
  0xb1   : > { %p5960_p4 = pnand %p5958_p0, %p5929_p9  ;;  %p5966_p7 = scmp.lt.u32.totalorder %s5957_s6, %s6418_s11 }
  0xb2   : > { %p5965_p5 = por %p5964_p3, %p5963_p6 }
  0xb3   : > { %p5961_p8 = pneg %p5960_p4 }
  0xb4   : > { %p5967_p12 = por %p5966_p7, %p5965_p5 }
  0xb6   : > { %p5968_p1 = pnand %p5967_p12, %p5961_p8 }
  0xb8   : > { %5971 = shalt.err (!%p5968_p1)
}
  0xb9   : > { %s5972_s2 = scalar_lea.vmem %s6420_s0, 4096  ;;  %s6112_s30 = smov [#allocation5]  }
  0xba   : > { %p5973_p2 = scmp.ne.s32.totalorder %s6420_s0, %s5972_s2  ;;  %s5977_s29 = sshll.u32 %s6112_s30, 4  ;;  %s5978_s29 = int_to_ptr.vmem [resolvable:$false] %s5977_s29 }
  0xbb   : > { %s5979_s10 = scalar_lea.vmem %s5978_s29, 8192  ;;  %p5980_p4 = scmp.lt.s32.totalorder %s6420_s0, %s5978_s29 }
  0xbc   : > { %p5975_p13 = pnand %p5973_p2, %p5929_p9  ;;  %p5981_p6 = scmp.lt.s32.totalorder %s5979_s10, %s5972_s2 }
  0xbe   : > { %p5976_p0 = pneg %p5975_p13  ;;  %p5982_p3 = por %p5981_p6, %p5980_p4 }
  0xc0   : > { %p5983_p5 = pnand %p5982_p3, %p5976_p0 }
  0xc2   : > { %5986 = shalt.err (!%p5983_p5)
}
  0xc3   : > { %5650 = dma.hbm_to_vmem [thread:$0]  (!%p6377_p11), %s6418_s11, 4096, %s6420_s0, %s6424_s4, %s6110_s28, %s6110_s28, %s6111_s16  }
  0xc4   : > { %p7974_p9 = scmp.ne.s32.totalorder %s7963_s25, 0 }
  0xc5   : > { %s6456_s6 = sand.u32 (!%p7974_p9), 1, %s6093_s18   ;;  %p7975_p8 = scmp.ne.s32.totalorder (!%p7974_p9), %s7960_s23, 0 }
  0xc6   : > { %435 = sbr.rel (%p7974_p9) target bundleno = 6963 (0x1b33), region = 60  ;;  %s6459_s15 = sshll.u32 (!%p7974_p9), %s6456_s6, 4 }
  0xc7   : > { %s438_s13 = scalar_lea.sflag (!%p7974_p9), [#allocation3], %s6456_s6  ;;  %s441_s26 = scalar_lea.vmem (!%p7974_p9), [#allocation2], %s6459_s15 }
  0xcd   : > { %6060 = dma.done.wait (%p7975_p8), %s438_s13, 256  }
  0xce   : > { %6062 = vsyncadd (%p7975_p8), %s438_s13, 4294967040  ;;  %s446_s0 = sand.u32 1, %s6207_s21   ;;  %s4362_s4 = sshll.u32 %s6456_s6, 8 }
  0xcf   : > { %s447_s25 = scalar_lea.sflag [#allocation6], %s446_s0  ;;  %s6469_s28 = scalar_lea.vmem [#allocation5], %s4362_s4 }
  0xd0   : > { %6064 = dma.done.wait (%p7975_p8), %s447_s25, 4096  }
  0xd1   : > { %6066 = vsyncadd (%p7975_p8), %s447_s25, 4294963200  ;;  %p7976_p11 = scmp.eq.s32.totalorder %s6207_s21, 0 }
  0xd3   : > { %6068 = dma.done.wait (%p7976_p11), [#allocation6], 1024   ;;  %p7977_p7 = pmov %p7976_p11 }
  0xd5   : > { %6070 = vsyncadd (%p7977_p7), [#allocation6], 4294966272  ;;  %p7978_p12 = pmov %p7977_p7 }
  0xd6   : > { %p7979_p1 = pmov %p7977_p7 }
  0xd7   : > { %6072 = dma.done.wait (%p7978_p12), [#allocation9], 2048  }
  0xd8   : > { %6074 = vsyncadd (%p7979_p1), [#allocation9], 4294965248  ;;  %p7980_p2 = pmov %p7979_p1 }
  0xd9   : > { %p7981_p13 = pmov %p7979_p1 }
  0xda   : > { %6076 = dma.done.wait (%p7980_p2), [#allocation12], 1024  }
  0xdb   : > { %6078 = vsyncadd (%p7981_p13), [#allocation12], 4294966272  ;;  %v6113_v0 = vmov 0.0   ;;  %vm6114_vm0 = vmmov 0   ;;  %v5719_v1 = vld [vmem:[#allocation8] sm:$0xff]   ;;  %v5720_v2 = vld [vmem:[#allocation8 + $0x8] sm:$0xff]  }
  0xdc   : > { %4803 = vmatprep.subr.bf16.mxu0 %v6113_v0  ;;  %4819 = vmatprep.mubr.msk.bf16.mxu0 %vm6114_vm0, %v6113_v0  ;;  %v5721_v3 = vld [vmem:[#allocation8 + $0x10] sm:$0xff]   ;;  %v5722_v4 = vld [vmem:[#allocation8 + $0x18] sm:$0xff]   ;;  %v523_v5 = vld [vmem:[%s6469_s28] sm:$0xff]  ;;  %vm1183_vm1 = vcmask 130048   ;;  %s6115_s11 = smov 112   ;;  %s6116_s2 = smov 96  }
  0xdd   : > { %4823 = vmatprep.subr.bf16.mxu1 %v5719_v1  ;;  %v524_v6 = vld [vmem:[%s6469_s28 + $0x8] sm:$0xff]  ;;  %v5723_v8 = vld [vmem:[#allocation8 + $0x20] sm:$0xff]   ;;  %v5725_v12 = vld [vmem:[#allocation8 + $0x30] sm:$0xff]   ;;  %s6117_s30 = smov 80   ;;  %s6118_s29 = smov 64  }
  0xde   : > { %4824 = vmatpush3.bf16.msra.mxu1 %v5719_v1  ;;  %v6492_v7 = vpack.c.bf16 %v524_v6, %v523_v5  ;;  %v5727_v9 = vld [vmem:[#allocation7] sm:$0xff]   ;;  %v5724_v10 = vld [vmem:[#allocation8 + $0x28] sm:$0xff]   ;;  %v5729_v13 = vld [vmem:[#allocation7 + $0x10] sm:$0xff]   ;;  %s6119_s10 = smov 48   ;;  %s6120_s13 = smov 32  }
  0xdf   : > { %4825 = vmatprep.subr.bf16.mxu1 %v5720_v2  ;;  %4804 = vmatpush3.bf16.msra.mxu0 %v5727_v9  ;;  %v5728_v11 = vld [vmem:[#allocation7 + $0x8] sm:$0xff]   ;;  %v5726_v14 = vld [vmem:[#allocation8 + $0x38] sm:$0xff]   ;;  %v525_v15 = vld [vmem:[%s6469_s28 + $0x10] sm:$0xff]  ;;  %s7815_s0 = scalar_lea.vmem [#allocation14], %s6459_s15  ;;  %s4440_s4 = sshll.u32 %s6207_s21, 8 }
  0xe0   : > { %4839 = vmatprep.mubr.bf16.mxu1 %v6492_v7  ;;  %4805 = vmatprep.subr.bf16.mxu0 %v6113_v0  ;;  %v5730_v16 = vld [vmem:[#allocation7 + $0x18] sm:$0xff]   ;;  %v527_v18 = vld [vmem:[%s6469_s28 + $0x20] sm:$0xff]  ;;  %v528_v19 = vld [vmem:[%s6469_s28 + $0x28] sm:$0xff]  ;;  %s7982_s23 = sld [smem:[#allocation31_spill]]  ;;  %s4151_s12 = scalar_lea.sflag [#allocation15], %s6456_s6 }
  0xe1   : > { %v526_v17 = vld [vmem:[%s6469_s28 + $0x18] sm:$0xff]  ;;  %v5731_v20 = vld [vmem:[#allocation7 + $0x20] sm:$0xff]   ;;  %v6505_v22 = vpack.c.bf16 %v528_v19, %v527_v18  ;;  %v5732_v23 = vld [vmem:[#allocation7 + $0x28] sm:$0xff]   ;;  %s6122_s9 = smov [#allocation14]  }
  0xe2   : > { %4826 = vmatpush3.bf16.msra.mxu1 %v5720_v2  ;;  %v6502_v21 = vpack.c.bf16 %v526_v17, %v525_v15  ;;  %v529_v24 = vld [vmem:[%s6469_s28 + $0x30] sm:$0xff]  ;;  %v530_v25 = vld [vmem:[%s6469_s28 + $0x38] sm:$0xff]  ;;  %v531_v26 = vld [vmem:[%s6469_s28 + $0x40] sm:$0xff]  ;;  %s5991_s14 = sshll.u32 %s6122_s9, 4  ;;  %s5992_s14 = int_to_ptr.vmem [resolvable:$false] %s5991_s14 }
  0xe3   : > { %4827 = vmatprep.subr.bf16.mxu1 %v5721_v3  ;;  %4806 = vmatpush3.bf16.msra.mxu0 %v5728_v11  ;;  %v532_v27 = vld [vmem:[%s6469_s28 + $0x48] sm:$0xff]  ;;  %v5733_v28 = vld [vmem:[#allocation7 + $0x30] sm:$0xff]   ;;  %v6515_v29 = vpack.c.bf16 %v530_v25, %v529_v24  ;;  %v5734_v31 = vld [vmem:[#allocation7 + $0x38] sm:$0xff]  }
  0xe4   : > { %4807 = vmatprep.subr.bf16.mxu0 %v6113_v0  ;;  %v6518_v30 = vpack.c.bf16 %v532_v27, %v531_v26  ;;  %v520_v32 = vld [vmem:[%s441_s26] sm:$0xff]  ;;  %v521_v33 = vld [vmem:[%s441_s26 + $0x8] sm:$0xff]  ;;  %s6121_s26 = smov 16  }
  0xe5   : > { %v533_v34 = vld [vmem:[%s6469_s28 + $0x50] sm:$0xff]  ;;  %v534_v35 = vld [vmem:[%s6469_s28 + $0x58] sm:$0xff]  ;;  %v535_v36 = vld [vmem:[%s6469_s28 + $0x60] sm:$0xff]  ;;  %v522_v38 = vpack.c.bf16 %v521_v33, %v520_v32 }
  0xe6   : > { %4828 = vmatpush3.bf16.msra.mxu1 %v5721_v3  ;;  %v536_v37 = vld [vmem:[%s6469_s28 + $0x68] sm:$0xff]  ;;  %v6531_v39 = vpack.c.bf16 %v534_v35, %v533_v34  ;;  %v537_v41 = vld [vmem:[%s6469_s28 + $0x70] sm:$0xff]  ;;  %v538_v42 = vld [vmem:[%s6469_s28 + $0x78] sm:$0xff]  ;;  %s7841_s16 = scalar_lea.hbm %s7982_s23, %s4440_s4 }
  0xe7   : > { %4829 = vmatprep.subr.bf16.mxu1 %v5722_v4  ;;  %4808 = vmatpush3.bf16.msra.mxu0 %v5729_v13  ;;  %v6533_v40 = vpack.c.bf16 %v536_v37, %v535_v36  ;;  %v539_v43 = vld [vmem:[%s6469_s28 + $0x80] sm:$0xff]  ;;  %v540_v44 = vld [vmem:[%s6469_s28 + $0x88] sm:$0xff]  ;;  %v6542_v45 = vpack.c.bf16 %v538_v42, %v537_v41  ;;  %v541_v47 = vld [vmem:[%s6469_s28 + $0x90] sm:$0xff] }
  0xe8   : > { %4809 = vmatprep.subr.bf16.mxu0 %v6113_v0  ;;  %v6544_v46 = vpack.c.bf16 %v540_v44, %v539_v43  ;;  %v542_v48 = vld [vmem:[%s6469_s28 + $0x98] sm:$0xff]  ;;  %v543_v49 = vld [vmem:[%s6469_s28 + $0xa0] sm:$0xff]  ;;  %v544_v50 = vld [vmem:[%s6469_s28 + $0xa8] sm:$0xff] }
  0xe9   : > { %v564_v51 = vpack.c.bf16 %v542_v48, %v541_v47  ;;  %v565_v52 = vpack.c.bf16 %v544_v50, %v543_v49  ;;  %v545_v53 = vld [vmem:[%s6469_s28 + $0xb0] sm:$0xff]  ;;  %v546_v54 = vld [vmem:[%s6469_s28 + $0xb8] sm:$0xff]  ;;  %v547_v55 = vld [vmem:[%s6469_s28 + $0xc0] sm:$0xff] }
  0xea   : > { %4830 = vmatpush3.bf16.msra.mxu1 %v5722_v4  ;;  %v548_v56 = vld [vmem:[%s6469_s28 + $0xc8] sm:$0xff]  ;;  %v566_v57 = vpack.c.bf16 %v546_v54, %v545_v53  ;;  %v549_v59 = vld [vmem:[%s6469_s28 + $0xd0] sm:$0xff]  ;;  %v550_v60 = vld [vmem:[%s6469_s28 + $0xd8] sm:$0xff] }
  0xeb   : > { %4831 = vmatprep.subr.bf16.mxu1 %v5723_v8  ;;  %4810 = vmatpush3.bf16.msra.mxu0 %v5730_v16  ;;  %v567_v58 = vpack.c.bf16 %v548_v56, %v547_v55  ;;  %v551_v61 = vld [vmem:[%s6469_s28 + $0xe0] sm:$0xff]  ;;  %v552_v62 = vld [vmem:[%s6469_s28 + $0xe8] sm:$0xff]  ;;  %v568_v63 = vpack.c.bf16 %v550_v60, %v549_v59  ;;  %v553_v2 = vld [vmem:[%s6469_s28 + $0xf0] sm:$0xff] }
  0xec   : > { %4811 = vmatprep.subr.bf16.mxu0 %v6113_v0  ;;  %v569_v1 = vpack.c.bf16 %v552_v62, %v551_v61  ;;  %v554_v3 = vld [vmem:[%s6469_s28 + $0xf8] sm:$0xff]  ;;  %v5735_v5 = vld [vmem:[#allocation10] sm:$0xff]   ;;  %v5736_v6 = vld [vmem:[#allocation10 + $0x8] sm:$0xff]  }
  0xed   : > { %v570_v4 = vpack.c.bf16 %v554_v3, %v553_v2  ;;  %v5739_v9 = vld [vmem:[#allocation10 + $0x20] sm:$0xff]   ;;  %v5741_v11 = vld [vmem:[#allocation10 + $0x30] sm:$0xff]  }
  0xee   : > { %4832 = vmatpush3.bf16.msra.mxu1 %v5723_v8  ;;  %v5738_v8 = vld [vmem:[#allocation10 + $0x18] sm:$0xff]  }
  0xef   : > { %4833 = vmatprep.subr.bf16.mxu1 %v5724_v10  ;;  %4812 = vmatpush3.bf16.msra.mxu0 %v5731_v20 }
  0xf0   : > { %4813 = vmatprep.subr.bf16.mxu0 %v6113_v0 }
  0xf2   : > { %4834 = vmatpush3.bf16.msra.mxu1 %v5724_v10  ;;  %v5740_v10 = vld [vmem:[#allocation10 + $0x28] sm:$0xff]  }
  0xf3   : > { %4835 = vmatprep.subr.bf16.mxu1 %v5725_v12  ;;  %4814 = vmatpush3.bf16.msra.mxu0 %v5732_v23 }
  0xf4   : > { %4815 = vmatprep.subr.bf16.mxu0 %v6113_v0 }
  0xf6   : > { %4836 = vmatpush3.bf16.msra.mxu1 %v5725_v12  ;;  %v5742_v12 = vld [vmem:[#allocation10 + $0x38] sm:$0xff]  }
  0xf7   : > { %4837 = vmatprep.subr.bf16.mxu1 %v5726_v14  ;;  %4816 = vmatpush3.bf16.msra.mxu0 %v5733_v28 }
  0xf8   : > { %4817 = vmatprep.subr.bf16.mxu0 %v6113_v0 }
  0xfa   : > { %4838 = vmatpush3.bf16.msra.mxu1 %v5726_v14  ;;  %v6578_v14 = vld [vmem:[%s7938_s5] ss:$0 sm:$0xff] }
  0xfb   : > { %4919 = vmatprep.subr.bf16.mxu1 %v6113_v0  ;;  %4818 = vmatpush3.bf16.msra.mxu0 %v5734_v31 }
  0xfc   : > { %4871 = vmatprep.subr.bf16.mxu0 %v5735_v5 }
  0xfd   : > { %4840 = vmatmul.mubr.bf16.vlgmr.msra.gmra.mrb[0].mxu1 %v6502_v21 }
  0xfe   : > { %4843 = vmatprep.mubr.bf16.mxu1 %v6505_v22  ;;  %4820 = vmatmul.mubr.bf16.vlgmr.msra.gmra.mrb[0].mxu0 %v522_v38 }
  0xff   : > { %4887 = vmatprep.mubr.bf16.mxu0 %v6492_v7  ;;  %4872 = vmatpush3.bf16.msra.mxu0 %v5735_v5  ;;  %v5737_v7 = vld [vmem:[#allocation10 + $0x10] sm:$0xff]  }
 0x100   : > { %4873 = vmatprep.subr.bf16.mxu0 %v5736_v6 }
 0x103   : > { %4874 = vmatpush3.bf16.msra.mxu0 %v5736_v6 }
 0x104   : > { %4875 = vmatprep.subr.bf16.mxu0 %v5737_v7 }
 0x105   : > { %4844 = vmatmul.mubr.bf16.gmra.mrb[4].mxu1 %v6515_v29 }
 0x106   : > { %4847 = vmatprep.mubr.bf16.mxu1 %v6518_v30 }
 0x107   : > { %4876 = vmatpush3.bf16.msra.mxu0 %v5737_v7 }
 0x108   : > { %4877 = vmatprep.subr.bf16.mxu0 %v5738_v8 }
 0x10b   : > { %4878 = vmatpush3.bf16.msra.mxu0 %v5738_v8 }
 0x10c   : > { %4879 = vmatprep.subr.bf16.mxu0 %v5739_v9 }
 0x10d   : > { %4848 = vmatmul.mubr.bf16.gmra.mrb[8].mxu1 %v6531_v39 }
 0x10e   : > { %4851 = vmatprep.mubr.bf16.mxu1 %v6533_v40 }
 0x10f   : > { %4880 = vmatpush3.bf16.msra.mxu0 %v5739_v9 }
 0x110   : > { %4881 = vmatprep.subr.bf16.mxu0 %v5740_v10 }
 0x113   : > { %4882 = vmatpush3.bf16.msra.mxu0 %v5740_v10 }
 0x114   : > { %4883 = vmatprep.subr.bf16.mxu0 %v5741_v11 }
 0x115   : > { %4852 = vmatmul.mubr.bf16.gmra.mrb[12].mxu1 %v6542_v45 }
 0x116   : > { %4855 = vmatprep.mubr.bf16.mxu1 %v6544_v46 }
 0x117   : > { %4884 = vmatpush3.bf16.msra.mxu0 %v5741_v11 }
 0x118   : > { %4885 = vmatprep.subr.bf16.mxu0 %v5742_v12 }
 0x11b   : > { %4886 = vmatpush3.bf16.msra.mxu0 %v5742_v12 }
 0x11c   : > { %4939 = vmatprep.subr.bf16.mxu0 %v6113_v0 }
 0x11d   : > { %4856 = vmatmul.mubr.bf16.gmra.mrb[16].mxu1 %v564_v51 }
 0x11e   : > { %4859 = vmatprep.mubr.bf16.mxu1 %v565_v52  ;;  %4888 = vmatmul.mubr.bf16.vlgmr.msra.gmra.mrb[4].mxu0 %v6502_v21 }
 0x11f   : > { %4891 = vmatprep.mubr.bf16.mxu0 %v6505_v22 }
 0x125   : > { %4860 = vmatmul.mubr.bf16.gmra.mrb[20].mxu1 %v566_v57 }
 0x126   : > { %4863 = vmatprep.mubr.bf16.mxu1 %v567_v58  ;;  %4892 = vmatmul.mubr.bf16.gmra.mrb[8].mxu0 %v6515_v29 }
 0x127   : > { %4895 = vmatprep.mubr.bf16.mxu0 %v6518_v30 }
 0x12d   : > { %4864 = vmatmul.mubr.bf16.gmra.mrb[24].mxu1 %v568_v63 }
 0x12e   : > { %4867 = vmatprep.mubr.bf16.mxu1 %v569_v1  ;;  %4896 = vmatmul.mubr.bf16.gmra.mrb[12].mxu0 %v6531_v39 }
 0x12f   : > { %4899 = vmatprep.mubr.bf16.mxu0 %v6533_v40 }
 0x135   : > { %4868 = vmatmul.mubr.bf16.gmra.mrb[28].mxu1 %v570_v4 }
 0x136   : > { %4935 = vmatprep.mubr.msk.bf16.mxu1 %vm6114_vm0, %v6113_v0  ;;  %4900 = vmatmul.mubr.bf16.gmra.mrb[16].mxu0 %v6542_v45 }
 0x137   : > { %4903 = vmatprep.mubr.bf16.mxu0 %v6544_v46 }
 0x13e   : > { %4904 = vmatmul.mubr.bf16.gmra.mrb[20].mxu0 %v564_v51 }
 0x13f   : > { %4907 = vmatprep.mubr.bf16.mxu0 %v565_v52 }
 0x146   : > { %4908 = vmatmul.mubr.bf16.gmra.mrb[24].mxu0 %v566_v57 }
 0x147   : > { %4911 = vmatprep.mubr.bf16.mxu0 %v567_v58 }
 0x14e   : > { %4912 = vmatmul.mubr.bf16.gmra.mrb[28].mxu0 %v568_v63 }
 0x14f   : > { %4915 = vmatprep.mubr.bf16.mxu0 %v569_v1 }
 0x156   : > { %4916 = vmatmul.mubr.bf16.gmra.mrb[32].mxu0 %v570_v4 }
 0x157   : > { %4955 = vmatprep.mubr.msk.bf16.mxu0 %vm6114_vm0, %v6113_v0 }
 0x1d0   : > { %v4841_v13 = vpop.f32.mrb[0].mxu1 }
 0x1d1   : > { %v788_v15 = vpop.f32.mrb[1].mxu1  ;;  %v797_v17 = vadd.f32 %v4841_v13, %v6578_v14  ;;  %v6599_v35 = vpop.f32.mrb[0].mxu0 }
 0x1d2   : > { %v4842_v16 = vpop.f32.mrb[2].mxu1  ;;  %v789_v20 = vadd.f32 %v6578_v14, %v788_v15  ;;  %v4821_v36 = vpop.f32.mrb[1].mxu0 }
 0x1d3   : > { %v800_v18 = vadd.f32 %v4842_v16, %v6578_v14  ;;  %v791_v19 = vpop.f32.mrb[3].mxu1  ;;  %v6603_v39 = vpop.f32.mrb[2].mxu0 }
 0x1d4   : > { %v792_v21 = vadd.f32 %v6578_v14, %v791_v19  ;;  %v4822_v41 = vpop.f32.mrb[3].mxu0 }
 0x1d5   : > { %v6584_v22 = vpack.c.bf16 %v800_v18, %v797_v17 }
 0x1d6   : > { %v6586_v23 = vpack.c.bf16 %v792_v21, %v789_v20 }
 0x1d7   : > { %v1191_v38 = vsel %vm1183_vm1, %v6584_v22, 0 }
 0x1d8   : > { %v4845_v24 = vpop.f32.mrb[4].mxu1  ;;  %v1188_v25 = vsel %vm1183_vm1, %v6586_v23, 0 }
 0x1d9   : > { %v804_v26 = vpop.f32.mrb[5].mxu1  ;;  %4920 = vmatpush3.bf16.xpose.msra.mxu1 %v1188_v25  ;;  %v813_v28 = vadd.f32 %v4845_v24, %v6578_v14 }
 0x1da   : > { %v4846_v27 = vpop.f32.mrb[6].mxu1  ;;  %4921 = vmatprep.subr.bf16.mxu1 %v6113_v0  ;;  %v805_v31 = vadd.f32 %v6578_v14, %v804_v26 }
 0x1db   : > { %v816_v29 = vadd.f32 %v4846_v27, %v6578_v14  ;;  %v807_v30 = vpop.f32.mrb[7].mxu1 }
 0x1dc   : > { %v808_v32 = vadd.f32 %v6578_v14, %v807_v30 }
 0x1dd   : > { %v6595_v33 = vpack.c.bf16 %v816_v29, %v813_v28 }
 0x1de   : > { %v6597_v34 = vpack.c.bf16 %v808_v32, %v805_v31 }
 0x1df   : > { %v1197_v62 = vsel %vm1183_vm1, %v6595_v33, 0 }
 0x1e0   : > { %v4849_v37 = vpop.f32.mrb[8].mxu1  ;;  %v1194_v51 = vsel %vm1183_vm1, %v6597_v34, 0 }
 0x1e1   : > { %v820_v40 = vpop.f32.mrb[9].mxu1  ;;  %4922 = vmatpush3.bf16.xpose.msra.mxu1 %v1191_v38  ;;  %v829_v43 = vadd.f32 %v4849_v37, %v6578_v14 }
 0x1e2   : > { %v4850_v42 = vpop.f32.mrb[10].mxu1  ;;  %4923 = vmatprep.subr.bf16.mxu1 %v6113_v0  ;;  %v821_v46 = vadd.f32 %v6578_v14, %v820_v40 }
 0x1e3   : > { %v832_v44 = vadd.f32 %v4850_v42, %v6578_v14  ;;  %v823_v45 = vpop.f32.mrb[11].mxu1 }
 0x1e4   : > { %v824_v47 = vadd.f32 %v6578_v14, %v823_v45 }
 0x1e5   : > { %v6610_v48 = vpack.c.bf16 %v832_v44, %v829_v43  ;;  %v4369_v43 = vld [vmem:[%s7936_s3] ss:$0 sm:$0xff] }
 0x1e6   : > { %v6612_v49 = vpack.c.bf16 %v824_v47, %v821_v46 }
 0x1e7   : > { %v1203_v24 = vsel %vm1183_vm1, %v6610_v48, 0 }
 0x1e8   : > { %v4853_v50 = vpop.f32.mrb[12].mxu1  ;;  %v1200_v9 = vsel %vm1183_vm1, %v6612_v49, 0 }
 0x1e9   : > { %v836_v52 = vpop.f32.mrb[13].mxu1  ;;  %4924 = vmatpush3.bf16.xpose.msra.mxu1 %v1194_v51  ;;  %v845_v54 = vadd.f32 %v4853_v50, %v6578_v14 }
 0x1ea   : > { %v4854_v53 = vpop.f32.mrb[14].mxu1  ;;  %4925 = vmatprep.subr.bf16.mxu1 %v6113_v0  ;;  %v837_v57 = vadd.f32 %v6578_v14, %v836_v52  ;;  %v677_v52 = vadd.f32 %v4369_v43, %v6599_v35 }
 0x1eb   : > { %v848_v55 = vadd.f32 %v4854_v53, %v6578_v14  ;;  %v839_v56 = vpop.f32.mrb[15].mxu1 }
 0x1ec   : > { %v840_v58 = vadd.f32 %v6578_v14, %v839_v56  ;;  %v1147_v56 = vmul.f32 0.25, %v677_v52 }
 0x1ed   : > { %v6621_v59 = vpack.c.bf16 %v848_v55, %v845_v54 }
 0x1ee   : > { %v6623_v60 = vpack.c.bf16 %v840_v58, %v837_v57  ;;  %v6692_v35 = vpack.c.bf16 %v1147_v56, %v1147_v56 }
 0x1ef   : > { %v1209_v57 = vsel %vm1183_vm1, %v6621_v59, 0 }
 0x1f0   : > { %v4857_v61 = vpop.f32.mrb[16].mxu1  ;;  %v1206_v40 = vsel %vm1183_vm1, %v6623_v60, 0 }
 0x1f1   : > { %v852_v63 = vpop.f32.mrb[17].mxu1  ;;  %4926 = vmatpush3.bf16.xpose.msra.mxu1 %v1197_v62  ;;  %v861_v2 = vadd.f32 %v4857_v61, %v6578_v14 }
 0x1f2   : > { %v4858_v1 = vpop.f32.mrb[18].mxu1  ;;  %4927 = vmatprep.subr.bf16.mxu1 %v6113_v0  ;;  %v853_v5 = vadd.f32 %v6578_v14, %v852_v63  ;;  %v680_v63 = vadd.f32 %v4369_v43, %v6603_v39  ;;  %v4889_v39 = vpop.f32.mrb[4].mxu0 }
 0x1f3   : > { %v864_v3 = vadd.f32 %v4858_v1, %v6578_v14  ;;  %v855_v4 = vpop.f32.mrb[19].mxu1 }
 0x1f4   : > { %v856_v6 = vadd.f32 %v6578_v14, %v855_v4  ;;  %v6720_v4 = vld [vmem:[%s7940_s7] ss:$0 sm:$0xff] }
 0x1f5   : > { %v6632_v7 = vpack.c.bf16 %v864_v3, %v861_v2  ;;  %v1148_v2 = vmul.f32 0.25, %v680_v63 }
 0x1f6   : > { %v6634_v8 = vpack.c.bf16 %v856_v6, %v853_v5  ;;  %v1029_v5 = vadd.f32 %v4889_v39, %v6720_v4  ;;  %v1020_v6 = vpop.f32.mrb[5].mxu0 }
 0x1f7   : > { %v1258_v25 = vsel %vm1183_vm1, %v6632_v7, 0  ;;  %v6711_v3 = vpack.c.bf16 %v1148_v2, %v1148_v2 }
 0x1f8   : > { %1528 = vrot.lane.b32.xlu1 %v6634_v8, %s6115_s11  ;;  %v1255_v10 = vsel %vm1183_vm1, %v6634_v8, 0  ;;  %v4861_v11 = vpop.f32.mrb[20].mxu1 }
 0x1f9   : > { %4928 = vmatpush3.bf16.xpose.msra.mxu1 %v1200_v9  ;;  %4940 = vmatpush3.bf16.xpose.msra.mxu0 %v1255_v10  ;;  %v877_v12 = vadd.f32 %v4861_v11, %v6578_v14  ;;  %v868_v13 = vpop.f32.mrb[21].mxu1  ;;  %v1021_v9 = vadd.f32 %v6720_v4, %v1020_v6  ;;  %v4890_v10 = vpop.f32.mrb[6].mxu0 }
 0x1fa   : > { %v869_v15 = vadd.f32 %v6578_v14, %v868_v13  ;;  %v4862_v16 = vpop.f32.mrb[22].mxu1  ;;  %4929 = vmatprep.subr.bf16.mxu1 %v6113_v0  ;;  %4941 = vmatprep.subr.bf16.mxu0 %v6113_v0  ;;  %v1032_v11 = vadd.f32 %v4890_v10, %v6720_v4 }
 0x1fb   : > { %v880_v17 = vadd.f32 %v4862_v16, %v6578_v14  ;;  %v871_v18 = vpop.f32.mrb[23].mxu1 }
 0x1fc   : > { %1436 = vrot.lane.b32.xlu1 %v6584_v22, %s6115_s11  ;;  %v872_v19 = vadd.f32 %v6578_v14, %v871_v18 }
 0x1fd   : > { %v6650_v20 = vpack.c.bf16 %v880_v17, %v877_v12  ;;  %v1023_v12 = vpop.f32.mrb[7].mxu0 }
 0x1fe   : > { %v6652_v21 = vpack.c.bf16 %v872_v19, %v869_v15  ;;  %v1024_v13 = vadd.f32 %v6720_v4, %v1023_v12  ;;  %v6726_v15 = vpack.c.bf16 %v1032_v11, %v1029_v5  ;;  %v4893_v17 = vpop.f32.mrb[8].mxu0 }
 0x1ff   : > { %v1264_v58 = vsel %vm1183_vm1, %v6650_v20, 0  ;;  %v1045_v18 = vadd.f32 %v4893_v17, %v6720_v4  ;;  %v1036_v19 = vpop.f32.mrb[9].mxu0 }
 0x200   : > { %v4865_v26 = vpop.f32.mrb[24].mxu1  ;;  %v1261_v41 = vsel %vm1183_vm1, %v6652_v21, 0  ;;  %v6728_v16 = vpack.c.bf16 %v1024_v13, %v1021_v9 }
 0x201   : > { %4930 = vmatpush3.bf16.xpose.msra.mxu1 %v1203_v24  ;;  %4942 = vmatpush3.bf16.xpose.msra.mxu0 %v1258_v25  ;;  %v893_v27 = vadd.f32 %v4865_v26, %v6578_v14  ;;  %v884_v28 = vpop.f32.mrb[25].mxu1  ;;  %v1037_v24 = vadd.f32 %v6720_v4, %v1036_v19  ;;  %v4894_v25 = vpop.f32.mrb[10].mxu0 }
 0x202   : > { %4931 = vmatprep.subr.bf16.mxu1 %v6113_v0  ;;  %4943 = vmatprep.subr.bf16.mxu0 %v6113_v0  ;;  %v885_v29 = vadd.f32 %v6578_v14, %v884_v28  ;;  %v4866_v30 = vpop.f32.mrb[26].mxu1  ;;  %v1048_v26 = vadd.f32 %v4894_v25, %v6720_v4 }
 0x203   : > { %v896_v31 = vadd.f32 %v4866_v30, %v6578_v14  ;;  %v887_v32 = vpop.f32.mrb[27].mxu1 }
 0x204   : > { %v888_v36 = vadd.f32 %v6578_v14, %v887_v32 }
 0x205   : > { %v6664_v37 = vpack.c.bf16 %v896_v31, %v893_v27  ;;  %v1039_v27 = vpop.f32.mrb[11].mxu0 }
 0x206   : > { %v6666_v38 = vpack.c.bf16 %v888_v36, %v885_v29  ;;  %v1040_v28 = vadd.f32 %v6720_v4, %v1039_v27  ;;  %v6737_v29 = vpack.c.bf16 %v1048_v26, %v1045_v18  ;;  %v4897_v31 = vpop.f32.mrb[12].mxu0 }
 0x207   : > { %v1270_v61 = vsel %vm1183_vm1, %v6664_v37, 0  ;;  %v1061_v32 = vadd.f32 %v4897_v31, %v6720_v4  ;;  %v1052_v36 = vpop.f32.mrb[13].mxu0 }
 0x208   : > { %v4869_v42 = vpop.f32.mrb[28].mxu1  ;;  %v6740_v30 = vpack.c.bf16 %v1040_v28, %v1037_v24 }
 0x209   : > { %4932 = vmatpush3.bf16.xpose.msra.mxu1 %v1206_v40  ;;  %4944 = vmatpush3.bf16.xpose.msra.mxu0 %v1261_v41  ;;  %v909_v44 = vadd.f32 %v4869_v42, %v6578_v14  ;;  %v900_v45 = vpop.f32.mrb[29].mxu1  ;;  %v1053_v40 = vadd.f32 %v6720_v4, %v1052_v36  ;;  %v4898_v41 = vpop.f32.mrb[14].mxu0 }
 0x20a   : > { %4933 = vmatprep.subr.bf16.mxu1 %v6113_v0  ;;  %4945 = vmatprep.subr.bf16.mxu0 %v6113_v0  ;;  %v901_v46 = vadd.f32 %v6578_v14, %v900_v45  ;;  %v4870_v47 = vpop.f32.mrb[30].mxu1  ;;  %v1064_v42 = vadd.f32 %v4898_v41, %v6720_v4  ;;  %v1055_v43 = vpop.f32.mrb[15].mxu0 }
 0x20b   : > { %v912_v50 = vadd.f32 %v4870_v47, %v6578_v14  ;;  %v903_v51 = vpop.f32.mrb[31].mxu1  ;;  %v4901_v47 = vpop.f32.mrb[16].mxu0 }
 0x20c   : > { %v904_v53 = vadd.f32 %v6578_v14, %v903_v51  ;;  %v1267_v14 = vsel %vm1183_vm1, %v6666_v38, 0  ;;  %v6749_v45 = vpack.c.bf16 %v1064_v42, %v1061_v32  ;;  %v1068_v51 = vpop.f32.mrb[17].mxu0 }
 0x20d   : > { %v6682_v54 = vpack.c.bf16 %v912_v50, %v909_v44  ;;  %v1056_v44 = vadd.f32 %v6720_v4, %v1055_v43  ;;  %v1077_v50 = vadd.f32 %v4901_v47, %v6720_v4  ;;  %v1069_v52 = vadd.f32 %v6720_v4, %v1068_v51 }
 0x20e   : > { %v6684_v55 = vpack.c.bf16 %v904_v53, %v901_v46  ;;  %v4902_v53 = vpop.f32.mrb[18].mxu0 }
 0x20f   : > { %v1276_v1 = vsel %vm1183_vm1, %v6682_v54, 0  ;;  %v6752_v46 = vpack.c.bf16 %v1056_v44, %v1053_v40  ;;  %v1080_v56 = vadd.f32 %v4902_v53, %v6720_v4 }
 0x210   : > { %v1273_v62 = vsel %vm1183_vm1, %v6684_v55, 0 }
 0x211   : > { %4934 = vmatpush3.bf16.xpose.msra.mxu1 %v1209_v57  ;;  %4946 = vmatpush3.bf16.xpose.msra.mxu0 %v1264_v58  ;;  %v1071_v57 = vpop.f32.mrb[19].mxu0 }
 0x212   : > { %4947 = vmatprep.subr.bf16.mxu0 %v6113_v0  ;;  %4959 = vmatprep.subr.bf16.mxu1 %v6113_v0  ;;  %v1072_v58 = vadd.f32 %v6720_v4, %v1071_v57 }
 0x218   : > { %4936 = vmatmul.mubr.msk.bf16.vlgmr.msra.gmra.mrb[32].mxu1 %vm1183_vm1, %v6692_v35 }
 0x219   : > { %4948 = vmatpush3.bf16.xpose.msra.mxu0 %v1267_v14  ;;  %4975 = vmatprep.mubr.msk.bf16.mxu1 %vm6114_vm0, %v6113_v0  ;;  %v6761_v14 = vpack.c.bf16 %v1080_v56, %v1077_v50 }
 0x21a   : > { %4949 = vmatprep.subr.bf16.mxu0 %v6113_v0  ;;  %4960 = vmatpush3.bf16.msra.mxu1 %v6728_v16 }
 0x21b   : > { %4961 = vmatprep.subr.bf16.mxu1 %v6113_v0 }
 0x21e   : > { %4962 = vmatpush3.bf16.msra.mxu1 %v6726_v15 }
 0x21f   : > { %4963 = vmatprep.subr.bf16.mxu1 %v6113_v0 }
 0x221   : > { %4950 = vmatpush3.bf16.xpose.msra.mxu0 %v1270_v61  ;;  %v6764_v61 = vpack.c.bf16 %v1072_v58, %v1069_v52 }
 0x222   : > { %4951 = vmatprep.subr.bf16.mxu0 %v6113_v0  ;;  %4964 = vmatpush3.bf16.msra.mxu1 %v6740_v30 }
 0x223   : > { %4965 = vmatprep.subr.bf16.mxu1 %v6113_v0 }
 0x226   : > { %4966 = vmatpush3.bf16.msra.mxu1 %v6737_v29 }
 0x227   : > { %4967 = vmatprep.subr.bf16.mxu1 %v6113_v0 }
 0x229   : > { %4952 = vmatpush3.bf16.xpose.msra.mxu0 %v1273_v62  ;;  %v4905_v62 = vpop.f32.mrb[20].mxu0 }
 0x22a   : > { %4953 = vmatprep.subr.bf16.mxu0 %v6113_v0  ;;  %4968 = vmatpush3.bf16.msra.mxu1 %v6752_v46  ;;  %v1093_v63 = vadd.f32 %v4905_v62, %v6720_v4 }
 0x22b   : > { %4969 = vmatprep.subr.bf16.mxu1 %v6113_v0 }
 0x22e   : > { %4970 = vmatpush3.bf16.msra.mxu1 %v6749_v45 }
 0x22f   : > { %4971 = vmatprep.subr.bf16.mxu1 %v6113_v0 }
 0x231   : > { %4954 = vmatpush3.bf16.xpose.msra.mxu0 %v1276_v1  ;;  %v1084_v1 = vpop.f32.mrb[21].mxu0 }
 0x232   : > { %4979 = vmatprep.subr.bf16.mxu0 %v6113_v0  ;;  %4972 = vmatpush3.bf16.msra.mxu1 %v6764_v61  ;;  %v1085_v2 = vadd.f32 %v6720_v4, %v1084_v1  ;;  %v4906_v39 = vpop.f32.mrb[22].mxu0 }
 0x233   : > { %4973 = vmatprep.subr.bf16.mxu1 %v6113_v0  ;;  %v1096_v5 = vadd.f32 %v4906_v39, %v6720_v4  ;;  %v1087_v6 = vpop.f32.mrb[23].mxu0 }
 0x234   : > { %v1088_v9 = vadd.f32 %v6720_v4, %v1087_v6  ;;  %v4909_v12 = vpop.f32.mrb[24].mxu0 }
 0x235   : > { %v6773_v10 = vpack.c.bf16 %v1096_v5, %v1093_v63  ;;  %v1109_v13 = vadd.f32 %v4909_v12, %v6720_v4  ;;  %v1100_v17 = vpop.f32.mrb[25].mxu0 }
 0x236   : > { %4974 = vmatpush3.bf16.msra.mxu1 %v6761_v14  ;;  %v6776_v11 = vpack.c.bf16 %v1088_v9, %v1085_v2  ;;  %v1101_v18 = vadd.f32 %v6720_v4, %v1100_v17  ;;  %v4910_v19 = vpop.f32.mrb[26].mxu0 }
 0x237   : > { %4999 = vmatprep.subr.bf16.mxu1 %v6113_v0  ;;  %v1112_v24 = vadd.f32 %v4910_v19, %v6720_v4  ;;  %v1103_v25 = vpop.f32.mrb[27].mxu0 }
 0x238   : > { %4956 = vmatmul.mubr.msk.bf16.vlgmr.msra.gmra.mrb[36].mxu0 %vm1183_vm1, %v6711_v3  ;;  %v1104_v26 = vadd.f32 %v6720_v4, %v1103_v25  ;;  %v4913_v31 = vpop.f32.mrb[28].mxu0 }
 0x239   : > { %4995 = vmatprep.mubr.msk.bf16.mxu0 %vm6114_vm0, %v6113_v0  ;;  %4980 = vmatpush3.bf16.msra.mxu0 %v6776_v11  ;;  %v6785_v27 = vpack.c.bf16 %v1112_v24, %v1109_v13  ;;  %v1125_v32 = vadd.f32 %v4913_v31, %v6720_v4  ;;  %v1116_v36 = vpop.f32.mrb[29].mxu0 }
 0x23a   : > { %4981 = vmatprep.subr.bf16.mxu0 %v6113_v0  ;;  %v6788_v28 = vpack.c.bf16 %v1104_v26, %v1101_v18  ;;  %v1117_v40 = vadd.f32 %v6720_v4, %v1116_v36  ;;  %v4914_v41 = vpop.f32.mrb[30].mxu0 }
 0x23b   : > { %v1128_v42 = vadd.f32 %v4914_v41, %v6720_v4  ;;  %v1119_v43 = vpop.f32.mrb[31].mxu0 }
 0x23c   : > { %v1120_v44 = vadd.f32 %v6720_v4, %v1119_v43  ;;  %v4917_v51 = vpop.f32.mrb[32].mxu0 }
 0x23d   : > { %4982 = vmatpush3.bf16.msra.mxu0 %v6773_v10  ;;  %v6797_v47 = vpack.c.bf16 %v1128_v42, %v1125_v32  ;;  %v1141_v52 = vadd.f32 %v4917_v51, %v6720_v4  ;;  %v1132_v53 = vpop.f32.mrb[33].mxu0 }
 0x23e   : > { %4983 = vmatprep.subr.bf16.mxu0 %v6113_v0  ;;  %v6800_v50 = vpack.c.bf16 %v1120_v44, %v1117_v40  ;;  %v1133_v56 = vadd.f32 %v6720_v4, %v1132_v53  ;;  %v4918_v57 = vpop.f32.mrb[34].mxu0 }
 0x23f   : > { %v1144_v58 = vadd.f32 %v4918_v57, %v6720_v4  ;;  %v1135_v62 = vpop.f32.mrb[35].mxu0 }
 0x240   : > { %v1136_v63 = vadd.f32 %v6720_v4, %v1135_v62 }
 0x241   : > { %4984 = vmatpush3.bf16.msra.mxu0 %v6788_v28  ;;  %v6809_v1 = vpack.c.bf16 %v1144_v58, %v1141_v52 }
 0x242   : > { %4985 = vmatprep.subr.bf16.mxu0 %v6113_v0  ;;  %v6812_v2 = vpack.c.bf16 %v1136_v63, %v1133_v56 }
 0x245   : > { %4986 = vmatpush3.bf16.msra.mxu0 %v6785_v27 }
 0x246   : > { %4987 = vmatprep.subr.bf16.mxu0 %v6113_v0 }
 0x249   : > { %4988 = vmatpush3.bf16.msra.mxu0 %v6800_v50 }
 0x24a   : > { %4989 = vmatprep.subr.bf16.mxu0 %v6113_v0 }
 0x24d   : > { %4990 = vmatpush3.bf16.msra.mxu0 %v6797_v47 }
 0x24e   : > { %4991 = vmatprep.subr.bf16.mxu0 %v6113_v0 }
 0x251   : > { %4992 = vmatpush3.bf16.msra.mxu0 %v6812_v2 }
 0x252   : > { %4993 = vmatprep.subr.bf16.mxu0 %v6113_v0 }
 0x255   : > { %4994 = vmatpush3.bf16.msra.mxu0 %v6809_v1 }
 0x256   : > { %5019 = vmatprep.subr.bf16.mxu0 %v6113_v0 }
 0x26a   : > { %v1529_v40 = vpop.permute.xlu1 %1528 }
 0x26e   : > { %v1437_v41 = vpop.permute.xlu1 %1436 }
 0x26f   : > { %v1457_v56 = vsel %vm1183_vm1, %v1437_v41, 0 }
 0x2eb   : > { %v1245_v39 = vpop.f32.mrb[32].mxu1 }
 0x2ec   : > { %1318 = vmax.xlane.f32.xlu0 %v1245_v39  ;;  %v4937_v5 = vpop.f32.mrb[33].mxu1 }
 0x2ed   : > { %v1248_v4 = vpop.f32.mrb[34].mxu1 }
 0x2ee   : > { %v4938_v6 = vpop.f32.mrb[35].mxu1 }
 0x30b   : > { %v1312_v9 = vpop.f32.mrb[36].mxu0 }
 0x30c   : > { %1320 = vmax.xlane.f32.xlu0 %v1312_v9  ;;  %v4957_v12 = vpop.f32.mrb[37].mxu0 }
 0x30d   : > { %v1315_v13 = vpop.f32.mrb[38].mxu0  ;;  %v1548_v12 = vsel %vm1183_vm1, %v1529_v40, 0 }
 0x30e   : > { %v4958_v17 = vpop.f32.mrb[39].mxu0 }
 0x322   : > { %1434 = vrot.lane.b32.xlu0 %v6586_v23, %s6115_s11 }
 0x326   : > { %1438 = vrot.lane.b32.xlu0 %v6597_v34, %s6115_s11 }
 0x32a   : > { %1440 = vrot.lane.b32.xlu0 %v6595_v33, %s6115_s11 }
 0x32e   : > { %1442 = vrot.lane.b32.xlu0 %v6612_v49, %s6115_s11 }
 0x332   : > { %1444 = vrot.lane.b32.xlu0 %v6610_v48, %s6115_s11 }
 0x336   : > { %1446 = vrot.lane.b32.xlu0 %v6623_v60, %s6115_s11 }
 0x33a   : > { %1448 = vrot.lane.b32.xlu0 %v6621_v59, %s6115_s11 }
 0x33e   : > { %1424 = vrot.lane.b32.xlu0 %v6692_v35, %s6115_s11 }
 0x379   : > { %v1319_v18 = vpop.xlane.xlu0 %1318 }
 0x37a   : > { %v1322_v19 = vsub.f32 %v1245_v39, %v1319_v18 }
 0x37c   : > { %v1324_v24 = vmul.f32 1.442695, %v1322_v19 }
 0x37e   : > { %5751 = vpow2.f32 %v1324_v24 }
 0x388   : > { %v5752_v25 = vpop.eup %5751 }
 0x389   : > { %1328 = vadd.xlane.f32.xlu1 %v5752_v25 }
 0x399   : > { %v1321_v26 = vpop.xlane.xlu0 %1320 }
 0x39a   : > { %v1323_v31 = vsub.f32 %v1312_v9, %v1321_v26 }
 0x39c   : > { %v1326_v32 = vmul.f32 1.442695, %v1323_v31 }
 0x39d   : > { %v1435_v51 = vpop.permute.xlu0 %1434 }
 0x39e   : > { %5753 = vpow2.f32 %v1326_v32  ;;  %v1454_v53 = vsel %vm1183_vm1, %v1435_v51, 0 }
 0x3a1   : > { %v1439_v57 = vpop.permute.xlu0 %1438 }
 0x3a2   : > { %v1460_v58 = vsel %vm1183_vm1, %v1439_v57, 0 }
 0x3a5   : > { %v1441_v63 = vpop.permute.xlu0 %1440 }
 0x3a6   : > { %v1463_v39 = vsel %vm1183_vm1, %v1441_v63, 0 }
 0x3a8   : > { %v5754_v36 = vpop.eup %5753 }
 0x3a9   : > { %1330 = vadd.xlane.f32.xlu1 %v5754_v36  ;;  %v1443_v6 = vpop.permute.xlu0 %1442 }
 0x3aa   : > { %v1466_v13 = vsel %vm1183_vm1, %v1443_v6, 0 }
 0x3ad   : > { %v1445_v17 = vpop.permute.xlu0 %1444 }
 0x3ae   : > { %v1469_v19 = vsel %vm1183_vm1, %v1445_v17, 0 }
 0x3ba   : > { %1530 = vrot.lane.b32.xlu1 %v6632_v7, %s6115_s11 }
 0x3be   : > { %1532 = vrot.lane.b32.xlu1 %v6652_v21, %s6115_s11 }
 0x3c2   : > { %1534 = vrot.lane.b32.xlu1 %v6650_v20, %s6115_s11 }
 0x3c6   : > { %1536 = vrot.lane.b32.xlu1 %v6666_v38, %s6115_s11 }
 0x3ca   : > { %1538 = vrot.lane.b32.xlu1 %v6664_v37, %s6115_s11 }
 0x3ce   : > { %1540 = vrot.lane.b32.xlu1 %v6684_v55, %s6115_s11 }
 0x3d2   : > { %1542 = vrot.lane.b32.xlu1 %v6682_v54, %s6115_s11 }
 0x3d6   : > { %1518 = vrot.lane.b32.xlu1 %v6711_v3, %s6115_s11 }
 0x416   : > { %v1329_v42 = vpop.xlane.xlu1 %1328 }
 0x417   : > { %5755 = vrcp.f32 %v1329_v42 }
 0x421   : > { %v5756_v43 = vpop.eup %5755 }
 0x422   : > { %v6850_v44 = vmul.f32 %v5756_v43, %v5752_v25  ;;  %v1447_v25 = vpop.permute.xlu0 %1446 }
 0x423   : > { %v1472_v31 = vsel %vm1183_vm1, %v1447_v25, 0 }
 0x424   : > { %v1338_v52 = vpack.c.bf16 %v6850_v44, %v6850_v44 }
 0x426   : > { %4976 = vmatmul.mubr.bf16.vlgmr.msra.gmra.mrb[36].mxu1 %v1338_v52 }
 0x427   : > { %5000 = vmatpush3.bf16.xpose.msra.mxu1 %v1454_v53  ;;  %5015 = vmatprep.mubr.msk.bf16.mxu1 %vm6114_vm0, %v6113_v0 }
 0x428   : > { %5001 = vmatprep.subr.bf16.mxu1 %v6113_v0 }
 0x42f   : > { %5002 = vmatpush3.bf16.xpose.msra.mxu1 %v1457_v56 }
 0x430   : > { %5003 = vmatprep.subr.bf16.mxu1 %v6113_v0 }
 0x436   : > { %v1331_v62 = vpop.xlane.xlu1 %1330 }
 0x437   : > { %5757 = vrcp.f32 %v1331_v62  ;;  %5004 = vmatpush3.bf16.xpose.msra.mxu1 %v1460_v58 }
 0x438   : > { %5005 = vmatprep.subr.bf16.mxu1 %v6113_v0 }
 0x43a   : > { %v1531_v18 = vpop.permute.xlu1 %1530 }
 0x43b   : > { %v1551_v24 = vsel %vm1183_vm1, %v1531_v18, 0 }
 0x43e   : > { %v1533_v26 = vpop.permute.xlu1 %1532 }
 0x43f   : > { %5006 = vmatpush3.bf16.xpose.msra.mxu1 %v1463_v39  ;;  %v1554_v32 = vsel %vm1183_vm1, %v1533_v26, 0 }
 0x440   : > { %5007 = vmatprep.subr.bf16.mxu1 %v6113_v0 }
 0x441   : > { %v5758_v5 = vpop.eup %5757 }
 0x442   : > { %v6864_v4 = vmul.f32 %v5758_v5, %v5754_v36  ;;  %v1449_v36 = vpop.permute.xlu0 %1448  ;;  %v1535_v40 = vpop.permute.xlu1 %1534 }
 0x443   : > { %v1475_v41 = vsel %vm1183_vm1, %v1449_v36, 0  ;;  %v1557_v42 = vsel %vm1183_vm1, %v1535_v40, 0 }
 0x444   : > { %v1339_v9 = vpack.c.bf16 %v6864_v4, %v6864_v4 }
 0x446   : > { %4996 = vmatmul.mubr.bf16.vlgmr.msra.gmra.mrb[40].mxu0 %v1339_v9  ;;  %v1537_v43 = vpop.permute.xlu1 %1536  ;;  %v1425_v51 = vpop.permute.xlu0 %1424 }
 0x447   : > { %5008 = vmatpush3.bf16.xpose.msra.mxu1 %v1466_v13  ;;  %5020 = vmatpush3.bf16.xpose.msra.mxu0 %v1548_v12  ;;  %v1560_v52 = vsel %vm1183_vm1, %v1537_v43, 0 }
 0x448   : > { %5009 = vmatprep.subr.bf16.mxu1 %v6113_v0  ;;  %5021 = vmatprep.subr.bf16.mxu0 %v6113_v0 }
 0x449   : > { %5035 = vmatprep.mubr.msk.bf16.mxu0 %vm6114_vm0, %v6113_v0 }
 0x44a   : > { %v1539_v53 = vpop.permute.xlu1 %1538 }
 0x44b   : > { %v1563_v56 = vsel %vm1183_vm1, %v1539_v53, 0 }
 0x44e   : > { %v1541_v57 = vpop.permute.xlu1 %1540 }
 0x44f   : > { %5010 = vmatpush3.bf16.xpose.msra.mxu1 %v1469_v19  ;;  %5022 = vmatpush3.bf16.xpose.msra.mxu0 %v1551_v24  ;;  %v1566_v58 = vsel %vm1183_vm1, %v1541_v57, 0 }
 0x450   : > { %5011 = vmatprep.subr.bf16.mxu1 %v6113_v0  ;;  %5023 = vmatprep.subr.bf16.mxu0 %v6113_v0 }
 0x452   : > { %v1543_v62 = vpop.permute.xlu1 %1542 }
 0x453   : > { %v1569_v63 = vsel %vm1183_vm1, %v1543_v62, 0 }
 0x456   : > { %v1519_v39 = vpop.permute.xlu1 %1518 }
 0x457   : > { %5012 = vmatpush3.bf16.xpose.msra.mxu1 %v1472_v31  ;;  %5024 = vmatpush3.bf16.xpose.msra.mxu0 %v1554_v32 }
 0x458   : > { %5013 = vmatprep.subr.bf16.mxu1 %v6113_v0  ;;  %5025 = vmatprep.subr.bf16.mxu0 %v6113_v0 }
 0x45f   : > { %5014 = vmatpush3.bf16.xpose.msra.mxu1 %v1475_v41  ;;  %5026 = vmatpush3.bf16.xpose.msra.mxu0 %v1557_v42 }
 0x460   : > { %5027 = vmatprep.subr.bf16.mxu0 %v6113_v0  ;;  %5039 = vmatprep.subr.bf16.mxu1 %v6113_v0 }
 0x466   : > { %5016 = vmatmul.mubr.msk.bf16.vlgmr.msra.gmra.mrb[40].mxu1 %vm1183_vm1, %v1425_v51 }
 0x467   : > { %5028 = vmatpush3.bf16.xpose.msra.mxu0 %v1560_v52  ;;  %5055 = vmatprep.mubr.msk.bf16.mxu1 %vm6114_vm0, %v6113_v0 }
 0x468   : > { %5029 = vmatprep.subr.bf16.mxu0 %v6113_v0 }
 0x46f   : > { %5030 = vmatpush3.bf16.xpose.msra.mxu0 %v1563_v56 }
 0x470   : > { %5031 = vmatprep.subr.bf16.mxu0 %v6113_v0 }
 0x477   : > { %5032 = vmatpush3.bf16.xpose.msra.mxu0 %v1566_v58 }
 0x478   : > { %5033 = vmatprep.subr.bf16.mxu0 %v6113_v0 }
 0x47f   : > { %5034 = vmatpush3.bf16.xpose.msra.mxu0 %v1569_v63 }
 0x480   : > { %5059 = vmatprep.subr.bf16.mxu0 %v6113_v0 }
 0x486   : > { %5036 = vmatmul.mubr.msk.bf16.vlgmr.msra.gmra.mrb[44].mxu0 %vm1183_vm1, %v1519_v39 }
 0x487   : > { %5075 = vmatprep.mubr.msk.bf16.mxu0 %vm6114_vm0, %v6113_v0 }
 0x4f9   : > { %v6900_v5 = vpop.f32.mrb[36].mxu1 }
 0x4fa   : > { %v4977_v6 = vpop.f32.mrb[37].mxu1 }
 0x4fb   : > { %v1377_v9 = vpop.f32.mrb[38].mxu1 }
 0x4fc   : > { %v4978_v12 = vpop.f32.mrb[39].mxu1 }
 0x519   : > { %v6902_v13 = vpop.f32.mrb[40].mxu0 }
 0x51a   : > { %v1420_v17 = vpack.c.bf16 %v6902_v13, %v6900_v5  ;;  %v4997_v18 = vpop.f32.mrb[41].mxu0 }
 0x51b   : > { %v1417_v19 = vpop.f32.mrb[42].mxu0 }
 0x51c   : > { %v4998_v24 = vpop.f32.mrb[43].mxu0 }
 0x539   : > { %v1511_v25 = vpop.f32.mrb[40].mxu1 }
 0x53a   : > { %1611 = vmax.xlane.f32.xlu0 %v1511_v25  ;;  %v5017_v26 = vpop.f32.mrb[41].mxu1 }
 0x53b   : > { %v1514_v31 = vpop.f32.mrb[42].mxu1 }
 0x53c   : > { %v5018_v32 = vpop.f32.mrb[43].mxu1 }
 0x550   : > { %1641 = vrot.lane.b32.xlu0 %v6728_v16, %s6115_s11 }
 0x554   : > { %1643 = vrot.lane.b32.xlu0 %v6726_v15, %s6115_s11 }
 0x558   : > { %1645 = vrot.lane.b32.xlu0 %v6740_v30, %s6115_s11 }
 0x559   : > { %v1605_v36 = vpop.f32.mrb[44].mxu0 }
 0x55a   : > { %1613 = vmax.xlane.f32.xlu1 %v1605_v36  ;;  %v5037_v40 = vpop.f32.mrb[45].mxu0 }
 0x55b   : > { %v1608_v41 = vpop.f32.mrb[46].mxu0 }
 0x55c   : > { %v5038_v42 = vpop.f32.mrb[47].mxu0  ;;  %1647 = vrot.lane.b32.xlu0 %v6737_v29, %s6115_s11 }
 0x560   : > { %1649 = vrot.lane.b32.xlu0 %v6752_v46, %s6115_s11 }
 0x564   : > { %1651 = vrot.lane.b32.xlu0 %v6749_v45, %s6115_s11 }
 0x568   : > { %1653 = vrot.lane.b32.xlu0 %v6764_v61, %s6115_s11 }
 0x56b   : > { %1713 = vrot.lane.b32.xlu1 %v6776_v11, %s6115_s11 }
 0x56f   : > { %1715 = vrot.lane.b32.xlu1 %v6773_v10, %s6115_s11 }
 0x573   : > { %1717 = vrot.lane.b32.xlu1 %v6788_v28, %s6115_s11 }
 0x577   : > { %1719 = vrot.lane.b32.xlu1 %v6785_v27, %s6115_s11 }
 0x57b   : > { %1721 = vrot.lane.b32.xlu1 %v6800_v50, %s6115_s11 }
 0x57f   : > { %1723 = vrot.lane.b32.xlu1 %v6797_v47, %s6115_s11 }
 0x583   : > { %1725 = vrot.lane.b32.xlu1 %v6812_v2, %s6115_s11 }
 0x5c7   : > { %v1612_v43 = vpop.xlane.xlu0 %1611 }
 0x5c8   : > { %v1615_v51 = vsub.f32 %v1511_v25, %v1612_v43 }
 0x5ca   : > { %v1617_v52 = vmul.f32 1.442695, %v1615_v51 }
 0x5cb   : > { %v1642_v53 = vpop.permute.xlu0 %1641 }
 0x5cc   : > { %5759 = vpow2.f32 %v1617_v52  ;;  %5040 = vmatpush3.bf16.msra.mxu1 %v1642_v53 }
 0x5cd   : > { %5041 = vmatprep.subr.bf16.mxu1 %v6113_v0 }
 0x5cf   : > { %v1644_v56 = vpop.permute.xlu0 %1643 }
 0x5d0   : > { %5042 = vmatpush3.bf16.msra.mxu1 %v1644_v56 }
 0x5d1   : > { %5043 = vmatprep.subr.bf16.mxu1 %v6113_v0 }
 0x5d3   : > { %v1646_v57 = vpop.permute.xlu0 %1645 }
 0x5d4   : > { %5044 = vmatpush3.bf16.msra.mxu1 %v1646_v57 }
 0x5d5   : > { %5045 = vmatprep.subr.bf16.mxu1 %v6113_v0 }
 0x5d6   : > { %v6937_v58 = vpop.eup %5759 }
 0x5d7   : > { %1621 = vadd.xlane.f32.xlu0 %v6937_v58  ;;  %v1648_v62 = vpop.permute.xlu0 %1647 }
 0x5d8   : > { %5046 = vmatpush3.bf16.msra.mxu1 %v1648_v62 }
 0x5d9   : > { %5047 = vmatprep.subr.bf16.mxu1 %v6113_v0 }
 0x5db   : > { %v1650_v63 = vpop.permute.xlu0 %1649 }
 0x5dc   : > { %5048 = vmatpush3.bf16.msra.mxu1 %v1650_v63 }
 0x5dd   : > { %5049 = vmatprep.subr.bf16.mxu1 %v6113_v0 }
 0x5df   : > { %v1652_v39 = vpop.permute.xlu0 %1651 }
 0x5e0   : > { %5050 = vmatpush3.bf16.msra.mxu1 %v1652_v39 }
 0x5e1   : > { %5051 = vmatprep.subr.bf16.mxu1 %v6113_v0 }
 0x5e3   : > { %v1654_v6 = vpop.permute.xlu0 %1653 }
 0x5e4   : > { %5052 = vmatpush3.bf16.msra.mxu1 %v1654_v6 }
 0x5e5   : > { %5053 = vmatprep.subr.bf16.mxu1 %v6113_v0 }
 0x5e7   : > { %v1614_v9 = vpop.xlane.xlu1 %1613 }
 0x5e8   : > { %v1616_v12 = vsub.f32 %v1605_v36, %v1614_v9 }
 0x5ea   : > { %v1619_v18 = vmul.f32 1.442695, %v1616_v12 }
 0x5eb   : > { %v1714_v19 = vpop.permute.xlu1 %1713 }
 0x5ec   : > { %5761 = vpow2.f32 %v1619_v18  ;;  %5060 = vmatpush3.bf16.msra.mxu0 %v1714_v19 }
 0x5ed   : > { %1655 = vrot.lane.b32.xlu0 %v6761_v14, %s6115_s11  ;;  %5061 = vmatprep.subr.bf16.mxu0 %v6113_v0 }
 0x5ef   : > { %v1716_v24 = vpop.permute.xlu1 %1715 }
 0x5f0   : > { %5062 = vmatpush3.bf16.msra.mxu0 %v1716_v24 }
 0x5f1   : > { %1882 = vrot.lane.b32.xlu0 %v6586_v23, %s6116_s2  ;;  %5063 = vmatprep.subr.bf16.mxu0 %v6113_v0 }
 0x5f3   : > { %v1718_v25 = vpop.permute.xlu1 %1717 }
 0x5f4   : > { %5064 = vmatpush3.bf16.msra.mxu0 %v1718_v25 }
 0x5f5   : > { %1884 = vrot.lane.b32.xlu0 %v6584_v22, %s6116_s2  ;;  %5065 = vmatprep.subr.bf16.mxu0 %v6113_v0 }
 0x5f6   : > { %v5762_v26 = vpop.eup %5761 }
 0x5f7   : > { %1623 = vadd.xlane.f32.xlu1 %v5762_v26  ;;  %v1720_v31 = vpop.permute.xlu1 %1719 }
 0x5f8   : > { %5066 = vmatpush3.bf16.msra.mxu0 %v1720_v31 }
 0x5f9   : > { %1886 = vrot.lane.b32.xlu0 %v6597_v34, %s6116_s2  ;;  %5067 = vmatprep.subr.bf16.mxu0 %v6113_v0 }
 0x5fb   : > { %v1722_v32 = vpop.permute.xlu1 %1721 }
 0x5fc   : > { %5068 = vmatpush3.bf16.msra.mxu0 %v1722_v32 }
 0x5fd   : > { %1888 = vrot.lane.b32.xlu0 %v6595_v33, %s6116_s2  ;;  %5069 = vmatprep.subr.bf16.mxu0 %v6113_v0 }
 0x5ff   : > { %v1724_v36 = vpop.permute.xlu1 %1723 }
 0x600   : > { %5070 = vmatpush3.bf16.msra.mxu0 %v1724_v36 }
 0x601   : > { %1890 = vrot.lane.b32.xlu0 %v6612_v49, %s6116_s2  ;;  %5071 = vmatprep.subr.bf16.mxu0 %v6113_v0 }
 0x603   : > { %v1726_v40 = vpop.permute.xlu1 %1725 }
 0x604   : > { %5072 = vmatpush3.bf16.msra.mxu0 %v1726_v40 }
 0x605   : > { %1892 = vrot.lane.b32.xlu0 %v6610_v48, %s6116_s2  ;;  %5073 = vmatprep.subr.bf16.mxu0 %v6113_v0 }
 0x608   : > { %1727 = vrot.lane.b32.xlu1 %v6809_v1, %s6115_s11  ;;  %s4180_s11 = sshll.u32 %s7815_s0, 4  ;;  %s7844_s11 = int_to_ptr.vmem [resolvable:$true] %s4180_s11 }
 0x609   : > { %1894 = vrot.lane.b32.xlu0 %v6623_v60, %s6116_s2  ;;  %s5987_s27 = scalar_lea.vmem %s7844_s11, 256  ;;  %p5994_p3 = scmp.lt.s32.totalorder %s7844_s11, %s5992_s14 }
 0x60a   : > { %p5988_p0 = scmp.ne.s32.totalorder %s7844_s11, %s5987_s27 }
 0x60c   : > { %1967 = vrot.lane.b32.xlu1 %v6634_v8, %s6116_s2  ;;  %p5989_p4 = pnand %p5988_p0, %p6357_p10 }
 0x60d   : > { %1896 = vrot.lane.b32.xlu0 %v6621_v59, %s6116_s2 }
 0x60e   : > { %p5990_p6 = pneg %p5989_p4 }
 0x610   : > { %1969 = vrot.lane.b32.xlu1 %v6632_v7, %s6116_s2 }
 0x611   : > { %1880 = vrot.lane.b32.xlu0 %v6692_v35, %s6116_s2 }
 0x614   : > { %1971 = vrot.lane.b32.xlu1 %v6652_v21, %s6116_s2 }
 0x618   : > { %1973 = vrot.lane.b32.xlu1 %v6650_v20, %s6116_s2 }
 0x61c   : > { %1975 = vrot.lane.b32.xlu1 %v6666_v38, %s6116_s2 }
 0x620   : > { %1977 = vrot.lane.b32.xlu1 %v6664_v37, %s6116_s2 }
 0x624   : > { %1979 = vrot.lane.b32.xlu1 %v6684_v55, %s6116_s2 }
 0x628   : > { %1981 = vrot.lane.b32.xlu1 %v6682_v54, %s6116_s2 }
 0x62c   : > { %1965 = vrot.lane.b32.xlu1 %v6711_v3, %s6116_s2 }
 0x664   : > { %v1622_v41 = vpop.xlane.xlu0 %1621 }
 0x665   : > { %5763 = vrcp.f32 %v1622_v41 }
 0x668   : > { %v1656_v42 = vpop.permute.xlu0 %1655 }
 0x669   : > { %5054 = vmatpush3.bf16.msra.mxu1 %v1656_v42  ;;  %v5743_v42 = vld [vmem:[#allocation11 + $0x8] sm:$0xff]  }
 0x66a   : > { %5079 = vmatprep.subr.bf16.mxu1 %v6113_v0 }
 0x66f   : > { %v5764_v43 = vpop.eup %5763 }
 0x670   : > { %v6993_v51 = vmul.f32 %v5764_v43, %v6937_v58 }
 0x672   : > { %v1631_v52 = vpack.c.bf16 %v6993_v51, %v6993_v51 }
 0x674   : > { %5056 = vmatmul.mubr.bf16.vlgmr.msra.gmra.mrb[44].mxu1 %v1631_v52 }
 0x675   : > { %5081 = vmatprep.mubr.msk.bf16.mxu1 %vm6114_vm0, %v6113_v0  ;;  %5080 = vmatpush3.bf16.msra.mxu1 %v5743_v42 }
 0x676   : > { %5085 = vmatprep.subr.bf16.mxu1 %v6113_v0 }
 0x684   : > { %v1624_v53 = vpop.xlane.xlu1 %1623 }
 0x685   : > { %5765 = vrcp.f32 %v1624_v53 }
 0x688   : > { %v1728_v56 = vpop.permute.xlu1 %1727 }
 0x689   : > { %5074 = vmatpush3.bf16.msra.mxu0 %v1728_v56 }
 0x68a   : > { %5111 = vmatprep.subr.bf16.mxu0 %v6113_v0 }
 0x68c   : > { %v1968_v63 = vpop.permute.xlu1 %1967 }
 0x68d   : > { %v1987_v39 = vsel %vm1183_vm1, %v1968_v63, 0 }
 0x68f   : > { %v5766_v57 = vpop.eup %5765 }
 0x690   : > { %v7000_v62 = vmul.f32 %v5766_v57, %v5762_v26  ;;  %v1970_v6 = vpop.permute.xlu1 %1969 }
 0x691   : > { %v1990_v9 = vsel %vm1183_vm1, %v1970_v6, 0 }
 0x692   : > { %v1632_v58 = vpack.c.bf16 %v7000_v62, %v7000_v62 }
 0x694   : > { %5076 = vmatmul.mubr.bf16.vlgmr.msra.gmra.mrb[48].mxu0 %v1632_v58  ;;  %v1972_v12 = vpop.permute.xlu1 %1971 }
 0x695   : > { %5112 = vmatpush3.bf16.xpose.msra.mxu0 %v1987_v39  ;;  %5127 = vmatprep.mubr.msk.bf16.mxu0 %vm6114_vm0, %v6113_v0  ;;  %v1993_v18 = vsel %vm1183_vm1, %v1972_v12, 0  ;;  %v5744_v39 = vld [vmem:[#allocation11] sm:$0xff]  }
 0x696   : > { %5113 = vmatprep.subr.bf16.mxu0 %v6113_v0 }
 0x698   : > { %v1974_v19 = vpop.permute.xlu1 %1973 }
 0x699   : > { %v1996_v24 = vsel %vm1183_vm1, %v1974_v19, 0  ;;  %v1883_v19 = vpop.permute.xlu0 %1882 }
 0x69c   : > { %v1976_v25 = vpop.permute.xlu1 %1975 }
 0x69d   : > { %5114 = vmatpush3.bf16.xpose.msra.mxu0 %v1990_v9  ;;  %v1999_v26 = vsel %vm1183_vm1, %v1976_v25, 0  ;;  %v1885_v25 = vpop.permute.xlu0 %1884 }
 0x69e   : > { %5115 = vmatprep.subr.bf16.mxu0 %v6113_v0 }
 0x6a0   : > { %v1978_v31 = vpop.permute.xlu1 %1977 }
 0x6a1   : > { %v2002_v32 = vsel %vm1183_vm1, %v1978_v31, 0  ;;  %v1887_v31 = vpop.permute.xlu0 %1886 }
 0x6a4   : > { %v1980_v36 = vpop.permute.xlu1 %1979 }
 0x6a5   : > { %5116 = vmatpush3.bf16.xpose.msra.mxu0 %v1993_v18  ;;  %v2005_v40 = vsel %vm1183_vm1, %v1980_v36, 0  ;;  %v1889_v5 = vpop.permute.xlu0 %1888 }
 0x6a6   : > { %5117 = vmatprep.subr.bf16.mxu0 %v6113_v0  ;;  %v1911_v13 = vsel %vm1183_vm1, %v1889_v5, 0 }
 0x6a8   : > { %v1982_v41 = vpop.permute.xlu1 %1981 }
 0x6a9   : > { %v2008_v43 = vsel %vm1183_vm1, %v1982_v41, 0 }
 0x6ac   : > { %v1966_v52 = vpop.permute.xlu1 %1965 }
 0x6ad   : > { %5118 = vmatpush3.bf16.xpose.msra.mxu0 %v1996_v24  ;;  %v1902_v24 = vsel %vm1183_vm1, %v1883_v19, 0 }
 0x6ae   : > { %5119 = vmatprep.subr.bf16.mxu0 %v6113_v0 }
 0x6b5   : > { %5120 = vmatpush3.bf16.xpose.msra.mxu0 %v1999_v26  ;;  %v1905_v26 = vsel %vm1183_vm1, %v1885_v25, 0 }
 0x6b6   : > { %5121 = vmatprep.subr.bf16.mxu0 %v6113_v0 }
 0x6bd   : > { %5122 = vmatpush3.bf16.xpose.msra.mxu0 %v2002_v32  ;;  %v1908_v32 = vsel %vm1183_vm1, %v1887_v31, 0 }
 0x6be   : > { %5123 = vmatprep.subr.bf16.mxu0 %v6113_v0 }
 0x6c5   : > { %5124 = vmatpush3.bf16.xpose.msra.mxu0 %v2005_v40 }
 0x6c6   : > { %5125 = vmatprep.subr.bf16.mxu0 %v6113_v0 }
 0x6cd   : > { %5126 = vmatpush3.bf16.xpose.msra.mxu0 %v2008_v43 }
 0x6ce   : > { %5151 = vmatprep.subr.bf16.mxu0 %v6113_v0 }
 0x6d4   : > { %5128 = vmatmul.mubr.msk.bf16.vlgmr.msra.gmra.mrb[52].mxu0 %vm1183_vm1, %v1966_v52 }
 0x6d5   : > { %5167 = vmatprep.mubr.msk.bf16.mxu0 %vm6114_vm0, %v6113_v0 }
 0x747   : > { %v1699_v53 = vpop.f32.mrb[44].mxu1 }
 0x748   : > { %v5057_v56 = vpop.f32.mrb[45].mxu1 }
 0x749   : > { %v1702_v57 = vpop.f32.mrb[46].mxu1 }
 0x74a   : > { %v5058_v63 = vpop.f32.mrb[47].mxu1 }
 0x767   : > { %v1771_v58 = vpop.f32.mrb[48].mxu0 }
 0x768   : > { %v1777_v6 = vpack.c.bf16 %v1771_v58, %v1699_v53  ;;  %v5077_v9 = vpop.f32.mrb[49].mxu0 }
 0x769   : > { %v1774_v12 = vpop.f32.mrb[50].mxu0 }
 0x76a   : > { %v5078_v18 = vpop.f32.mrb[51].mxu0  ;;  %5082 = vmatmul.mubr.msk.bf16.vlgmr.msra.gmra.mrb[48].mxu1 %vm1183_vm1, %v1777_v6 }
 0x76b   : > { %5086 = vmatpush3.bf16.msra.mxu1 %v5744_v39  ;;  %5087 = vmatprep.mubr.msk.bf16.mxu1 %vm6114_vm0, %v6113_v0 }
 0x76c   : > { %5091 = vmatprep.subr.bf16.mxu1 %v6113_v0 }
 0x772   : > { %5088 = vmatmul.mubr.msk.bf16.vlgmr.msra.gmra.mrb[52].mxu1 %vm1183_vm1, %v1420_v17  ;;  %v1891_v17 = vpop.permute.xlu0 %1890 }
 0x773   : > { %5107 = vmatprep.mubr.msk.bf16.mxu1 %vm6114_vm0, %v6113_v0  ;;  %v1914_v36 = vsel %vm1183_vm1, %v1891_v17, 0 }
 0x774   : > { %5092 = vmatpush3.bf16.xpose.msra.mxu1 %v1902_v24 }
 0x775   : > { %5093 = vmatprep.subr.bf16.mxu1 %v6113_v0 }
 0x776   : > { %v1893_v40 = vpop.permute.xlu0 %1892 }
 0x777   : > { %v1917_v41 = vsel %vm1183_vm1, %v1893_v40, 0 }
 0x77a   : > { %v1895_v42 = vpop.permute.xlu0 %1894 }
 0x77b   : > { %v1920_v43 = vsel %vm1183_vm1, %v1895_v42, 0 }
 0x77c   : > { %5094 = vmatpush3.bf16.xpose.msra.mxu1 %v1905_v26 }
 0x77d   : > { %5095 = vmatprep.subr.bf16.mxu1 %v6113_v0 }
 0x77e   : > { %v1897_v53 = vpop.permute.xlu0 %1896 }
 0x77f   : > { %v1923_v58 = vsel %vm1183_vm1, %v1897_v53, 0 }
 0x782   : > { %v1881_v39 = vpop.permute.xlu0 %1880 }
 0x784   : > { %5096 = vmatpush3.bf16.xpose.msra.mxu1 %v1908_v32 }
 0x785   : > { %5097 = vmatprep.subr.bf16.mxu1 %v6113_v0 }
 0x78c   : > { %5098 = vmatpush3.bf16.xpose.msra.mxu1 %v1911_v13 }
 0x78d   : > { %5099 = vmatprep.subr.bf16.mxu1 %v6113_v0 }
 0x794   : > { %5100 = vmatpush3.bf16.xpose.msra.mxu1 %v1914_v36 }
 0x795   : > { %5101 = vmatprep.subr.bf16.mxu1 %v6113_v0 }
 0x79c   : > { %5102 = vmatpush3.bf16.xpose.msra.mxu1 %v1917_v41 }
 0x79d   : > { %5103 = vmatprep.subr.bf16.mxu1 %v6113_v0 }
 0x7a4   : > { %5104 = vmatpush3.bf16.xpose.msra.mxu1 %v1920_v43 }
 0x7a5   : > { %5105 = vmatprep.subr.bf16.mxu1 %v6113_v0 }
 0x7a7   : > { %v2044_v52 = vpop.f32.mrb[52].mxu0 }
 0x7a8   : > { %2052 = vmax.xlane.f32.xlu1 %v2044_v52  ;;  %v5129_v56 = vpop.f32.mrb[53].mxu0 }
 0x7a9   : > { %v2047_v57 = vpop.f32.mrb[54].mxu0 }
 0x7aa   : > { %v5130_v63 = vpop.f32.mrb[55].mxu0 }
 0x7ac   : > { %5106 = vmatpush3.bf16.xpose.msra.mxu1 %v1923_v58  ;;  %v1630_v58 = vadd.f32 %v7000_v62, %v6864_v4 }
 0x7ad   : > { %5131 = vmatprep.subr.bf16.mxu1 %v6113_v0 }
 0x7b3   : > { %5108 = vmatmul.mubr.msk.bf16.vlgmr.msra.gmra.mrb[56].mxu1 %vm1183_vm1, %v1881_v39 }
 0x7b4   : > { %5147 = vmatprep.mubr.msk.bf16.mxu1 %vm6114_vm0, %v6113_v0 }
 0x7b9   : > { %2136 = vrot.lane.b32.xlu1 %v6776_v11, %s6116_s2 }
 0x835   : > { %v2053_v6 = vpop.xlane.xlu1 %2052 }
 0x836   : > { %v2055_v9 = vsub.f32 %v2044_v52, %v2053_v6 }
 0x838   : > { %v2058_v12 = vmul.f32 1.442695, %v2055_v9 }
 0x839   : > { %v2137_v18 = vpop.permute.xlu1 %2136 }
 0x83a   : > { %5767 = vpow2.f32 %v2058_v12  ;;  %5152 = vmatpush3.bf16.msra.mxu0 %v2137_v18 }
 0x83b   : > { %5153 = vmatprep.subr.bf16.mxu0 %v6113_v0 }
 0x83d   : > { %v1823_v19 = vpop.f32.mrb[48].mxu1 }
 0x83e   : > { %v5083_v24 = vpop.f32.mrb[49].mxu1 }
 0x83f   : > { %v1826_v25 = vpop.f32.mrb[50].mxu1 }
 0x840   : > { %v5084_v26 = vpop.f32.mrb[51].mxu1 }
 0x844   : > { %v5768_v31 = vpop.eup %5767 }
 0x845   : > { %2062 = vadd.xlane.f32.xlu1 %v5768_v31  ;;  %v1873_v32 = vpop.f32.mrb[52].mxu1 }
 0x846   : > { %v7058_v5 = vadd.f32 %v1873_v32, %v1823_v19  ;;  %v5089_v13 = vpop.f32.mrb[53].mxu1 }
 0x847   : > { %v1876_v17 = vpop.f32.mrb[54].mxu1 }
 0x848   : > { %v7060_v36 = vadd.f32 %v1876_v17, %v1826_v25  ;;  %v5090_v40 = vpop.f32.mrb[55].mxu1 }
 0x856   : > { %2138 = vrot.lane.b32.xlu1 %v6773_v10, %s6116_s2 }
 0x85a   : > { %2140 = vrot.lane.b32.xlu1 %v6788_v28, %s6116_s2 }
 0x85e   : > { %2142 = vrot.lane.b32.xlu1 %v6785_v27, %s6116_s2 }
 0x862   : > { %2144 = vrot.lane.b32.xlu1 %v6800_v50, %s6116_s2 }
 0x866   : > { %2146 = vrot.lane.b32.xlu1 %v6797_v47, %s6116_s2 }
 0x86a   : > { %2148 = vrot.lane.b32.xlu1 %v6812_v2, %s6116_s2 }
 0x86e   : > { %2150 = vrot.lane.b32.xlu1 %v6809_v1, %s6116_s2 }
 0x872   : > { %2342 = vrot.lane.b32.xlu1 %v6634_v8, %s6117_s30 }
 0x876   : > { %2344 = vrot.lane.b32.xlu1 %v6632_v7, %s6117_s30 }
 0x87a   : > { %2346 = vrot.lane.b32.xlu1 %v6652_v21, %s6117_s30 }
 0x87e   : > { %2348 = vrot.lane.b32.xlu1 %v6650_v20, %s6117_s30 }
 0x882   : > { %2350 = vrot.lane.b32.xlu1 %v6666_v38, %s6117_s30 }
 0x886   : > { %2352 = vrot.lane.b32.xlu1 %v6664_v37, %s6117_s30  ;;  %v7088_v41 = vpop.f32.mrb[56].mxu1 }
 0x887   : > { %2050 = vmax.xlane.f32.xlu0 %v7088_v41  ;;  %v5109_v42 = vpop.f32.mrb[57].mxu1 }
 0x888   : > { %v1962_v43 = vpop.f32.mrb[58].mxu1 }
 0x889   : > { %v5110_v52 = vpop.f32.mrb[59].mxu1 }
 0x88a   : > { %2354 = vrot.lane.b32.xlu1 %v6684_v55, %s6117_s30 }
 0x88e   : > { %2356 = vrot.lane.b32.xlu1 %v6682_v54, %s6117_s30 }
 0x892   : > { %2340 = vrot.lane.b32.xlu1 %v6711_v3, %s6117_s30 }
 0x89d   : > { %2072 = vrot.lane.b32.xlu0 %v6728_v16, %s6116_s2 }
 0x8a1   : > { %2074 = vrot.lane.b32.xlu0 %v6726_v15, %s6116_s2 }
 0x8a5   : > { %2076 = vrot.lane.b32.xlu0 %v6740_v30, %s6116_s2 }
 0x8a9   : > { %2078 = vrot.lane.b32.xlu0 %v6737_v29, %s6116_s2 }
 0x8ad   : > { %2080 = vrot.lane.b32.xlu0 %v6752_v46, %s6116_s2 }
 0x8b1   : > { %2082 = vrot.lane.b32.xlu0 %v6749_v45, %s6116_s2 }
 0x8b5   : > { %2084 = vrot.lane.b32.xlu0 %v6764_v61, %s6116_s2 }
 0x8d2   : > { %v2063_v53 = vpop.xlane.xlu1 %2062 }
 0x8d3   : > { %5769 = vrcp.f32 %v2063_v53 }
 0x8d6   : > { %v2139_v56 = vpop.permute.xlu1 %2138 }
 0x8d7   : > { %5154 = vmatpush3.bf16.msra.mxu0 %v2139_v56 }
 0x8d8   : > { %5155 = vmatprep.subr.bf16.mxu0 %v6113_v0 }
 0x8da   : > { %v2141_v57 = vpop.permute.xlu1 %2140 }
 0x8db   : > { %5156 = vmatpush3.bf16.msra.mxu0 %v2141_v57 }
 0x8dc   : > { %5157 = vmatprep.subr.bf16.mxu0 %v6113_v0 }
 0x8dd   : > { %v5770_v63 = vpop.eup %5769 }
 0x8de   : > { %v2143_v39 = vpop.permute.xlu1 %2142  ;;  %v2067_v6 = vmul.f32 %v5770_v63, %v5768_v31 }
 0x8df   : > { %5158 = vmatpush3.bf16.msra.mxu0 %v2143_v39 }
 0x8e0   : > { %5159 = vmatprep.subr.bf16.mxu0 %v6113_v0  ;;  %v7116_v9 = vadd.f32 %v2067_v6, %v1630_v58  ;;  %v2071_v62 = vpack.c.bf16 %v2067_v6, %v2067_v6 }
 0x8e2   : > { %v2145_v12 = vpop.permute.xlu1 %2144 }
 0x8e3   : > { %5160 = vmatpush3.bf16.msra.mxu0 %v2145_v12 }
 0x8e4   : > { %5161 = vmatprep.subr.bf16.mxu0 %v6113_v0 }
 0x8e6   : > { %v2147_v18 = vpop.permute.xlu1 %2146 }
 0x8e7   : > { %5162 = vmatpush3.bf16.msra.mxu0 %v2147_v18 }
 0x8e8   : > { %5163 = vmatprep.subr.bf16.mxu0 %v6113_v0 }
 0x8ea   : > { %v2149_v19 = vpop.permute.xlu1 %2148 }
 0x8eb   : > { %5164 = vmatpush3.bf16.msra.mxu0 %v2149_v19 }
 0x8ec   : > { %5165 = vmatprep.subr.bf16.mxu0 %v6113_v0 }
 0x8ee   : > { %v2151_v4 = vpop.permute.xlu1 %2150 }
 0x8ef   : > { %5166 = vmatpush3.bf16.msra.mxu0 %v2151_v4 }
 0x8f0   : > { %5197 = vmatprep.subr.bf16.mxu0 %v6113_v0 }
 0x8f2   : > { %5168 = vmatmul.mubr.bf16.vlgmr.msra.gmra.mrb[56].mxu0 %v2071_v62  ;;  %v2343_v24 = vpop.permute.xlu1 %2342 }
 0x8f3   : > { %5213 = vmatprep.mubr.msk.bf16.mxu0 %vm6114_vm0, %v6113_v0  ;;  %v2362_v25 = vsel %vm1183_vm1, %v2343_v24, 0 }
 0x8f6   : > { %v2345_v26 = vpop.permute.xlu1 %2344 }
 0x8f7   : > { %v2365_v31 = vsel %vm1183_vm1, %v2345_v26, 0 }
 0x8f8   : > { %5198 = vmatpush3.bf16.xpose.msra.mxu0 %v2362_v25 }
 0x8f9   : > { %5199 = vmatprep.subr.bf16.mxu0 %v6113_v0 }
 0x8fa   : > { %v2347_v32 = vpop.permute.xlu1 %2346 }
 0x8fb   : > { %v2368_v13 = vsel %vm1183_vm1, %v2347_v32, 0 }
 0x8fe   : > { %v2349_v17 = vpop.permute.xlu1 %2348 }
 0x8ff   : > { %v2371_v40 = vsel %vm1183_vm1, %v2349_v17, 0 }
 0x900   : > { %5200 = vmatpush3.bf16.xpose.msra.mxu0 %v2365_v31 }
 0x901   : > { %5201 = vmatprep.subr.bf16.mxu0 %v6113_v0 }
 0x902   : > { %v2351_v42 = vpop.permute.xlu1 %2350 }
 0x903   : > { %v2374_v53 = vsel %vm1183_vm1, %v2351_v42, 0 }
 0x906   : > { %v2353_v63 = vpop.permute.xlu1 %2352 }
 0x907   : > { %v2377_v39 = vsel %vm1183_vm1, %v2353_v63, 0 }
 0x908   : > { %5202 = vmatpush3.bf16.xpose.msra.mxu0 %v2368_v13 }
 0x909   : > { %5203 = vmatprep.subr.bf16.mxu0 %v6113_v0 }
 0x90a   : > { %v2355_v12 = vpop.permute.xlu1 %2354 }
 0x90b   : > { %v2380_v19 = vsel %vm1183_vm1, %v2355_v12, 0 }
 0x90e   : > { %v2357_v62 = vpop.permute.xlu1 %2356 }
 0x90f   : > { %v2383_v25 = vsel %vm1183_vm1, %v2357_v62, 0 }
 0x910   : > { %5204 = vmatpush3.bf16.xpose.msra.mxu0 %v2371_v40  ;;  %v1629_v40 = vadd.f32 %v6993_v51, %v6850_v44 }
 0x911   : > { %5205 = vmatprep.subr.bf16.mxu0 %v6113_v0 }
 0x912   : > { %v2341_v31 = vpop.permute.xlu1 %2340 }
 0x914   : > { %v2051_v43 = vpop.xlane.xlu0 %2050 }
 0x915   : > { %v2054_v52 = vsub.f32 %v7088_v41, %v2051_v43  ;;  %v5745_v43 = vld [vmem:[#allocation11 + $0x10] sm:$0xff]  }
 0x917   : > { %v2056_v56 = vmul.f32 1.442695, %v2054_v52 }
 0x918   : > { %5206 = vmatpush3.bf16.xpose.msra.mxu0 %v2374_v53  ;;  %v2073_v57 = vpop.permute.xlu0 %2072 }
 0x919   : > { %5771 = vpow2.f32 %v2056_v56  ;;  %5132 = vmatpush3.bf16.msra.mxu1 %v2073_v57  ;;  %5207 = vmatprep.subr.bf16.mxu0 %v6113_v0 }
 0x91a   : > { %5133 = vmatprep.subr.bf16.mxu1 %v6113_v0 }
 0x91c   : > { %v2075_v58 = vpop.permute.xlu0 %2074 }
 0x91d   : > { %5134 = vmatpush3.bf16.msra.mxu1 %v2075_v58 }
 0x91e   : > { %5135 = vmatprep.subr.bf16.mxu1 %v6113_v0 }
 0x920   : > { %5208 = vmatpush3.bf16.xpose.msra.mxu0 %v2377_v39  ;;  %v2077_v41 = vpop.permute.xlu0 %2076 }
 0x921   : > { %5136 = vmatpush3.bf16.msra.mxu1 %v2077_v41  ;;  %5209 = vmatprep.subr.bf16.mxu0 %v6113_v0 }
 0x922   : > { %5137 = vmatprep.subr.bf16.mxu1 %v6113_v0 }
 0x923   : > { %v5772_v6 = vpop.eup %5771 }
 0x924   : > { %2060 = vadd.xlane.f32.xlu0 %v5772_v6  ;;  %v2079_v18 = vpop.permute.xlu0 %2078 }
 0x925   : > { %5138 = vmatpush3.bf16.msra.mxu1 %v2079_v18 }
 0x926   : > { %5139 = vmatprep.subr.bf16.mxu1 %v6113_v0 }
 0x928   : > { %5210 = vmatpush3.bf16.xpose.msra.mxu0 %v2380_v19  ;;  %v2081_v4 = vpop.permute.xlu0 %2080 }
 0x929   : > { %5140 = vmatpush3.bf16.msra.mxu1 %v2081_v4  ;;  %5211 = vmatprep.subr.bf16.mxu0 %v6113_v0 }
 0x92a   : > { %5141 = vmatprep.subr.bf16.mxu1 %v6113_v0 }
 0x92c   : > { %v2083_v24 = vpop.permute.xlu0 %2082 }
 0x92d   : > { %5142 = vmatpush3.bf16.msra.mxu1 %v2083_v24 }
 0x92e   : > { %5143 = vmatprep.subr.bf16.mxu1 %v6113_v0 }
 0x930   : > { %5212 = vmatpush3.bf16.xpose.msra.mxu0 %v2383_v25  ;;  %v2085_v26 = vpop.permute.xlu0 %2084 }
 0x931   : > { %5144 = vmatpush3.bf16.msra.mxu1 %v2085_v26  ;;  %5237 = vmatprep.subr.bf16.mxu0 %v6113_v0 }
 0x932   : > { %5145 = vmatprep.subr.bf16.mxu1 %v6113_v0 }
 0x937   : > { %5214 = vmatmul.mubr.msk.bf16.vlgmr.msra.gmra.mrb[60].mxu0 %vm1183_vm1, %v2341_v31 }
 0x938   : > { %5253 = vmatprep.mubr.msk.bf16.mxu0 %vm6114_vm0, %v6113_v0 }
 0x93a   : > { %2086 = vrot.lane.b32.xlu0 %v6761_v14, %s6116_s2  ;;  %s5993_s2 = scalar_lea.vmem %s5992_s14, 512 }
 0x93b   : > { %p5995_p5 = scmp.lt.s32.totalorder %s5993_s2, %s5987_s27 }
 0x93d   : > { %p5996_p9 = por %p5995_p5, %p5994_p3 }
 0x93e   : > { %2257 = vrot.lane.b32.xlu0 %v6586_v23, %s6117_s30 }
 0x93f   : > { %p5997_p8 = pnand %p5996_p9, %p5990_p6 }
 0x942   : > { %2259 = vrot.lane.b32.xlu0 %v6584_v22, %s6117_s30 }
 0x946   : > { %2261 = vrot.lane.b32.xlu0 %v6597_v34, %s6117_s30 }
 0x94a   : > { %2263 = vrot.lane.b32.xlu0 %v6595_v33, %s6117_s30 }
 0x94e   : > { %2265 = vrot.lane.b32.xlu0 %v6612_v49, %s6117_s30 }
 0x952   : > { %2267 = vrot.lane.b32.xlu0 %v6610_v48, %s6117_s30 }
 0x956   : > { %2269 = vrot.lane.b32.xlu0 %v6623_v60, %s6117_s30 }
 0x95a   : > { %2271 = vrot.lane.b32.xlu0 %v6621_v59, %s6117_s30 }
 0x95e   : > { %2255 = vrot.lane.b32.xlu0 %v6692_v35, %s6117_s30 }
 0x9b1   : > { %v2061_v32 = vpop.xlane.xlu0 %2060 }
 0x9b2   : > { %5773 = vrcp.f32 %v2061_v32 }
 0x9b5   : > { %v2087_v13 = vpop.permute.xlu0 %2086 }
 0x9b6   : > { %5146 = vmatpush3.bf16.msra.mxu1 %v2087_v13 }
 0x9b7   : > { %5171 = vmatprep.subr.bf16.mxu1 %v6113_v0 }
 0x9bc   : > { %v5774_v17 = vpop.eup %5773 }
 0x9bd   : > { %v2066_v42 = vmul.f32 %v5774_v17, %v5772_v6  ;;  %v2258_v6 = vpop.permute.xlu0 %2257 }
 0x9be   : > { %v2277_v62 = vsel %vm1183_vm1, %v2258_v6, 0 }
 0x9bf   : > { %v7174_v52 = vadd.f32 %v2066_v42, %v1629_v40  ;;  %v2070_v53 = vpack.c.bf16 %v2066_v42, %v2066_v42 }
 0x9c1   : > { %5148 = vmatmul.mubr.bf16.vlgmr.msra.gmra.mrb[60].mxu1 %v2070_v53  ;;  %v2260_v32 = vpop.permute.xlu0 %2259 }
 0x9c2   : > { %5172 = vmatpush3.bf16.msra.mxu1 %v5745_v43  ;;  %5173 = vmatprep.mubr.msk.bf16.mxu1 %vm6114_vm0, %v6113_v0  ;;  %v2280_v17 = vsel %vm1183_vm1, %v2260_v32, 0 }
 0x9c3   : > { %5177 = vmatprep.subr.bf16.mxu1 %v6113_v0 }
 0x9c5   : > { %v2194_v56 = vpop.f32.mrb[56].mxu0  ;;  %v2262_v40 = vpop.permute.xlu0 %2261 }
 0x9c6   : > { %v5169_v57 = vpop.f32.mrb[57].mxu0  ;;  %v2283_v43 = vsel %vm1183_vm1, %v2262_v40, 0 }
 0x9c7   : > { %v2197_v63 = vpop.f32.mrb[58].mxu0 }
 0x9c8   : > { %v5170_v58 = vpop.f32.mrb[59].mxu0 }
 0x9c9   : > { %v2264_v53 = vpop.permute.xlu0 %2263 }
 0x9cd   : > { %v2266_v57 = vpop.permute.xlu0 %2265 }
 0x9ce   : > { %v2289_v63 = vsel %vm1183_vm1, %v2266_v57, 0 }
 0x9d1   : > { %v2268_v58 = vpop.permute.xlu0 %2267 }
 0xa0a   : > { %v2419_v39 = vpop.f32.mrb[60].mxu0 }
 0xa0b   : > { %2427 = vmax.xlane.f32.xlu1 %v2419_v39  ;;  %v5215_v41 = vpop.f32.mrb[61].mxu0 }
 0xa0c   : > { %v2422_v44 = vpop.f32.mrb[62].mxu0  ;;  %v2270_v41 = vpop.permute.xlu0 %2269 }
 0xa0d   : > { %v5216_v51 = vpop.f32.mrb[63].mxu0  ;;  %v2295_v44 = vsel %vm1183_vm1, %v2270_v41, 0 }
 0xa10   : > { %v2272_v51 = vpop.permute.xlu0 %2271 }
 0xa11   : > { %v2298_v6 = vsel %vm1183_vm1, %v2272_v51, 0 }
 0xa1c   : > { %2511 = vrot.lane.b32.xlu1 %v6776_v11, %s6117_s30 }
 0xa94   : > { %v2130_v12 = vpop.f32.mrb[60].mxu1 }
 0xa95   : > { %v2200_v18 = vpack.c.bf16 %v2194_v56, %v2130_v12  ;;  %v5149_v19 = vpop.f32.mrb[61].mxu1  ;;  %v2286_v56 = vsel %vm1183_vm1, %v2264_v53, 0  ;;  %v2256_v12 = vpop.permute.xlu0 %2255 }
 0xa96   : > { %v2133_v4 = vpop.f32.mrb[62].mxu1 }
 0xa97   : > { %v5150_v24 = vpop.f32.mrb[63].mxu1  ;;  %5174 = vmatmul.mubr.msk.bf16.vlgmr.msra.gmra.mrb[64].mxu1 %vm1183_vm1, %v2200_v18 }
 0xa98   : > { %5178 = vmatpush3.bf16.xpose.msra.mxu1 %v2277_v62  ;;  %v2428_v25 = vpop.xlane.xlu1 %2427  ;;  %5193 = vmatprep.mubr.msk.bf16.mxu1 %vm6114_vm0, %v6113_v0 }
 0xa99   : > { %v2430_v26 = vsub.f32 %v2419_v39, %v2428_v25  ;;  %5179 = vmatprep.subr.bf16.mxu1 %v6113_v0  ;;  %v2292_v39 = vsel %vm1183_vm1, %v2268_v58, 0 }
 0xa9b   : > { %v2433_v31 = vmul.f32 1.442695, %v2430_v26 }
 0xa9c   : > { %v2512_v13 = vpop.permute.xlu1 %2511 }
 0xa9d   : > { %5775 = vpow2.f32 %v2433_v31  ;;  %5238 = vmatpush3.bf16.msra.mxu0 %v2512_v13 }
 0xa9e   : > { %5239 = vmatprep.subr.bf16.mxu0 %v6113_v0 }
 0xaa0   : > { %5180 = vmatpush3.bf16.xpose.msra.mxu1 %v2280_v17 }
 0xaa1   : > { %5181 = vmatprep.subr.bf16.mxu1 %v6113_v0 }
 0xaa7   : > { %v5776_v42 = vpop.eup %5775 }
 0xaa8   : > { %5182 = vmatpush3.bf16.xpose.msra.mxu1 %v2283_v43  ;;  %2437 = vadd.xlane.f32.xlu1 %v5776_v42 }
 0xaa9   : > { %5183 = vmatprep.subr.bf16.mxu1 %v6113_v0 }
 0xab0   : > { %5184 = vmatpush3.bf16.xpose.msra.mxu1 %v2286_v56 }
 0xab1   : > { %5185 = vmatprep.subr.bf16.mxu1 %v6113_v0 }
 0xab8   : > { %5186 = vmatpush3.bf16.xpose.msra.mxu1 %v2289_v63 }
 0xab9   : > { %2513 = vrot.lane.b32.xlu1 %v6773_v10, %s6117_s30  ;;  %5187 = vmatprep.subr.bf16.mxu1 %v6113_v0 }
 0xabd   : > { %2515 = vrot.lane.b32.xlu1 %v6788_v28, %s6117_s30 }
 0xac0   : > { %5188 = vmatpush3.bf16.xpose.msra.mxu1 %v2292_v39 }
 0xac1   : > { %2517 = vrot.lane.b32.xlu1 %v6785_v27, %s6117_s30  ;;  %5189 = vmatprep.subr.bf16.mxu1 %v6113_v0 }
 0xac5   : > { %2519 = vrot.lane.b32.xlu1 %v6800_v50, %s6117_s30 }
 0xac8   : > { %5190 = vmatpush3.bf16.xpose.msra.mxu1 %v2295_v44 }
 0xac9   : > { %2521 = vrot.lane.b32.xlu1 %v6797_v47, %s6117_s30  ;;  %5191 = vmatprep.subr.bf16.mxu1 %v6113_v0 }
 0xacd   : > { %2523 = vrot.lane.b32.xlu1 %v6812_v2, %s6117_s30 }
 0xad0   : > { %5192 = vmatpush3.bf16.xpose.msra.mxu1 %v2298_v6 }
 0xad1   : > { %2525 = vrot.lane.b32.xlu1 %v6809_v1, %s6117_s30  ;;  %5217 = vmatprep.subr.bf16.mxu1 %v6113_v0 }
 0xad5   : > { %2717 = vrot.lane.b32.xlu1 %v6634_v8, %s6118_s29 }
 0xad7   : > { %5194 = vmatmul.mubr.msk.bf16.vlgmr.msra.gmra.mrb[68].mxu1 %vm1183_vm1, %v2256_v12 }
 0xad8   : > { %5233 = vmatprep.mubr.msk.bf16.mxu1 %vm6114_vm0, %v6113_v0 }
 0xad9   : > { %2719 = vrot.lane.b32.xlu1 %v6632_v7, %s6118_s29 }
 0xadd   : > { %2721 = vrot.lane.b32.xlu1 %v6652_v21, %s6118_s29 }
 0xae1   : > { %2723 = vrot.lane.b32.xlu1 %v6650_v20, %s6118_s29 }
 0xae5   : > { %2725 = vrot.lane.b32.xlu1 %v6666_v38, %s6118_s29 }
 0xae9   : > { %2727 = vrot.lane.b32.xlu1 %v6664_v37, %s6118_s29 }
 0xaed   : > { %2729 = vrot.lane.b32.xlu1 %v6684_v55, %s6118_s29 }
 0xaf1   : > { %2731 = vrot.lane.b32.xlu1 %v6682_v54, %s6118_s29 }
 0xaf5   : > { %2715 = vrot.lane.b32.xlu1 %v6711_v3, %s6118_s29 }
 0xb35   : > { %v2438_v18 = vpop.xlane.xlu1 %2437 }
 0xb36   : > { %5777 = vrcp.f32 %v2438_v18 }
 0xb39   : > { %v2514_v19 = vpop.permute.xlu1 %2513 }
 0xb3a   : > { %5240 = vmatpush3.bf16.msra.mxu0 %v2514_v19 }
 0xb3b   : > { %5241 = vmatprep.subr.bf16.mxu0 %v6113_v0 }
 0xb3d   : > { %v2516_v4 = vpop.permute.xlu1 %2515 }
 0xb3e   : > { %5242 = vmatpush3.bf16.msra.mxu0 %v2516_v4 }
 0xb3f   : > { %5243 = vmatprep.subr.bf16.mxu0 %v6113_v0 }
 0xb40   : > { %v5778_v62 = vpop.eup %5777 }
 0xb41   : > { %v2518_v24 = vpop.permute.xlu1 %2517  ;;  %v2442_v25 = vmul.f32 %v5778_v62, %v5776_v42 }
 0xb42   : > { %5244 = vmatpush3.bf16.msra.mxu0 %v2518_v24 }
 0xb43   : > { %5245 = vmatprep.subr.bf16.mxu0 %v6113_v0  ;;  %v7240_v26 = vadd.f32 %v2442_v25, %v7116_v9  ;;  %v2446_v40 = vpack.c.bf16 %v2442_v25, %v2442_v25 }
 0xb45   : > { %v2520_v31 = vpop.permute.xlu1 %2519 }
 0xb46   : > { %5246 = vmatpush3.bf16.msra.mxu0 %v2520_v31 }
 0xb47   : > { %5247 = vmatprep.subr.bf16.mxu0 %v6113_v0 }
 0xb49   : > { %v2522_v32 = vpop.permute.xlu1 %2521 }
 0xb4a   : > { %5248 = vmatpush3.bf16.msra.mxu0 %v2522_v32 }
 0xb4b   : > { %5249 = vmatprep.subr.bf16.mxu0 %v6113_v0 }
 0xb4d   : > { %v2524_v13 = vpop.permute.xlu1 %2523 }
 0xb4e   : > { %5250 = vmatpush3.bf16.msra.mxu0 %v2524_v13 }
 0xb4f   : > { %5251 = vmatprep.subr.bf16.mxu0 %v6113_v0 }
 0xb51   : > { %v2526_v17 = vpop.permute.xlu1 %2525 }
 0xb52   : > { %5252 = vmatpush3.bf16.msra.mxu0 %v2526_v17 }
 0xb53   : > { %5263 = vmatprep.subr.bf16.mxu0 %v6113_v0 }
 0xb55   : > { %5254 = vmatmul.mubr.bf16.vlgmr.msra.gmra.mrb[64].mxu0 %v2446_v40 }
 0xb56   : > { %5279 = vmatprep.mubr.msk.bf16.mxu0 %vm6114_vm0, %v6113_v0 }
 0xb6a   : > { %v2246_v9 = vpop.f32.mrb[64].mxu1 }
 0xb6b   : > { %v7249_v42 = vadd.f32 %v2246_v9, %v7058_v5  ;;  %v5175_v43 = vpop.f32.mrb[65].mxu1 }
 0xb6c   : > { %v2249_v53 = vpop.f32.mrb[66].mxu1 }
 0xb6d   : > { %v7252_v56 = vadd.f32 %v2249_v53, %v7060_v36  ;;  %v5176_v57 = vpop.f32.mrb[67].mxu1 }
 0xbaa   : > { %v2334_v63 = vpop.f32.mrb[68].mxu1 }
 0xbab   : > { %2425 = vmax.xlane.f32.xlu0 %v2334_v63  ;;  %v5195_v58 = vpop.f32.mrb[69].mxu1 }
 0xbac   : > { %v2337_v39 = vpop.f32.mrb[70].mxu1 }
 0xbad   : > { %v5196_v41 = vpop.f32.mrb[71].mxu1 }
 0xbc1   : > { %2447 = vrot.lane.b32.xlu0 %v6728_v16, %s6117_s30 }
 0xbc5   : > { %2449 = vrot.lane.b32.xlu0 %v6726_v15, %s6117_s30 }
 0xbc9   : > { %2451 = vrot.lane.b32.xlu0 %v6740_v30, %s6117_s30 }
 0xbcd   : > { %2453 = vrot.lane.b32.xlu0 %v6737_v29, %s6117_s30 }
 0xbd1   : > { %2455 = vrot.lane.b32.xlu0 %v6752_v46, %s6117_s30 }
 0xbd5   : > { %2457 = vrot.lane.b32.xlu0 %v6749_v45, %s6117_s30 }
 0xbd9   : > { %2459 = vrot.lane.b32.xlu0 %v6764_v61, %s6117_s30 }
 0xc28   : > { %v7268_v5 = vpop.f32.mrb[64].mxu0 }
 0xc29   : > { %v5255_v36 = vpop.f32.mrb[65].mxu0 }
 0xc2a   : > { %v2572_v44 = vpop.f32.mrb[66].mxu0 }
 0xc2b   : > { %v5256_v51 = vpop.f32.mrb[67].mxu0 }
 0xc38   : > { %v2426_v6 = vpop.xlane.xlu0 %2425 }
 0xc39   : > { %v2429_v12 = vsub.f32 %v2334_v63, %v2426_v6  ;;  %v5746_v63 = vld [vmem:[#allocation11 + $0x18] sm:$0xff]  }
 0xc3b   : > { %v2431_v18 = vmul.f32 1.442695, %v2429_v12 }
 0xc3c   : > { %v2448_v19 = vpop.permute.xlu0 %2447 }
 0xc3d   : > { %5779 = vpow2.f32 %v2431_v18  ;;  %5218 = vmatpush3.bf16.msra.mxu1 %v2448_v19 }
 0xc3e   : > { %5219 = vmatprep.subr.bf16.mxu1 %v6113_v0 }
 0xc40   : > { %v2450_v4 = vpop.permute.xlu0 %2449 }
 0xc41   : > { %5220 = vmatpush3.bf16.msra.mxu1 %v2450_v4 }
 0xc42   : > { %5221 = vmatprep.subr.bf16.mxu1 %v6113_v0 }
 0xc44   : > { %v2452_v62 = vpop.permute.xlu0 %2451 }
 0xc45   : > { %5222 = vmatpush3.bf16.msra.mxu1 %v2452_v62 }
 0xc46   : > { %5223 = vmatprep.subr.bf16.mxu1 %v6113_v0 }
 0xc47   : > { %v5780_v24 = vpop.eup %5779 }
 0xc48   : > { %2435 = vadd.xlane.f32.xlu0 %v5780_v24  ;;  %v2454_v25 = vpop.permute.xlu0 %2453 }
 0xc49   : > { %5224 = vmatpush3.bf16.msra.mxu1 %v2454_v25 }
 0xc4a   : > { %5225 = vmatprep.subr.bf16.mxu1 %v6113_v0 }
 0xc4c   : > { %v2456_v31 = vpop.permute.xlu0 %2455 }
 0xc4d   : > { %5226 = vmatpush3.bf16.msra.mxu1 %v2456_v31 }
 0xc4e   : > { %5227 = vmatprep.subr.bf16.mxu1 %v6113_v0 }
 0xc50   : > { %v2458_v32 = vpop.permute.xlu0 %2457 }
 0xc51   : > { %5228 = vmatpush3.bf16.msra.mxu1 %v2458_v32 }
 0xc52   : > { %5229 = vmatprep.subr.bf16.mxu1 %v6113_v0 }
 0xc54   : > { %v2460_v13 = vpop.permute.xlu0 %2459 }
 0xc55   : > { %5230 = vmatpush3.bf16.msra.mxu1 %v2460_v13  ;;  %v2718_v13 = vpop.permute.xlu1 %2717 }
 0xc56   : > { %5231 = vmatprep.subr.bf16.mxu1 %v6113_v0 }
 0xc5e   : > { %2461 = vrot.lane.b32.xlu0 %v6761_v14, %s6117_s30 }
 0xc62   : > { %2632 = vrot.lane.b32.xlu0 %v6586_v23, %s6118_s29 }
 0xc66   : > { %2634 = vrot.lane.b32.xlu0 %v6584_v22, %s6118_s29 }
 0xc6a   : > { %2636 = vrot.lane.b32.xlu0 %v6597_v34, %s6118_s29 }
 0xc6e   : > { %2638 = vrot.lane.b32.xlu0 %v6595_v33, %s6118_s29 }
 0xc72   : > { %2640 = vrot.lane.b32.xlu0 %v6612_v49, %s6118_s29 }
 0xc76   : > { %2642 = vrot.lane.b32.xlu0 %v6610_v48, %s6118_s29 }
 0xc7a   : > { %2644 = vrot.lane.b32.xlu0 %v6623_v60, %s6118_s29 }
 0xc7e   : > { %2646 = vrot.lane.b32.xlu0 %v6621_v59, %s6118_s29 }
 0xc82   : > { %2630 = vrot.lane.b32.xlu0 %v6692_v35, %s6118_s29 }
 0xcd5   : > { %v2436_v17 = vpop.xlane.xlu0 %2435 }
 0xcd6   : > { %5781 = vrcp.f32 %v2436_v17 }
 0xcd9   : > { %v2462_v40 = vpop.permute.xlu0 %2461 }
 0xcda   : > { %5232 = vmatpush3.bf16.msra.mxu1 %v2462_v40 }
 0xcdb   : > { %5257 = vmatprep.subr.bf16.mxu1 %v6113_v0 }
 0xcdd   : > { %v2633_v9 = vpop.permute.xlu0 %2632 }
 0xcde   : > { %v2652_v43 = vsel %vm1183_vm1, %v2633_v9, 0 }
 0xcdf   : > { %5264 = vmatpush3.bf16.xpose.msra.mxu0 %v2652_v43 }
 0xce0   : > { %v5782_v53 = vpop.eup %5781  ;;  %5265 = vmatprep.subr.bf16.mxu0 %v6113_v0 }
 0xce1   : > { %v2441_v57 = vmul.f32 %v5782_v53, %v5780_v24  ;;  %v2635_v58 = vpop.permute.xlu0 %2634  ;;  %v2737_v53 = vsel %vm1183_vm1, %v2718_v13, 0 }
 0xce2   : > { %v2655_v36 = vsel %vm1183_vm1, %v2635_v58, 0 }
 0xce3   : > { %v7301_v39 = vadd.f32 %v2441_v57, %v7174_v52  ;;  %v2445_v41 = vpack.c.bf16 %v2441_v57, %v2441_v57 }
 0xce5   : > { %5234 = vmatmul.mubr.bf16.vlgmr.msra.gmra.mrb[72].mxu1 %v2445_v41  ;;  %v2637_v44 = vpop.permute.xlu0 %2636 }
 0xce6   : > { %5258 = vmatpush3.bf16.msra.mxu1 %v5746_v63  ;;  %5259 = vmatprep.mubr.msk.bf16.mxu1 %vm6114_vm0, %v6113_v0  ;;  %v2658_v51 = vsel %vm1183_vm1, %v2637_v44, 0  ;;  %v2720_v63 = vpop.permute.xlu1 %2719 }
 0xce7   : > { %5266 = vmatpush3.bf16.xpose.msra.mxu0 %v2655_v36  ;;  %5283 = vmatprep.subr.bf16.mxu1 %v6113_v0  ;;  %v2740_v58 = vsel %vm1183_vm1, %v2720_v63, 0 }
 0xce8   : > { %5267 = vmatprep.subr.bf16.mxu0 %v6113_v0 }
 0xce9   : > { %v2639_v52 = vpop.permute.xlu0 %2638 }
 0xcea   : > { %v2661_v6 = vsel %vm1183_vm1, %v2639_v52, 0 }
 0xced   : > { %v2641_v12 = vpop.permute.xlu0 %2640 }
 0xcee   : > { %v2664_v18 = vsel %vm1183_vm1, %v2641_v12, 0 }
 0xcef   : > { %5268 = vmatpush3.bf16.xpose.msra.mxu0 %v2658_v51 }
 0xcf0   : > { %5269 = vmatprep.subr.bf16.mxu0 %v6113_v0 }
 0xcf1   : > { %v2643_v19 = vpop.permute.xlu0 %2642 }
 0xcf2   : > { %v2667_v4 = vsel %vm1183_vm1, %v2643_v19, 0 }
 0xcf5   : > { %v2645_v62 = vpop.permute.xlu0 %2644 }
 0xcf6   : > { %v2670_v24 = vsel %vm1183_vm1, %v2645_v62, 0 }
 0xcf7   : > { %5270 = vmatpush3.bf16.xpose.msra.mxu0 %v2661_v6 }
 0xcf8   : > { %5271 = vmatprep.subr.bf16.mxu0 %v6113_v0 }
 0xcf9   : > { %v2647_v25 = vpop.permute.xlu0 %2646 }
 0xcfa   : > { %v2673_v31 = vsel %vm1183_vm1, %v2647_v25, 0 }
 0xcfd   : > { %v2631_v32 = vpop.permute.xlu0 %2630 }
 0xcff   : > { %5272 = vmatpush3.bf16.xpose.msra.mxu0 %v2664_v18 }
 0xd00   : > { %5273 = vmatprep.subr.bf16.mxu0 %v6113_v0 }
 0xd07   : > { %5274 = vmatpush3.bf16.xpose.msra.mxu0 %v2667_v4 }
 0xd08   : > { %5275 = vmatprep.subr.bf16.mxu0 %v6113_v0 }
 0xd0f   : > { %5276 = vmatpush3.bf16.xpose.msra.mxu0 %v2670_v24 }
 0xd10   : > { %5277 = vmatprep.subr.bf16.mxu0 %v6113_v0 }
 0xd17   : > { %5278 = vmatpush3.bf16.xpose.msra.mxu0 %v2673_v31 }
 0xd18   : > { %5303 = vmatprep.subr.bf16.mxu0 %v6113_v0 }
 0xd1e   : > { %5280 = vmatmul.mubr.msk.bf16.vlgmr.msra.gmra.mrb[68].mxu0 %vm1183_vm1, %v2631_v32 }
 0xd1f   : > { %5319 = vmatprep.mubr.msk.bf16.mxu0 %vm6114_vm0, %v6113_v0 }
 0xdb8   : > { %v2505_v17 = vpop.f32.mrb[72].mxu1 }
 0xdb9   : > { %v2575_v40 = vpack.c.bf16 %v7268_v5, %v2505_v17  ;;  %v5235_v9 = vpop.f32.mrb[73].mxu1  ;;  %v2722_v5 = vpop.permute.xlu1 %2721 }
 0xdba   : > { %v2508_v43 = vpop.f32.mrb[74].mxu1  ;;  %v2743_v41 = vsel %vm1183_vm1, %v2722_v5, 0 }
 0xdbb   : > { %v5236_v57 = vpop.f32.mrb[75].mxu1  ;;  %5260 = vmatmul.mubr.msk.bf16.vlgmr.msra.gmra.mrb[76].mxu1 %vm1183_vm1, %v2575_v40 }
 0xdbc   : > { %5284 = vmatpush3.bf16.xpose.msra.mxu1 %v2737_v53  ;;  %5299 = vmatprep.mubr.msk.bf16.mxu1 %vm6114_vm0, %v6113_v0 }
 0xdbd   : > { %5285 = vmatprep.subr.bf16.mxu1 %v6113_v0  ;;  %v2724_v36 = vpop.permute.xlu1 %2723 }
 0xdbe   : > { %v2746_v44 = vsel %vm1183_vm1, %v2724_v36, 0 }
 0xdc1   : > { %v2726_v51 = vpop.permute.xlu1 %2725 }
 0xdc2   : > { %v2749_v52 = vsel %vm1183_vm1, %v2726_v51, 0 }
 0xdc4   : > { %5286 = vmatpush3.bf16.xpose.msra.mxu1 %v2740_v58 }
 0xdc5   : > { %5287 = vmatprep.subr.bf16.mxu1 %v6113_v0  ;;  %v2728_v6 = vpop.permute.xlu1 %2727 }
 0xdc6   : > { %v2752_v12 = vsel %vm1183_vm1, %v2728_v6, 0 }
 0xdc9   : > { %v2730_v18 = vpop.permute.xlu1 %2729 }
 0xdca   : > { %v2755_v19 = vsel %vm1183_vm1, %v2730_v18, 0 }
 0xdcc   : > { %5288 = vmatpush3.bf16.xpose.msra.mxu1 %v2743_v41 }
 0xdcd   : > { %5289 = vmatprep.subr.bf16.mxu1 %v6113_v0  ;;  %v2732_v4 = vpop.permute.xlu1 %2731 }
 0xdce   : > { %v2758_v25 = vsel %vm1183_vm1, %v2732_v4, 0 }
 0xdd1   : > { %v2716_v13 = vpop.permute.xlu1 %2715 }
 0xdd4   : > { %5290 = vmatpush3.bf16.xpose.msra.mxu1 %v2746_v44 }
 0xdd5   : > { %5291 = vmatprep.subr.bf16.mxu1 %v6113_v0 }
 0xddc   : > { %5292 = vmatpush3.bf16.xpose.msra.mxu1 %v2749_v52 }
 0xddd   : > { %5293 = vmatprep.subr.bf16.mxu1 %v6113_v0 }
 0xde4   : > { %5294 = vmatpush3.bf16.xpose.msra.mxu1 %v2752_v12 }
 0xde5   : > { %5295 = vmatprep.subr.bf16.mxu1 %v6113_v0 }
 0xdec   : > { %5296 = vmatpush3.bf16.xpose.msra.mxu1 %v2755_v19 }
 0xded   : > { %5297 = vmatprep.subr.bf16.mxu1 %v6113_v0 }
 0xdf1   : > { %v2709_v62 = vpop.f32.mrb[68].mxu0 }
 0xdf2   : > { %2800 = vmax.xlane.f32.xlu0 %v2709_v62  ;;  %v5281_v24 = vpop.f32.mrb[69].mxu0 }
 0xdf3   : > { %v2712_v31 = vpop.f32.mrb[70].mxu0 }
 0xdf4   : > { %5298 = vmatpush3.bf16.xpose.msra.mxu1 %v2758_v25  ;;  %v5282_v32 = vpop.f32.mrb[71].mxu0 }
 0xdf5   : > { %5323 = vmatprep.subr.bf16.mxu1 %v6113_v0 }
 0xdfb   : > { %5300 = vmatmul.mubr.msk.bf16.vlgmr.msra.gmra.mrb[80].mxu1 %vm1183_vm1, %v2716_v13 }
 0xdfc   : > { %5339 = vmatprep.mubr.msk.bf16.mxu1 %vm6114_vm0, %v6113_v0 }
 0xe08   : > { %2822 = vrot.lane.b32.xlu0 %v6728_v16, %s6118_s29 }
 0xe7f   : > { %v2801_v17 = vpop.xlane.xlu0 %2800 }
 0xe80   : > { %v2804_v40 = vsub.f32 %v2709_v62, %v2801_v17 }
 0xe82   : > { %v2806_v9 = vmul.f32 1.442695, %v2804_v40 }
 0xe83   : > { %v2823_v43 = vpop.permute.xlu0 %2822 }
 0xe84   : > { %5783 = vpow2.f32 %v2806_v9  ;;  %5304 = vmatpush3.bf16.msra.mxu0 %v2823_v43 }
 0xe85   : > { %5305 = vmatprep.subr.bf16.mxu0 %v6113_v0 }
 0xe8e   : > { %v5784_v53 = vpop.eup %5783  ;;  %v2621_v57 = vpop.f32.mrb[76].mxu1 }
 0xe8f   : > { %v7350_v63 = vadd.f32 %v2621_v57, %v7249_v42  ;;  %2810 = vadd.xlane.f32.xlu0 %v5784_v53  ;;  %v5261_v58 = vpop.f32.mrb[77].mxu1 }
 0xe90   : > { %v2624_v5 = vpop.f32.mrb[78].mxu1 }
 0xe91   : > { %v7353_v41 = vadd.f32 %v2624_v5, %v7252_v56  ;;  %v5262_v36 = vpop.f32.mrb[79].mxu1 }
 0xea5   : > { %2824 = vrot.lane.b32.xlu0 %v6726_v15, %s6118_s29 }
 0xea9   : > { %2826 = vrot.lane.b32.xlu0 %v6740_v30, %s6118_s29 }
 0xead   : > { %2828 = vrot.lane.b32.xlu0 %v6737_v29, %s6118_s29 }
 0xeb1   : > { %2830 = vrot.lane.b32.xlu0 %v6752_v46, %s6118_s29 }
 0xeb5   : > { %2832 = vrot.lane.b32.xlu0 %v6749_v45, %s6118_s29 }
 0xeb9   : > { %2834 = vrot.lane.b32.xlu0 %v6764_v61, %s6118_s29 }
 0xebd   : > { %2836 = vrot.lane.b32.xlu0 %v6761_v14, %s6118_s29 }
 0xec1   : > { %3007 = vrot.lane.b32.xlu0 %v6586_v23, %s6119_s10 }
 0xec5   : > { %3009 = vrot.lane.b32.xlu0 %v6584_v22, %s6119_s10 }
 0xec9   : > { %3011 = vrot.lane.b32.xlu0 %v6597_v34, %s6119_s10 }
 0xecd   : > { %3013 = vrot.lane.b32.xlu0 %v6595_v33, %s6119_s10 }
 0xece   : > { %v2794_v42 = vpop.f32.mrb[80].mxu1 }
 0xecf   : > { %2802 = vmax.xlane.f32.xlu1 %v2794_v42  ;;  %v5301_v56 = vpop.f32.mrb[81].mxu1 }
 0xed0   : > { %v2797_v44 = vpop.f32.mrb[82].mxu1  ;;  %v5747_v56 = vld [vmem:[#allocation11 + $0x20] sm:$0xff]  }
 0xed1   : > { %v5302_v51 = vpop.f32.mrb[83].mxu1  ;;  %3015 = vrot.lane.b32.xlu0 %v6612_v49, %s6119_s10 }
 0xed5   : > { %3017 = vrot.lane.b32.xlu0 %v6610_v48, %s6119_s10 }
 0xed9   : > { %3019 = vrot.lane.b32.xlu0 %v6623_v60, %s6119_s10 }
 0xedd   : > { %3021 = vrot.lane.b32.xlu0 %v6621_v59, %s6119_s10 }
 0xee0   : > { %2886 = vrot.lane.b32.xlu1 %v6776_v11, %s6118_s29 }
 0xee1   : > { %3005 = vrot.lane.b32.xlu0 %v6692_v35, %s6119_s10 }
 0xee4   : > { %2888 = vrot.lane.b32.xlu1 %v6773_v10, %s6118_s29 }
 0xee8   : > { %2890 = vrot.lane.b32.xlu1 %v6788_v28, %s6118_s29 }
 0xeec   : > { %2892 = vrot.lane.b32.xlu1 %v6785_v27, %s6118_s29 }
 0xef0   : > { %2894 = vrot.lane.b32.xlu1 %v6800_v50, %s6118_s29 }
 0xef4   : > { %2896 = vrot.lane.b32.xlu1 %v6797_v47, %s6118_s29 }
 0xef8   : > { %2898 = vrot.lane.b32.xlu1 %v6812_v2, %s6118_s29 }
 0xf1c   : > { %v2811_v52 = vpop.xlane.xlu0 %2810 }
 0xf1d   : > { %5785 = vrcp.f32 %v2811_v52 }
 0xf20   : > { %v2825_v6 = vpop.permute.xlu0 %2824 }
 0xf21   : > { %5306 = vmatpush3.bf16.msra.mxu0 %v2825_v6 }
 0xf22   : > { %5307 = vmatprep.subr.bf16.mxu0 %v6113_v0 }
 0xf24   : > { %v2827_v12 = vpop.permute.xlu0 %2826 }
 0xf25   : > { %5308 = vmatpush3.bf16.msra.mxu0 %v2827_v12 }
 0xf26   : > { %5309 = vmatprep.subr.bf16.mxu0 %v6113_v0 }
 0xf27   : > { %v5786_v18 = vpop.eup %5785 }
 0xf28   : > { %v2829_v19 = vpop.permute.xlu0 %2828  ;;  %v2816_v4 = vmul.f32 %v5786_v18, %v5784_v53 }
 0xf29   : > { %5310 = vmatpush3.bf16.msra.mxu0 %v2829_v19 }
 0xf2a   : > { %5311 = vmatprep.subr.bf16.mxu0 %v6113_v0  ;;  %v7405_v62 = vadd.f32 %v2816_v4, %v7301_v39  ;;  %v2820_v13 = vpack.c.bf16 %v2816_v4, %v2816_v4 }
 0xf2c   : > { %v2831_v24 = vpop.permute.xlu0 %2830 }
 0xf2d   : > { %5312 = vmatpush3.bf16.msra.mxu0 %v2831_v24 }
 0xf2e   : > { %5313 = vmatprep.subr.bf16.mxu0 %v6113_v0 }
 0xf30   : > { %v2833_v25 = vpop.permute.xlu0 %2832 }
 0xf31   : > { %5314 = vmatpush3.bf16.msra.mxu0 %v2833_v25 }
 0xf32   : > { %5315 = vmatprep.subr.bf16.mxu0 %v6113_v0 }
 0xf34   : > { %v2835_v31 = vpop.permute.xlu0 %2834 }
 0xf35   : > { %5316 = vmatpush3.bf16.msra.mxu0 %v2835_v31 }
 0xf36   : > { %5317 = vmatprep.subr.bf16.mxu0 %v6113_v0 }
 0xf38   : > { %v2837_v32 = vpop.permute.xlu0 %2836 }
 0xf39   : > { %5318 = vmatpush3.bf16.msra.mxu0 %v2837_v32 }
 0xf3a   : > { %5343 = vmatprep.subr.bf16.mxu0 %v6113_v0 }
 0xf3c   : > { %5320 = vmatmul.mubr.bf16.vlgmr.msra.gmra.mrb[72].mxu0 %v2820_v13  ;;  %v3008_v12 = vpop.permute.xlu0 %3007 }
 0xf3d   : > { %5345 = vmatprep.mubr.msk.bf16.mxu0 %vm6114_vm0, %v6113_v0  ;;  %5344 = vmatpush3.bf16.msra.mxu0 %v5747_v56  ;;  %v3027_v4 = vsel %vm1183_vm1, %v3008_v12, 0 }
 0xf3e   : > { %5369 = vmatprep.subr.bf16.mxu0 %v6113_v0 }
 0xf40   : > { %v3010_v24 = vpop.permute.xlu0 %3009 }
 0xf41   : > { %v3030_v32 = vsel %vm1183_vm1, %v3010_v24, 0 }
 0xf5c   : > { %v2803_v39 = vpop.xlane.xlu1 %2802 }
 0xf5d   : > { %v2805_v17 = vsub.f32 %v2794_v42, %v2803_v39 }
 0xf5f   : > { %v2808_v40 = vmul.f32 1.442695, %v2805_v17 }
 0xf60   : > { %v2887_v9 = vpop.permute.xlu1 %2886 }
 0xf61   : > { %5787 = vpow2.f32 %v2808_v40  ;;  %5324 = vmatpush3.bf16.msra.mxu1 %v2887_v9 }
 0xf62   : > { %5325 = vmatprep.subr.bf16.mxu1 %v6113_v0 }
 0xf64   : > { %v2889_v43 = vpop.permute.xlu1 %2888 }
 0xf65   : > { %5326 = vmatpush3.bf16.msra.mxu1 %v2889_v43 }
 0xf66   : > { %5327 = vmatprep.subr.bf16.mxu1 %v6113_v0 }
 0xf68   : > { %v2891_v53 = vpop.permute.xlu1 %2890 }
 0xf69   : > { %5328 = vmatpush3.bf16.msra.mxu1 %v2891_v53 }
 0xf6a   : > { %5329 = vmatprep.subr.bf16.mxu1 %v6113_v0 }
 0xf6b   : > { %v5788_v57 = vpop.eup %5787 }
 0xf6c   : > { %2812 = vadd.xlane.f32.xlu1 %v5788_v57  ;;  %v2893_v58 = vpop.permute.xlu1 %2892 }
 0xf6d   : > { %5330 = vmatpush3.bf16.msra.mxu1 %v2893_v58 }
 0xf6e   : > { %5331 = vmatprep.subr.bf16.mxu1 %v6113_v0 }
 0xf70   : > { %v2895_v5 = vpop.permute.xlu1 %2894 }
 0xf71   : > { %5332 = vmatpush3.bf16.msra.mxu1 %v2895_v5 }
 0xf72   : > { %5333 = vmatprep.subr.bf16.mxu1 %v6113_v0 }
 0xf74   : > { %v2897_v36 = vpop.permute.xlu1 %2896 }
 0xf75   : > { %5334 = vmatpush3.bf16.msra.mxu1 %v2897_v36 }
 0xf76   : > { %5335 = vmatprep.subr.bf16.mxu1 %v6113_v0 }
 0xf78   : > { %v2899_v42 = vpop.permute.xlu1 %2898 }
 0xf79   : > { %5336 = vmatpush3.bf16.msra.mxu1 %v2899_v42 }
 0xf7a   : > { %5337 = vmatprep.subr.bf16.mxu1 %v6113_v0 }
 0xf7d   : > { %2900 = vrot.lane.b32.xlu1 %v6809_v1, %s6118_s29 }
 0xf81   : > { %3092 = vrot.lane.b32.xlu1 %v6634_v8, %s6119_s10 }
 0xf85   : > { %3094 = vrot.lane.b32.xlu1 %v6632_v7, %s6119_s10 }
 0xf89   : > { %3096 = vrot.lane.b32.xlu1 %v6652_v21, %s6119_s10 }
 0xf8d   : > { %3098 = vrot.lane.b32.xlu1 %v6650_v20, %s6119_s10 }
 0xf91   : > { %3100 = vrot.lane.b32.xlu1 %v6666_v38, %s6119_s10 }
 0xf95   : > { %3102 = vrot.lane.b32.xlu1 %v6664_v37, %s6119_s10 }
 0xf99   : > { %3104 = vrot.lane.b32.xlu1 %v6684_v55, %s6119_s10 }
 0xf9d   : > { %3106 = vrot.lane.b32.xlu1 %v6682_v54, %s6119_s10 }
 0xfa1   : > { %3090 = vrot.lane.b32.xlu1 %v6711_v3, %s6119_s10 }
 0xff9   : > { %v2813_v44 = vpop.xlane.xlu1 %2812 }
 0xffa   : > { %5789 = vrcp.f32 %v2813_v44 }
 0xffd   : > { %v2901_v51 = vpop.permute.xlu1 %2900 }
 0xffe   : > { %5338 = vmatpush3.bf16.msra.mxu1 %v2901_v51 }
 0xfff   : > { %5349 = vmatprep.subr.bf16.mxu1 %v6113_v0 }
0x1001   : > { %v3093_v51 = vpop.permute.xlu1 %3092 }
0x1004   : > { %v5790_v52 = vpop.eup %5789 }
0x1005   : > { %v2817_v6 = vmul.f32 %v5790_v52, %v5788_v57 }
0x1007   : > { %v7443_v18 = vadd.f32 %v2817_v6, %v7240_v26  ;;  %v2821_v19 = vpack.c.bf16 %v2817_v6, %v2817_v6  ;;  %v3012_v26 = vpop.permute.xlu0 %3011 }
0x1008   : > { %v3033_v17 = vsel %vm1183_vm1, %v3012_v26, 0 }
0x1009   : > { %5340 = vmatmul.mubr.bf16.vlgmr.msra.gmra.mrb[84].mxu1 %v2821_v19 }
0x100a   : > { %5350 = vmatpush3.bf16.xpose.msra.mxu1 %v3027_v4  ;;  %5365 = vmatprep.mubr.msk.bf16.mxu1 %vm6114_vm0, %v6113_v0  ;;  %v3112_v4 = vsel %vm1183_vm1, %v3093_v51, 0 }
0x100b   : > { %5351 = vmatprep.subr.bf16.mxu1 %v6113_v0  ;;  %v3014_v40 = vpop.permute.xlu0 %3013 }
0x100c   : > { %v3036_v9 = vsel %vm1183_vm1, %v3014_v40, 0 }
0x100f   : > { %v2880_v25 = vpop.f32.mrb[72].mxu0  ;;  %v3016_v43 = vpop.permute.xlu0 %3015 }
0x1010   : > { %v5321_v31 = vpop.f32.mrb[73].mxu0  ;;  %v3039_v53 = vsel %vm1183_vm1, %v3016_v43, 0 }
0x1011   : > { %v2883_v13 = vpop.f32.mrb[74].mxu0  ;;  %v3095_v31 = vpop.permute.xlu1 %3094 }
0x1012   : > { %5352 = vmatpush3.bf16.xpose.msra.mxu1 %v3030_v32  ;;  %v5322_v39 = vpop.f32.mrb[75].mxu0  ;;  %v3115_v32 = vsel %vm1183_vm1, %v3095_v31, 0 }
0x1013   : > { %5353 = vmatprep.subr.bf16.mxu1 %v6113_v0  ;;  %v3018_v57 = vpop.permute.xlu0 %3017 }
0x1014   : > { %v3042_v58 = vsel %vm1183_vm1, %v3018_v57, 0 }
0x1017   : > { %v3020_v5 = vpop.permute.xlu0 %3019 }
0x1018   : > { %v3045_v36 = vsel %vm1183_vm1, %v3020_v5, 0 }
0x101a   : > { %5354 = vmatpush3.bf16.xpose.msra.mxu1 %v3033_v17 }
0x101b   : > { %5355 = vmatprep.subr.bf16.mxu1 %v6113_v0  ;;  %v3022_v42 = vpop.permute.xlu0 %3021 }
0x101c   : > { %v3048_v56 = vsel %vm1183_vm1, %v3022_v42, 0 }
0x101f   : > { %v3006_v44 = vpop.permute.xlu0 %3005 }
0x1022   : > { %5356 = vmatpush3.bf16.xpose.msra.mxu1 %v3036_v9 }
0x1023   : > { %5357 = vmatprep.subr.bf16.mxu1 %v6113_v0 }
0x102a   : > { %5358 = vmatpush3.bf16.xpose.msra.mxu1 %v3039_v53 }
0x102b   : > { %5359 = vmatprep.subr.bf16.mxu1 %v6113_v0 }
0x1032   : > { %5360 = vmatpush3.bf16.xpose.msra.mxu1 %v3042_v58 }
0x1033   : > { %5361 = vmatprep.subr.bf16.mxu1 %v6113_v0 }
0x103a   : > { %5362 = vmatpush3.bf16.xpose.msra.mxu1 %v3045_v36 }
0x103b   : > { %5363 = vmatprep.subr.bf16.mxu1 %v6113_v0 }
0x1042   : > { %5364 = vmatpush3.bf16.xpose.msra.mxu1 %v3048_v56 }
0x1043   : > { %5389 = vmatprep.subr.bf16.mxu1 %v6113_v0 }
0x1049   : > { %5366 = vmatmul.mubr.msk.bf16.vlgmr.msra.gmra.mrb[88].mxu1 %vm1183_vm1, %v3006_v44 }
0x104a   : > { %5405 = vmatprep.mubr.msk.bf16.mxu1 %vm6114_vm0, %v6113_v0 }
0x10dc   : > { %v2944_v52 = vpop.f32.mrb[84].mxu1 }
0x10dd   : > { %v2950_v6 = vpack.c.bf16 %v2944_v52, %v2880_v25  ;;  %v5341_v12 = vpop.f32.mrb[85].mxu1  ;;  %v3097_v25 = vpop.permute.xlu1 %3096 }
0x10de   : > { %v2947_v19 = vpop.f32.mrb[86].mxu1  ;;  %v3118_v13 = vsel %vm1183_vm1, %v3097_v25, 0 }
0x10df   : > { %v5342_v24 = vpop.f32.mrb[87].mxu1  ;;  %5346 = vmatmul.mubr.msk.bf16.vlgmr.msra.gmra.mrb[76].mxu0 %vm1183_vm1, %v2950_v6 }
0x10e0   : > { %5370 = vmatpush3.bf16.xpose.msra.mxu0 %v3112_v4  ;;  %5385 = vmatprep.mubr.msk.bf16.mxu0 %vm6114_vm0, %v6113_v0 }
0x10e1   : > { %5371 = vmatprep.subr.bf16.mxu0 %v6113_v0  ;;  %v3099_v39 = vpop.permute.xlu1 %3098 }
0x10e2   : > { %v3121_v26 = vsel %vm1183_vm1, %v3099_v39, 0 }
0x10e5   : > { %v3101_v17 = vpop.permute.xlu1 %3100 }
0x10e6   : > { %v3124_v40 = vsel %vm1183_vm1, %v3101_v17, 0 }
0x10e8   : > { %5372 = vmatpush3.bf16.xpose.msra.mxu0 %v3115_v32 }
0x10e9   : > { %5373 = vmatprep.subr.bf16.mxu0 %v6113_v0  ;;  %v3103_v9 = vpop.permute.xlu1 %3102 }
0x10ea   : > { %v3127_v43 = vsel %vm1183_vm1, %v3103_v9, 0 }
0x10ed   : > { %v3105_v53 = vpop.permute.xlu1 %3104 }
0x10ee   : > { %v3130_v57 = vsel %vm1183_vm1, %v3105_v53, 0 }
0x10f0   : > { %5374 = vmatpush3.bf16.xpose.msra.mxu0 %v3118_v13 }
0x10f1   : > { %5375 = vmatprep.subr.bf16.mxu0 %v6113_v0  ;;  %v3107_v58 = vpop.permute.xlu1 %3106 }
0x10f2   : > { %v3133_v5 = vsel %vm1183_vm1, %v3107_v58, 0 }
0x10f5   : > { %v3091_v56 = vpop.permute.xlu1 %3090 }
0x10f8   : > { %5376 = vmatpush3.bf16.xpose.msra.mxu0 %v3121_v26 }
0x10f9   : > { %5377 = vmatprep.subr.bf16.mxu0 %v6113_v0 }
0x1100   : > { %5378 = vmatpush3.bf16.xpose.msra.mxu0 %v3124_v40 }
0x1101   : > { %5379 = vmatprep.subr.bf16.mxu0 %v6113_v0 }
0x1108   : > { %5380 = vmatpush3.bf16.xpose.msra.mxu0 %v3127_v43 }
0x1109   : > { %5381 = vmatprep.subr.bf16.mxu0 %v6113_v0 }
0x1110   : > { %5382 = vmatpush3.bf16.xpose.msra.mxu0 %v3130_v57 }
0x1111   : > { %5383 = vmatprep.subr.bf16.mxu0 %v6113_v0 }
0x1118   : > { %5384 = vmatpush3.bf16.xpose.msra.mxu0 %v3133_v5 }
0x1119   : > { %5409 = vmatprep.subr.bf16.mxu0 %v6113_v0 }
0x111c   : > { %v3084_v36 = vpop.f32.mrb[88].mxu1 }
0x111d   : > { %3175 = vmax.xlane.f32.xlu0 %v3084_v36  ;;  %v5367_v42 = vpop.f32.mrb[89].mxu1 }
0x111e   : > { %v3087_v44 = vpop.f32.mrb[90].mxu1 }
0x111f   : > { %v5368_v51 = vpop.f32.mrb[91].mxu1  ;;  %5386 = vmatmul.mubr.msk.bf16.vlgmr.msra.gmra.mrb[80].mxu0 %vm1183_vm1, %v3091_v56 }
0x1120   : > { %5425 = vmatprep.mubr.msk.bf16.mxu0 %vm6114_vm0, %v6113_v0 }
0x1133   : > { %3197 = vrot.lane.b32.xlu0 %v6728_v16, %s6119_s10 }
0x11aa   : > { %v3176_v52 = vpop.xlane.xlu0 %3175 }
0x11ab   : > { %v3179_v6 = vsub.f32 %v3084_v36, %v3176_v52 }
0x11ad   : > { %v3181_v12 = vmul.f32 1.442695, %v3179_v6 }
0x11ae   : > { %v3198_v19 = vpop.permute.xlu0 %3197 }
0x11af   : > { %5791 = vpow2.f32 %v3181_v12  ;;  %5390 = vmatpush3.bf16.msra.mxu1 %v3198_v19 }
0x11b0   : > { %5391 = vmatprep.subr.bf16.mxu1 %v6113_v0 }
0x11b2   : > { %v2996_v4 = vpop.f32.mrb[76].mxu0 }
0x11b3   : > { %v7492_v24 = vadd.f32 %v2996_v4, %v7350_v63  ;;  %v5347_v31 = vpop.f32.mrb[77].mxu0 }
0x11b4   : > { %v2999_v32 = vpop.f32.mrb[78].mxu0 }
0x11b5   : > { %v7495_v25 = vadd.f32 %v2999_v32, %v7353_v41  ;;  %v5348_v13 = vpop.f32.mrb[79].mxu0 }
0x11b9   : > { %v5792_v39 = vpop.eup %5791 }
0x11ba   : > { %3185 = vadd.xlane.f32.xlu0 %v5792_v39 }
0x11d0   : > { %3199 = vrot.lane.b32.xlu0 %v6726_v15, %s6119_s10 }
0x11d4   : > { %3201 = vrot.lane.b32.xlu0 %v6740_v30, %s6119_s10 }
0x11d8   : > { %3203 = vrot.lane.b32.xlu0 %v6737_v29, %s6119_s10 }
0x11dc   : > { %3205 = vrot.lane.b32.xlu0 %v6752_v46, %s6119_s10 }
0x11e0   : > { %3207 = vrot.lane.b32.xlu0 %v6749_v45, %s6119_s10 }
0x11e4   : > { %3209 = vrot.lane.b32.xlu0 %v6764_v61, %s6119_s10 }
0x11e8   : > { %3211 = vrot.lane.b32.xlu0 %v6761_v14, %s6119_s10 }
0x11ec   : > { %3382 = vrot.lane.b32.xlu0 %v6586_v23, %s6120_s13 }
0x11f0   : > { %3384 = vrot.lane.b32.xlu0 %v6584_v22, %s6120_s13 }
0x11f2   : > { %v3169_v63 = vpop.f32.mrb[80].mxu0 }
0x11f3   : > { %3177 = vmax.xlane.f32.xlu1 %v3169_v63  ;;  %v5387_v41 = vpop.f32.mrb[81].mxu0 }
0x11f4   : > { %v3172_v26 = vpop.f32.mrb[82].mxu0  ;;  %3386 = vrot.lane.b32.xlu0 %v6597_v34, %s6120_s13  ;;  %v5748_v41 = vld [vmem:[#allocation11 + $0x28] sm:$0xff]  }
0x11f5   : > { %v5388_v17 = vpop.f32.mrb[83].mxu0 }
0x11f8   : > { %3388 = vrot.lane.b32.xlu0 %v6595_v33, %s6120_s13 }
0x11fc   : > { %3390 = vrot.lane.b32.xlu0 %v6612_v49, %s6120_s13 }
0x1200   : > { %3392 = vrot.lane.b32.xlu0 %v6610_v48, %s6120_s13 }
0x1204   : > { %3261 = vrot.lane.b32.xlu1 %v6776_v11, %s6119_s10  ;;  %3394 = vrot.lane.b32.xlu0 %v6623_v60, %s6120_s13 }
0x1208   : > { %3263 = vrot.lane.b32.xlu1 %v6773_v10, %s6119_s10  ;;  %3396 = vrot.lane.b32.xlu0 %v6621_v59, %s6120_s13 }
0x120c   : > { %3265 = vrot.lane.b32.xlu1 %v6788_v28, %s6119_s10  ;;  %3380 = vrot.lane.b32.xlu0 %v6692_v35, %s6120_s13 }
0x1210   : > { %3267 = vrot.lane.b32.xlu1 %v6785_v27, %s6119_s10 }
0x1214   : > { %3269 = vrot.lane.b32.xlu1 %v6800_v50, %s6119_s10 }
0x1218   : > { %3271 = vrot.lane.b32.xlu1 %v6797_v47, %s6119_s10 }
0x121c   : > { %3273 = vrot.lane.b32.xlu1 %v6812_v2, %s6119_s10 }
0x1247   : > { %v3186_v40 = vpop.xlane.xlu0 %3185 }
0x1248   : > { %5793 = vrcp.f32 %v3186_v40 }
0x124b   : > { %v3200_v9 = vpop.permute.xlu0 %3199 }
0x124c   : > { %5392 = vmatpush3.bf16.msra.mxu1 %v3200_v9 }
0x124d   : > { %5393 = vmatprep.subr.bf16.mxu1 %v6113_v0 }
0x124f   : > { %v3202_v43 = vpop.permute.xlu0 %3201 }
0x1250   : > { %5394 = vmatpush3.bf16.msra.mxu1 %v3202_v43 }
0x1251   : > { %5395 = vmatprep.subr.bf16.mxu1 %v6113_v0 }
0x1252   : > { %v5794_v53 = vpop.eup %5793 }
0x1253   : > { %v3204_v57 = vpop.permute.xlu0 %3203  ;;  %v3191_v58 = vmul.f32 %v5794_v53, %v5792_v39 }
0x1254   : > { %5396 = vmatpush3.bf16.msra.mxu1 %v3204_v57 }
0x1255   : > { %5397 = vmatprep.subr.bf16.mxu1 %v6113_v0  ;;  %v7547_v5 = vadd.f32 %v3191_v58, %v7405_v62  ;;  %v3195_v51 = vpack.c.bf16 %v3191_v58, %v3191_v58 }
0x1257   : > { %v3206_v36 = vpop.permute.xlu0 %3205 }
0x1258   : > { %5398 = vmatpush3.bf16.msra.mxu1 %v3206_v36 }
0x1259   : > { %5399 = vmatprep.subr.bf16.mxu1 %v6113_v0 }
0x125b   : > { %v3208_v42 = vpop.permute.xlu0 %3207 }
0x125c   : > { %5400 = vmatpush3.bf16.msra.mxu1 %v3208_v42 }
0x125d   : > { %5401 = vmatprep.subr.bf16.mxu1 %v6113_v0 }
0x125f   : > { %v3210_v56 = vpop.permute.xlu0 %3209 }
0x1260   : > { %5402 = vmatpush3.bf16.msra.mxu1 %v3210_v56 }
0x1261   : > { %5403 = vmatprep.subr.bf16.mxu1 %v6113_v0 }
0x1263   : > { %v3212_v44 = vpop.permute.xlu0 %3211 }
0x1264   : > { %5404 = vmatpush3.bf16.msra.mxu1 %v3212_v44 }
0x1265   : > { %5429 = vmatprep.subr.bf16.mxu1 %v6113_v0 }
0x1267   : > { %5406 = vmatmul.mubr.bf16.vlgmr.msra.gmra.mrb[92].mxu1 %v3195_v51  ;;  %v3383_v43 = vpop.permute.xlu0 %3382 }
0x1268   : > { %5431 = vmatprep.mubr.msk.bf16.mxu1 %vm6114_vm0, %v6113_v0  ;;  %5430 = vmatpush3.bf16.msra.mxu1 %v5748_v41  ;;  %v3402_v58 = vsel %vm1183_vm1, %v3383_v43, 0 }
0x1269   : > { %5455 = vmatprep.subr.bf16.mxu1 %v6113_v0 }
0x126b   : > { %v3385_v36 = vpop.permute.xlu0 %3384 }
0x126c   : > { %v3405_v42 = vsel %vm1183_vm1, %v3385_v36, 0 }
0x126f   : > { %v3387_v56 = vpop.permute.xlu0 %3386 }
0x1280   : > { %v3178_v62 = vpop.xlane.xlu1 %3177 }
0x1281   : > { %v3180_v52 = vsub.f32 %v3169_v63, %v3178_v62  ;;  %v3408_v62 = vsel %vm1183_vm1, %v3387_v56, 0 }
0x1283   : > { %v3183_v6 = vmul.f32 1.442695, %v3180_v52 }
0x1284   : > { %v3262_v12 = vpop.permute.xlu1 %3261 }
0x1285   : > { %5795 = vpow2.f32 %v3183_v6  ;;  %5410 = vmatpush3.bf16.msra.mxu0 %v3262_v12  ;;  %v3389_v6 = vpop.permute.xlu0 %3388 }
0x1286   : > { %5411 = vmatprep.subr.bf16.mxu0 %v6113_v0  ;;  %v3411_v12 = vsel %vm1183_vm1, %v3389_v6, 0 }
0x1288   : > { %v3264_v19 = vpop.permute.xlu1 %3263 }
0x1289   : > { %5412 = vmatpush3.bf16.msra.mxu0 %v3264_v19  ;;  %v3391_v19 = vpop.permute.xlu0 %3390 }
0x128a   : > { %5413 = vmatprep.subr.bf16.mxu0 %v6113_v0 }
0x128c   : > { %v3266_v4 = vpop.permute.xlu1 %3265 }
0x128d   : > { %5414 = vmatpush3.bf16.msra.mxu0 %v3266_v4  ;;  %v3414_v4 = vsel %vm1183_vm1, %v3391_v19, 0 }
0x128e   : > { %5415 = vmatprep.subr.bf16.mxu0 %v6113_v0 }
0x128f   : > { %v5796_v31 = vpop.eup %5795 }
0x1290   : > { %3187 = vadd.xlane.f32.xlu1 %v5796_v31  ;;  %v3268_v32 = vpop.permute.xlu1 %3267 }
0x1291   : > { %5416 = vmatpush3.bf16.msra.mxu0 %v3268_v32 }
0x1292   : > { %5417 = vmatprep.subr.bf16.mxu0 %v6113_v0 }
0x1294   : > { %v3270_v13 = vpop.permute.xlu1 %3269 }
0x1295   : > { %5418 = vmatpush3.bf16.msra.mxu0 %v3270_v13 }
0x1296   : > { %5419 = vmatprep.subr.bf16.mxu0 %v6113_v0 }
0x1298   : > { %v3272_v39 = vpop.permute.xlu1 %3271 }
0x1299   : > { %5420 = vmatpush3.bf16.msra.mxu0 %v3272_v39 }
0x129a   : > { %5421 = vmatprep.subr.bf16.mxu0 %v6113_v0 }
0x129c   : > { %v3274_v63 = vpop.permute.xlu1 %3273 }
0x129d   : > { %5422 = vmatpush3.bf16.msra.mxu0 %v3274_v63 }
0x129e   : > { %5423 = vmatprep.subr.bf16.mxu0 %v6113_v0 }
0x12a1   : > { %3275 = vrot.lane.b32.xlu1 %v6809_v1, %s6119_s10 }
0x12a5   : > { %3467 = vrot.lane.b32.xlu1 %v6634_v8, %s6120_s13 }
0x12a9   : > { %3469 = vrot.lane.b32.xlu1 %v6632_v7, %s6120_s13 }
0x12ad   : > { %3471 = vrot.lane.b32.xlu1 %v6652_v21, %s6120_s13 }
0x12b1   : > { %3473 = vrot.lane.b32.xlu1 %v6650_v20, %s6120_s13 }
0x12b5   : > { %3475 = vrot.lane.b32.xlu1 %v6666_v38, %s6120_s13 }
0x12b9   : > { %3477 = vrot.lane.b32.xlu1 %v6664_v37, %s6120_s13 }
0x12bd   : > { %3479 = vrot.lane.b32.xlu1 %v6684_v55, %s6120_s13 }
0x12c1   : > { %3481 = vrot.lane.b32.xlu1 %v6682_v54, %s6120_s13 }
0x12c5   : > { %3465 = vrot.lane.b32.xlu1 %v6711_v3, %s6120_s13 }
0x131d   : > { %v3188_v26 = vpop.xlane.xlu1 %3187 }
0x131e   : > { %5797 = vrcp.f32 %v3188_v26 }
0x1321   : > { %v3276_v17 = vpop.permute.xlu1 %3275 }
0x1322   : > { %5424 = vmatpush3.bf16.msra.mxu0 %v3276_v17 }
0x1323   : > { %5435 = vmatprep.subr.bf16.mxu0 %v6113_v0 }
0x1325   : > { %v3468_v17 = vpop.permute.xlu1 %3467 }
0x1328   : > { %v5798_v40 = vpop.eup %5797 }
0x1329   : > { %v3192_v9 = vmul.f32 %v5798_v40, %v5796_v31  ;;  %v3393_v31 = vpop.permute.xlu0 %3392 }
0x132a   : > { %v3417_v32 = vsel %vm1183_vm1, %v3393_v31, 0 }
0x132b   : > { %v7585_v53 = vadd.f32 %v3192_v9, %v7443_v18  ;;  %v3196_v57 = vpack.c.bf16 %v3192_v9, %v3192_v9 }
0x132d   : > { %5426 = vmatmul.mubr.bf16.vlgmr.msra.gmra.mrb[84].mxu0 %v3196_v57  ;;  %v3395_v13 = vpop.permute.xlu0 %3394 }
0x132e   : > { %5436 = vmatpush3.bf16.xpose.msra.mxu0 %v3402_v58  ;;  %5451 = vmatprep.mubr.msk.bf16.mxu0 %vm6114_vm0, %v6113_v0  ;;  %v3420_v39 = vsel %vm1183_vm1, %v3395_v13, 0  ;;  %v3487_v58 = vsel %vm1183_vm1, %v3468_v17, 0 }
0x132f   : > { %5437 = vmatprep.subr.bf16.mxu0 %v6113_v0 }
0x1331   : > { %v3397_v63 = vpop.permute.xlu0 %3396 }
0x1332   : > { %v3423_v41 = vsel %vm1183_vm1, %v3397_v63, 0 }
0x1335   : > { %v3381_v26 = vpop.permute.xlu0 %3380 }
0x1336   : > { %5438 = vmatpush3.bf16.xpose.msra.mxu0 %v3405_v42  ;;  %v3470_v42 = vpop.permute.xlu1 %3469 }
0x1337   : > { %5439 = vmatprep.subr.bf16.mxu0 %v6113_v0  ;;  %v3490_v56 = vsel %vm1183_vm1, %v3470_v42, 0 }
0x133a   : > { %v3255_v44 = vpop.f32.mrb[92].mxu1 }
0x133b   : > { %v5407_v18 = vpop.f32.mrb[93].mxu1 }
0x133c   : > { %v3258_v51 = vpop.f32.mrb[94].mxu1 }
0x133d   : > { %v5408_v52 = vpop.f32.mrb[95].mxu1 }
0x133e   : > { %5440 = vmatpush3.bf16.xpose.msra.mxu0 %v3408_v62 }
0x133f   : > { %5441 = vmatprep.subr.bf16.mxu0 %v6113_v0 }
0x1346   : > { %5442 = vmatpush3.bf16.xpose.msra.mxu0 %v3411_v12 }
0x1347   : > { %5443 = vmatprep.subr.bf16.mxu0 %v6113_v0 }
0x134e   : > { %5444 = vmatpush3.bf16.xpose.msra.mxu0 %v3414_v4 }
0x134f   : > { %5445 = vmatprep.subr.bf16.mxu0 %v6113_v0 }
0x1356   : > { %5446 = vmatpush3.bf16.xpose.msra.mxu0 %v3417_v32 }
0x1357   : > { %5447 = vmatprep.subr.bf16.mxu0 %v6113_v0 }
0x135e   : > { %5448 = vmatpush3.bf16.xpose.msra.mxu0 %v3420_v39 }
0x135f   : > { %5449 = vmatprep.subr.bf16.mxu0 %v6113_v0 }
0x1366   : > { %5450 = vmatpush3.bf16.xpose.msra.mxu0 %v3423_v41 }
0x1367   : > { %5475 = vmatprep.subr.bf16.mxu0 %v6113_v0 }
0x136d   : > { %5452 = vmatmul.mubr.msk.bf16.vlgmr.msra.gmra.mrb[88].mxu0 %vm1183_vm1, %v3381_v26 }
0x136e   : > { %5491 = vmatprep.mubr.msk.bf16.mxu0 %vm6114_vm0, %v6113_v0 }
0x1400   : > { %v3319_v40 = vpop.f32.mrb[84].mxu0 }
0x1401   : > { %v3325_v9 = vpack.c.bf16 %v3319_v40, %v3255_v44  ;;  %v5427_v43 = vpop.f32.mrb[85].mxu0  ;;  %v3472_v44 = vpop.permute.xlu1 %3471 }
0x1402   : > { %v3322_v57 = vpop.f32.mrb[86].mxu0  ;;  %v3493_v18 = vsel %vm1183_vm1, %v3472_v44, 0 }
0x1403   : > { %v5428_v36 = vpop.f32.mrb[87].mxu0  ;;  %5432 = vmatmul.mubr.msk.bf16.vlgmr.msra.gmra.mrb[96].mxu1 %vm1183_vm1, %v3325_v9 }
0x1404   : > { %5456 = vmatpush3.bf16.xpose.msra.mxu1 %v3487_v58  ;;  %5471 = vmatprep.mubr.msk.bf16.mxu1 %vm6114_vm0, %v6113_v0 }
0x1405   : > { %5457 = vmatprep.subr.bf16.mxu1 %v6113_v0  ;;  %v3474_v51 = vpop.permute.xlu1 %3473 }
0x1406   : > { %v3496_v62 = vsel %vm1183_vm1, %v3474_v51, 0 }
0x1409   : > { %v3476_v52 = vpop.permute.xlu1 %3475 }
0x140a   : > { %v3499_v6 = vsel %vm1183_vm1, %v3476_v52, 0 }
0x140c   : > { %5458 = vmatpush3.bf16.xpose.msra.mxu1 %v3490_v56 }
0x140d   : > { %5459 = vmatprep.subr.bf16.mxu1 %v6113_v0  ;;  %v3478_v12 = vpop.permute.xlu1 %3477 }
0x140e   : > { %v3502_v19 = vsel %vm1183_vm1, %v3478_v12, 0 }
0x1411   : > { %v3480_v4 = vpop.permute.xlu1 %3479 }
0x1412   : > { %v3505_v31 = vsel %vm1183_vm1, %v3480_v4, 0 }
0x1414   : > { %5460 = vmatpush3.bf16.xpose.msra.mxu1 %v3493_v18 }
0x1415   : > { %5461 = vmatprep.subr.bf16.mxu1 %v6113_v0  ;;  %v3482_v32 = vpop.permute.xlu1 %3481 }
0x1416   : > { %v3508_v13 = vsel %vm1183_vm1, %v3482_v32, 0 }
0x1419   : > { %v3466_v41 = vpop.permute.xlu1 %3465 }
0x141c   : > { %5462 = vmatpush3.bf16.xpose.msra.mxu1 %v3496_v62 }
0x141d   : > { %5463 = vmatprep.subr.bf16.mxu1 %v6113_v0 }
0x1424   : > { %5464 = vmatpush3.bf16.xpose.msra.mxu1 %v3499_v6 }
0x1425   : > { %5465 = vmatprep.subr.bf16.mxu1 %v6113_v0 }
0x142c   : > { %5466 = vmatpush3.bf16.xpose.msra.mxu1 %v3502_v19 }
0x142d   : > { %5467 = vmatprep.subr.bf16.mxu1 %v6113_v0 }
0x1434   : > { %5468 = vmatpush3.bf16.xpose.msra.mxu1 %v3505_v31 }
0x1435   : > { %5469 = vmatprep.subr.bf16.mxu1 %v6113_v0 }
0x143c   : > { %5470 = vmatpush3.bf16.xpose.msra.mxu1 %v3508_v13 }
0x143d   : > { %5495 = vmatprep.subr.bf16.mxu1 %v6113_v0 }
0x1440   : > { %v3459_v39 = vpop.f32.mrb[88].mxu0 }
0x1441   : > { %3550 = vmax.xlane.f32.xlu0 %v3459_v39  ;;  %v5453_v63 = vpop.f32.mrb[89].mxu0 }
0x1442   : > { %v3462_v26 = vpop.f32.mrb[90].mxu0 }
0x1443   : > { %v5454_v17 = vpop.f32.mrb[91].mxu0  ;;  %5472 = vmatmul.mubr.msk.bf16.vlgmr.msra.gmra.mrb[100].mxu1 %vm1183_vm1, %v3466_v41 }
0x1444   : > { %5511 = vmatprep.mubr.msk.bf16.mxu1 %vm6114_vm0, %v6113_v0 }
0x1457   : > { %3572 = vrot.lane.b32.xlu0 %v6728_v16, %s6120_s13 }
0x14ce   : > { %v3551_v40 = vpop.xlane.xlu0 %3550 }
0x14cf   : > { %v3554_v9 = vsub.f32 %v3459_v39, %v3551_v40 }
0x14d1   : > { %v3556_v43 = vmul.f32 1.442695, %v3554_v9 }
0x14d2   : > { %v3573_v57 = vpop.permute.xlu0 %3572 }
0x14d3   : > { %5799 = vpow2.f32 %v3556_v43  ;;  %5476 = vmatpush3.bf16.msra.mxu0 %v3573_v57 }
0x14d4   : > { %5477 = vmatprep.subr.bf16.mxu0 %v6113_v0 }
0x14d6   : > { %v3371_v58 = vpop.f32.mrb[96].mxu1 }
0x14d7   : > { %v7634_v36 = vadd.f32 %v3371_v58, %v7492_v24  ;;  %v5433_v42 = vpop.f32.mrb[97].mxu1 }
0x14d8   : > { %v3374_v56 = vpop.f32.mrb[98].mxu1 }
0x14d9   : > { %v7637_v44 = vadd.f32 %v3374_v56, %v7495_v25  ;;  %v5434_v18 = vpop.f32.mrb[99].mxu1 }
0x14dd   : > { %v5800_v51 = vpop.eup %5799 }
0x14de   : > { %3560 = vadd.xlane.f32.xlu0 %v5800_v51 }
0x14f4   : > { %3574 = vrot.lane.b32.xlu0 %v6726_v15, %s6120_s13 }
0x14f8   : > { %3576 = vrot.lane.b32.xlu0 %v6740_v30, %s6120_s13 }
0x14fc   : > { %3578 = vrot.lane.b32.xlu0 %v6737_v29, %s6120_s13 }
0x1500   : > { %3580 = vrot.lane.b32.xlu0 %v6752_v46, %s6120_s13 }
0x1504   : > { %3582 = vrot.lane.b32.xlu0 %v6749_v45, %s6120_s13 }
0x1508   : > { %3584 = vrot.lane.b32.xlu0 %v6764_v61, %s6120_s13 }
0x150c   : > { %3586 = vrot.lane.b32.xlu0 %v6761_v14, %s6120_s13 }
0x1510   : > { %3757 = vrot.lane.b32.xlu0 %v6586_v23, %s6121_s26 }
0x1514   : > { %3759 = vrot.lane.b32.xlu0 %v6584_v22, %s6121_s26 }
0x1516   : > { %v3544_v24 = vpop.f32.mrb[100].mxu1 }
0x1517   : > { %3552 = vmax.xlane.f32.xlu1 %v3544_v24  ;;  %v5473_v25 = vpop.f32.mrb[101].mxu1 }
0x1518   : > { %3761 = vrot.lane.b32.xlu0 %v6597_v34, %s6121_s26  ;;  %v3547_v62 = vpop.f32.mrb[102].mxu1 }
0x1519   : > { %v5474_v52 = vpop.f32.mrb[103].mxu1 }
0x151c   : > { %3763 = vrot.lane.b32.xlu0 %v6595_v33, %s6121_s26 }
0x1520   : > { %3765 = vrot.lane.b32.xlu0 %v6612_v49, %s6121_s26 }
0x1524   : > { %3767 = vrot.lane.b32.xlu0 %v6610_v48, %s6121_s26 }
0x1528   : > { %3769 = vrot.lane.b32.xlu0 %v6623_v60, %s6121_s26  ;;  %3636 = vrot.lane.b32.xlu1 %v6776_v11, %s6120_s13 }
0x152c   : > { %3771 = vrot.lane.b32.xlu0 %v6621_v59, %s6121_s26  ;;  %3638 = vrot.lane.b32.xlu1 %v6773_v10, %s6120_s13 }
0x1530   : > { %3755 = vrot.lane.b32.xlu0 %v6692_v35, %s6121_s26  ;;  %3640 = vrot.lane.b32.xlu1 %v6788_v28, %s6120_s13 }
0x1534   : > { %3642 = vrot.lane.b32.xlu1 %v6785_v27, %s6120_s13 }
0x1538   : > { %3644 = vrot.lane.b32.xlu1 %v6800_v50, %s6120_s13 }
0x153c   : > { %3646 = vrot.lane.b32.xlu1 %v6797_v47, %s6120_s13 }
0x1540   : > { %3648 = vrot.lane.b32.xlu1 %v6812_v2, %s6120_s13 }
0x156b   : > { %v3561_v22 = vpop.xlane.xlu0 %3560 }
0x156c   : > { %5801 = vrcp.f32 %v3561_v22 }
0x156f   : > { %v3575_v23 = vpop.permute.xlu0 %3574 }
0x1570   : > { %5478 = vmatpush3.bf16.msra.mxu0 %v3575_v23 }
0x1571   : > { %5479 = vmatprep.subr.bf16.mxu0 %v6113_v0 }
0x1573   : > { %v3577_v33 = vpop.permute.xlu0 %3576 }
0x1574   : > { %5480 = vmatpush3.bf16.msra.mxu0 %v3577_v33 }
0x1575   : > { %5481 = vmatprep.subr.bf16.mxu0 %v6113_v0 }
0x1576   : > { %v5802_v34 = vpop.eup %5801 }
0x1577   : > { %v3579_v48 = vpop.permute.xlu0 %3578  ;;  %v3566_v49 = vmul.f32 %v5802_v34, %v5800_v51 }
0x1578   : > { %5482 = vmatpush3.bf16.msra.mxu0 %v3579_v48 }
0x1579   : > { %5483 = vmatprep.subr.bf16.mxu0 %v6113_v0  ;;  %v7689_v59 = vadd.f32 %v3566_v49, %v7547_v5  ;;  %v3570_v19 = vpack.c.bf16 %v3566_v49, %v3566_v49 }
0x157b   : > { %v3581_v60 = vpop.permute.xlu0 %3580 }
0x157c   : > { %5484 = vmatpush3.bf16.msra.mxu0 %v3581_v60 }
0x157d   : > { %5485 = vmatprep.subr.bf16.mxu0 %v6113_v0 }
0x157f   : > { %v3583_v35 = vpop.permute.xlu0 %3582 }
0x1580   : > { %5486 = vmatpush3.bf16.msra.mxu0 %v3583_v35 }
0x1581   : > { %5487 = vmatprep.subr.bf16.mxu0 %v6113_v0 }
0x1583   : > { %v3585_v6 = vpop.permute.xlu0 %3584 }
0x1584   : > { %5488 = vmatpush3.bf16.msra.mxu0 %v3585_v6 }
0x1585   : > { %5489 = vmatprep.subr.bf16.mxu0 %v6113_v0 }
0x1587   : > { %v3587_v12 = vpop.permute.xlu0 %3586 }
0x1588   : > { %5490 = vmatpush3.bf16.msra.mxu0 %v3587_v12 }
0x1589   : > { %5515 = vmatprep.subr.bf16.mxu0 %v6113_v0 }
0x158b   : > { %5492 = vmatmul.mubr.bf16.vlgmr.msra.gmra.mrb[92].mxu0 %v3570_v19 }
0x158c   : > { %5517 = vmatprep.mubr.msk.bf16.mxu0 %vm6114_vm0, %v6113_v0 }
0x15a4   : > { %v3553_v5 = vpop.xlane.xlu1 %3552 }
0x15a5   : > { %v3555_v4 = vsub.f32 %v3544_v24, %v3553_v5 }
0x15a7   : > { %v3558_v31 = vmul.f32 1.442695, %v3555_v4 }
0x15a8   : > { %v3637_v32 = vpop.permute.xlu1 %3636 }
0x15a9   : > { %5803 = vpow2.f32 %v3558_v31  ;;  %5496 = vmatpush3.bf16.msra.mxu1 %v3637_v32 }
0x15aa   : > { %5497 = vmatprep.subr.bf16.mxu1 %v6113_v0 }
0x15ac   : > { %v3639_v13 = vpop.permute.xlu1 %3638 }
0x15ad   : > { %5498 = vmatpush3.bf16.msra.mxu1 %v3639_v13 }
0x15ae   : > { %5499 = vmatprep.subr.bf16.mxu1 %v6113_v0 }
0x15b0   : > { %v3641_v39 = vpop.permute.xlu1 %3640 }
0x15b1   : > { %5500 = vmatpush3.bf16.msra.mxu1 %v3641_v39 }
0x15b2   : > { %5501 = vmatprep.subr.bf16.mxu1 %v6113_v0 }
0x15b3   : > { %v5804_v63 = vpop.eup %5803 }
0x15b4   : > { %3562 = vadd.xlane.f32.xlu1 %v5804_v63  ;;  %v3643_v41 = vpop.permute.xlu1 %3642 }
0x15b5   : > { %5502 = vmatpush3.bf16.msra.mxu1 %v3643_v41 }
0x15b6   : > { %5503 = vmatprep.subr.bf16.mxu1 %v6113_v0 }
0x15b8   : > { %v3645_v26 = vpop.permute.xlu1 %3644 }
0x15b9   : > { %5504 = vmatpush3.bf16.msra.mxu1 %v3645_v26 }
0x15ba   : > { %5505 = vmatprep.subr.bf16.mxu1 %v6113_v0 }
0x15bc   : > { %v3647_v17 = vpop.permute.xlu1 %3646 }
0x15bd   : > { %5506 = vmatpush3.bf16.msra.mxu1 %v3647_v17 }
0x15be   : > { %5507 = vmatprep.subr.bf16.mxu1 %v6113_v0 }
0x15c0   : > { %v3649_v40 = vpop.permute.xlu1 %3648 }
0x15c1   : > { %5508 = vmatpush3.bf16.msra.mxu1 %v3649_v40 }
0x15c2   : > { %5509 = vmatprep.subr.bf16.mxu1 %v6113_v0 }
0x15c5   : > { %3650 = vrot.lane.b32.xlu1 %v6809_v1, %s6120_s13 }
0x15c9   : > { %3842 = vrot.lane.b32.xlu1 %v6634_v8, %s6121_s26 }
0x15cd   : > { %3844 = vrot.lane.b32.xlu1 %v6632_v7, %s6121_s26  ;;  %v5749_v7 = vld [vmem:[#allocation11 + $0x30] sm:$0xff]  }
0x15ce   : > { %5516 = vmatpush3.bf16.msra.mxu0 %v5749_v7 }
0x15cf   : > { %5541 = vmatprep.subr.bf16.mxu0 %v6113_v0 }
0x15d1   : > { %3846 = vrot.lane.b32.xlu1 %v6652_v21, %s6121_s26 }
0x15d5   : > { %3848 = vrot.lane.b32.xlu1 %v6650_v20, %s6121_s26 }
0x15d9   : > { %3850 = vrot.lane.b32.xlu1 %v6666_v38, %s6121_s26  ;;  %v3758_v38 = vpop.permute.xlu0 %3757 }
0x15da   : > { %v3777_v9 = vsel %vm1183_vm1, %v3758_v38, 0 }
0x15dd   : > { %3852 = vrot.lane.b32.xlu1 %v6664_v37, %s6121_s26 }
0x15e1   : > { %3854 = vrot.lane.b32.xlu1 %v6684_v55, %s6121_s26 }
0x15e5   : > { %3856 = vrot.lane.b32.xlu1 %v6682_v54, %s6121_s26 }
0x15e9   : > { %3840 = vrot.lane.b32.xlu1 %v6711_v3, %s6121_s26  ;;  %v3760_v3 = vpop.permute.xlu0 %3759 }
0x15ea   : > { %v3780_v43 = vsel %vm1183_vm1, %v3760_v3, 0 }
0x15ed   : > { %v3762_v57 = vpop.permute.xlu0 %3761 }
0x15ee   : > { %v3783_v56 = vsel %vm1183_vm1, %v3762_v57, 0 }
0x15f1   : > { %v3764_v51 = vpop.permute.xlu0 %3763 }
0x15f2   : > { %v3786_v24 = vsel %vm1183_vm1, %v3764_v51, 0 }
0x15f5   : > { %v3766_v25 = vpop.permute.xlu0 %3765 }
0x15f6   : > { %v3789_v62 = vsel %vm1183_vm1, %v3766_v25, 0 }
0x15f9   : > { %v3768_v52 = vpop.permute.xlu0 %3767 }
0x15fa   : > { %v3792_v22 = vsel %vm1183_vm1, %v3768_v52, 0 }
0x15fd   : > { %v3770_v23 = vpop.permute.xlu0 %3769 }
0x15fe   : > { %v3795_v33 = vsel %vm1183_vm1, %v3770_v23, 0 }
0x1601   : > { %v3772_v34 = vpop.permute.xlu0 %3771 }
0x1602   : > { %v3798_v48 = vsel %vm1183_vm1, %v3772_v34, 0 }
0x1605   : > { %v3756_v49 = vpop.permute.xlu0 %3755 }
0x1641   : > { %v3563_v8 = vpop.xlane.xlu1 %3562 }
0x1642   : > { %5805 = vrcp.f32 %v3563_v8 }
0x1645   : > { %v3651_v20 = vpop.permute.xlu1 %3650 }
0x1646   : > { %5510 = vmatpush3.bf16.msra.mxu1 %v3651_v20 }
0x1647   : > { %5521 = vmatprep.subr.bf16.mxu1 %v6113_v0 }
0x1649   : > { %v3843_v60 = vpop.permute.xlu1 %3842 }
0x164a   : > { %v3862_v5 = vsel %vm1183_vm1, %v3843_v60, 0 }
0x164c   : > { %v5806_v21 = vpop.eup %5805 }
0x164d   : > { %v3567_v37 = vmul.f32 %v5806_v21, %v5804_v63  ;;  %v3845_v31 = vpop.permute.xlu1 %3844 }
0x164e   : > { %v3865_v32 = vsel %vm1183_vm1, %v3845_v31, 0 }
0x164f   : > { %v7727_v55 = vadd.f32 %v3567_v37, %v7585_v53  ;;  %v3571_v54 = vpack.c.bf16 %v3567_v37, %v3567_v37 }
0x1651   : > { %5512 = vmatmul.mubr.bf16.vlgmr.msra.gmra.mrb[104].mxu1 %v3571_v54  ;;  %v3847_v13 = vpop.permute.xlu1 %3846 }
0x1652   : > { %5522 = vmatpush3.bf16.xpose.msra.mxu1 %v3777_v9  ;;  %5537 = vmatprep.mubr.msk.bf16.mxu1 %vm6114_vm0, %v6113_v0  ;;  %v3868_v39 = vsel %vm1183_vm1, %v3847_v13, 0 }
0x1653   : > { %5523 = vmatprep.subr.bf16.mxu1 %v6113_v0 }
0x1655   : > { %v3849_v63 = vpop.permute.xlu1 %3848 }
0x1656   : > { %v3871_v41 = vsel %vm1183_vm1, %v3849_v63, 0 }
0x1659   : > { %v3851_v26 = vpop.permute.xlu1 %3850 }
0x165a   : > { %5524 = vmatpush3.bf16.xpose.msra.mxu1 %v3780_v43  ;;  %v3874_v17 = vsel %vm1183_vm1, %v3851_v26, 0 }
0x165b   : > { %5525 = vmatprep.subr.bf16.mxu1 %v6113_v0 }
0x165d   : > { %v3853_v40 = vpop.permute.xlu1 %3852 }
0x165e   : > { %v3630_v58 = vpop.f32.mrb[92].mxu0  ;;  %v3877_v7 = vsel %vm1183_vm1, %v3853_v40, 0 }
0x165f   : > { %v5493_v53 = vpop.f32.mrb[93].mxu0 }
0x1660   : > { %v3633_v42 = vpop.f32.mrb[94].mxu0 }
0x1661   : > { %v5494_v18 = vpop.f32.mrb[95].mxu0  ;;  %v3855_v8 = vpop.permute.xlu1 %3854 }
0x1662   : > { %5526 = vmatpush3.bf16.xpose.msra.mxu1 %v3783_v56  ;;  %v3880_v20 = vsel %vm1183_vm1, %v3855_v8, 0 }
0x1663   : > { %5527 = vmatprep.subr.bf16.mxu1 %v6113_v0 }
0x1665   : > { %v3857_v21 = vpop.permute.xlu1 %3856 }
0x1666   : > { %v3883_v37 = vsel %vm1183_vm1, %v3857_v21, 0 }
0x1669   : > { %v3841_v9 = vpop.permute.xlu1 %3840 }
0x166a   : > { %5528 = vmatpush3.bf16.xpose.msra.mxu1 %v3786_v24 }
0x166b   : > { %5529 = vmatprep.subr.bf16.mxu1 %v6113_v0 }
0x1672   : > { %5530 = vmatpush3.bf16.xpose.msra.mxu1 %v3789_v62 }
0x1673   : > { %5531 = vmatprep.subr.bf16.mxu1 %v6113_v0 }
0x167a   : > { %5532 = vmatpush3.bf16.xpose.msra.mxu1 %v3792_v22 }
0x167b   : > { %5533 = vmatprep.subr.bf16.mxu1 %v6113_v0 }
0x1682   : > { %5534 = vmatpush3.bf16.xpose.msra.mxu1 %v3795_v33 }
0x1683   : > { %5535 = vmatprep.subr.bf16.mxu1 %v6113_v0 }
0x168a   : > { %5536 = vmatpush3.bf16.xpose.msra.mxu1 %v3798_v48 }
0x168b   : > { %5561 = vmatprep.subr.bf16.mxu1 %v6113_v0 }
0x1691   : > { %5538 = vmatmul.mubr.msk.bf16.vlgmr.msra.gmra.mrb[108].mxu1 %vm1183_vm1, %v3756_v49 }
0x1692   : > { %5577 = vmatprep.mubr.msk.bf16.mxu1 %vm6114_vm0, %v6113_v0 }
0x1724   : > { %v3694_v35 = vpop.f32.mrb[104].mxu1 }
0x1725   : > { %v3700_v6 = vpack.c.bf16 %v3694_v35, %v3630_v58  ;;  %v5513_v12 = vpop.f32.mrb[105].mxu1 }
0x1726   : > { %v3697_v19 = vpop.f32.mrb[106].mxu1 }
0x1727   : > { %v5514_v4 = vpop.f32.mrb[107].mxu1  ;;  %5518 = vmatmul.mubr.msk.bf16.vlgmr.msra.gmra.mrb[96].mxu0 %vm1183_vm1, %v3700_v6  ;;  %v5750_v19 = vld [vmem:[#allocation11 + $0x38] sm:$0xff]  }
0x1728   : > { %5542 = vmatpush3.bf16.xpose.msra.mxu0 %v3862_v5  ;;  %5557 = vmatprep.mubr.msk.bf16.mxu0 %vm6114_vm0, %v6113_v0 }
0x1729   : > { %5543 = vmatprep.subr.bf16.mxu0 %v6113_v0 }
0x1730   : > { %5544 = vmatpush3.bf16.xpose.msra.mxu0 %v3865_v32 }
0x1731   : > { %5545 = vmatprep.subr.bf16.mxu0 %v6113_v0 }
0x1738   : > { %5546 = vmatpush3.bf16.xpose.msra.mxu0 %v3868_v39 }
0x1739   : > { %5547 = vmatprep.subr.bf16.mxu0 %v6113_v0 }
0x1740   : > { %5548 = vmatpush3.bf16.xpose.msra.mxu0 %v3871_v41 }
0x1741   : > { %5549 = vmatprep.subr.bf16.mxu0 %v6113_v0 }
0x1748   : > { %5550 = vmatpush3.bf16.xpose.msra.mxu0 %v3874_v17 }
0x1749   : > { %5551 = vmatprep.subr.bf16.mxu0 %v6113_v0 }
0x1750   : > { %5552 = vmatpush3.bf16.xpose.msra.mxu0 %v3877_v7 }
0x1751   : > { %5553 = vmatprep.subr.bf16.mxu0 %v6113_v0 }
0x1758   : > { %5554 = vmatpush3.bf16.xpose.msra.mxu0 %v3880_v20 }
0x1759   : > { %5555 = vmatprep.subr.bf16.mxu0 %v6113_v0 }
0x1760   : > { %5556 = vmatpush3.bf16.xpose.msra.mxu0 %v3883_v37 }
0x1761   : > { %5581 = vmatprep.subr.bf16.mxu0 %v6113_v0 }
0x1764   : > { %v3834_v38 = vpop.f32.mrb[108].mxu1 }
0x1765   : > { %3925 = vmax.xlane.f32.xlu0 %v3834_v38  ;;  %v5539_v54 = vpop.f32.mrb[109].mxu1 }
0x1766   : > { %v3837_v3 = vpop.f32.mrb[110].mxu1 }
0x1767   : > { %v5540_v43 = vpop.f32.mrb[111].mxu1  ;;  %5558 = vmatmul.mubr.msk.bf16.vlgmr.msra.gmra.mrb[100].mxu0 %vm1183_vm1, %v3841_v9 }
0x1768   : > { %5597 = vmatprep.mubr.msk.bf16.mxu0 %vm6114_vm0, %v6113_v0 }
0x177b   : > { %3947 = vrot.lane.b32.xlu0 %v6728_v16, %s6121_s26 }
0x17f2   : > { %v3926_v57 = vpop.xlane.xlu0 %3925 }
0x17f3   : > { %v3929_v58 = vsub.f32 %v3834_v38, %v3926_v57 }
0x17f5   : > { %v3931_v53 = vmul.f32 1.442695, %v3929_v58 }
0x17f6   : > { %v3948_v42 = vpop.permute.xlu0 %3947 }
0x17f7   : > { %5807 = vpow2.f32 %v3931_v53  ;;  %5562 = vmatpush3.bf16.msra.mxu1 %v3948_v42 }
0x17f8   : > { %5563 = vmatprep.subr.bf16.mxu1 %v6113_v0 }
0x17fa   : > { %v3746_v56 = vpop.f32.mrb[96].mxu0 }
0x17fb   : > { %v7776_v18 = vadd.f32 %v3746_v56, %v7634_v36  ;;  %v5519_v51 = vpop.f32.mrb[97].mxu0 }
0x17fc   : > { %v3749_v24 = vpop.f32.mrb[98].mxu0 }
0x17fd   : > { %v7779_v25 = vadd.f32 %v3749_v24, %v7637_v44  ;;  %v5520_v62 = vpop.f32.mrb[99].mxu0 }
0x1801   : > { %v5808_v52 = vpop.eup %5807 }
0x1802   : > { %3935 = vadd.xlane.f32.xlu0 %v5808_v52 }
0x1818   : > { %3949 = vrot.lane.b32.xlu0 %v6726_v15, %s6121_s26 }
0x181c   : > { %3951 = vrot.lane.b32.xlu0 %v6740_v30, %s6121_s26 }
0x1820   : > { %3953 = vrot.lane.b32.xlu0 %v6737_v29, %s6121_s26 }
0x1824   : > { %3955 = vrot.lane.b32.xlu0 %v6752_v46, %s6121_s26 }
0x1828   : > { %3957 = vrot.lane.b32.xlu0 %v6749_v45, %s6121_s26 }
0x182c   : > { %3959 = vrot.lane.b32.xlu0 %v6764_v61, %s6121_s26 }
0x1830   : > { %3961 = vrot.lane.b32.xlu0 %v6761_v14, %s6121_s26 }
0x183a   : > { %v3919_v16 = vpop.f32.mrb[100].mxu0 }
0x183b   : > { %3927 = vmax.xlane.f32.xlu1 %v3919_v16  ;;  %v5559_v15 = vpop.f32.mrb[101].mxu0 }
0x183c   : > { %v3922_v36 = vpop.f32.mrb[102].mxu0 }
0x183d   : > { %v5560_v30 = vpop.f32.mrb[103].mxu0 }
0x184c   : > { %4011 = vrot.lane.b32.xlu1 %v6776_v11, %s6121_s26 }
0x1850   : > { %4013 = vrot.lane.b32.xlu1 %v6773_v10, %s6121_s26 }
0x1854   : > { %4015 = vrot.lane.b32.xlu1 %v6788_v28, %s6121_s26 }
0x1858   : > { %4017 = vrot.lane.b32.xlu1 %v6785_v27, %s6121_s26 }
0x185c   : > { %4019 = vrot.lane.b32.xlu1 %v6800_v50, %s6121_s26 }
0x1860   : > { %4021 = vrot.lane.b32.xlu1 %v6797_v47, %s6121_s26 }
0x1864   : > { %4023 = vrot.lane.b32.xlu1 %v6812_v2, %s6121_s26 }
0x188f   : > { %v3936_v29 = vpop.xlane.xlu0 %3935 }
0x1890   : > { %5809 = vrcp.f32 %v3936_v29 }
0x1893   : > { %v3950_v45 = vpop.permute.xlu0 %3949 }
0x1894   : > { %5564 = vmatpush3.bf16.msra.mxu1 %v3950_v45 }
0x1895   : > { %5565 = vmatprep.subr.bf16.mxu1 %v6113_v0 }
0x1897   : > { %v3952_v46 = vpop.permute.xlu0 %3951 }
0x1898   : > { %5566 = vmatpush3.bf16.msra.mxu1 %v3952_v46 }
0x1899   : > { %5567 = vmatprep.subr.bf16.mxu1 %v6113_v0 }
0x189a   : > { %v5810_v14 = vpop.eup %5809 }
0x189b   : > { %v3954_v61 = vpop.permute.xlu0 %3953  ;;  %v3941_v10 = vmul.f32 %v5810_v14, %v5808_v52 }
0x189c   : > { %5568 = vmatpush3.bf16.msra.mxu1 %v3954_v61 }
0x189d   : > { %5569 = vmatprep.subr.bf16.mxu1 %v6113_v0  ;;  %v3943_v11 = vadd.f32 %v3941_v10, %v7689_v59  ;;  %v3945_v44 = vpack.c.bf16 %v3941_v10, %v3941_v10 }
0x189f   : > { %v3956_v27 = vpop.permute.xlu0 %3955  ;;  %v4141_v28 = vmul.f32 0.125, %v3943_v11 }
0x18a0   : > { %5570 = vmatpush3.bf16.msra.mxu1 %v3956_v27 }
0x18a1   : > { %5571 = vmatprep.subr.bf16.mxu1 %v6113_v0  ;;  %4143 = vst [vmem:[%s7815_s0] sm:$0xff] %v4141_v28 }
0x18a3   : > { %v3958_v47 = vpop.permute.xlu0 %3957 }
0x18a4   : > { %5572 = vmatpush3.bf16.msra.mxu1 %v3958_v47 }
0x18a5   : > { %5573 = vmatprep.subr.bf16.mxu1 %v6113_v0 }
0x18a7   : > { %v3960_v50 = vpop.permute.xlu0 %3959 }
0x18a8   : > { %5574 = vmatpush3.bf16.msra.mxu1 %v3960_v50 }
0x18a9   : > { %5575 = vmatprep.subr.bf16.mxu1 %v6113_v0 }
0x18ab   : > { %v3962_v2 = vpop.permute.xlu0 %3961 }
0x18ac   : > { %5576 = vmatpush3.bf16.msra.mxu1 %v3962_v2 }
0x18ad   : > { %5601 = vmatprep.subr.bf16.mxu1 %v6113_v0 }
0x18af   : > { %5578 = vmatmul.mubr.bf16.vlgmr.msra.gmra.mrb[112].mxu1 %v3945_v44 }
0x18b0   : > { %5603 = vmatprep.mubr.msk.bf16.mxu1 %vm6114_vm0, %v6113_v0  ;;  %5602 = vmatpush3.bf16.msra.mxu1 %v5750_v19 }
0x18c8   : > { %v3928_v59 = vpop.xlane.xlu1 %3927 }
0x18c9   : > { %v3930_v22 = vsub.f32 %v3919_v16, %v3928_v59 }
0x18cb   : > { %v3933_v23 = vmul.f32 1.442695, %v3930_v22 }
0x18cc   : > { %v4012_v33 = vpop.permute.xlu1 %4011 }
0x18cd   : > { %5811 = vpow2.f32 %v3933_v23  ;;  %5582 = vmatpush3.bf16.msra.mxu0 %v4012_v33 }
0x18ce   : > { %5583 = vmatprep.subr.bf16.mxu0 %v6113_v0 }
0x18d0   : > { %v4014_v34 = vpop.permute.xlu1 %4013 }
0x18d1   : > { %5584 = vmatpush3.bf16.msra.mxu0 %v4014_v34 }
0x18d2   : > { %5585 = vmatprep.subr.bf16.mxu0 %v6113_v0 }
0x18d4   : > { %v4016_v48 = vpop.permute.xlu1 %4015 }
0x18d5   : > { %5586 = vmatpush3.bf16.msra.mxu0 %v4016_v48 }
0x18d6   : > { %5587 = vmatprep.subr.bf16.mxu0 %v6113_v0 }
0x18d7   : > { %v5812_v49 = vpop.eup %5811 }
0x18d8   : > { %3937 = vadd.xlane.f32.xlu1 %v5812_v49  ;;  %v4018_v60 = vpop.permute.xlu1 %4017 }
0x18d9   : > { %5588 = vmatpush3.bf16.msra.mxu0 %v4018_v60 }
0x18da   : > { %5589 = vmatprep.subr.bf16.mxu0 %v6113_v0 }
0x18dc   : > { %v4020_v35 = vpop.permute.xlu1 %4019 }
0x18dd   : > { %5590 = vmatpush3.bf16.msra.mxu0 %v4020_v35 }
0x18de   : > { %5591 = vmatprep.subr.bf16.mxu0 %v6113_v0 }
0x18e0   : > { %v4022_v6 = vpop.permute.xlu1 %4021 }
0x18e1   : > { %5592 = vmatpush3.bf16.msra.mxu0 %v4022_v6 }
0x18e2   : > { %5593 = vmatprep.subr.bf16.mxu0 %v6113_v0 }
0x18e4   : > { %v4024_v12 = vpop.permute.xlu1 %4023 }
0x18e5   : > { %5594 = vmatpush3.bf16.msra.mxu0 %v4024_v12 }
0x18e6   : > { %5595 = vmatprep.subr.bf16.mxu0 %v6113_v0 }
0x18e9   : > { %4025 = vrot.lane.b32.xlu1 %v6809_v1, %s6121_s26 }
0x1965   : > { %v3938_v5 = vpop.xlane.xlu1 %3937 }
0x1966   : > { %5813 = vrcp.f32 %v3938_v5 }
0x1969   : > { %v4026_v4 = vpop.permute.xlu1 %4025 }
0x196a   : > { %5596 = vmatpush3.bf16.msra.mxu0 %v4026_v4 }
0x1970   : > { %v5814_v31 = vpop.eup %5813 }
0x1971   : > { %v3942_v32 = vmul.f32 %v5814_v31, %v5812_v49 }
0x1973   : > { %v3944_v13 = vadd.f32 %v3942_v32, %v7727_v55  ;;  %v3946_v39 = vpack.c.bf16 %v3942_v32, %v3942_v32 }
0x1975   : > { %5598 = vmatmul.mubr.bf16.vlgmr.msra.gmra.mrb[104].mxu0 %v3946_v39  ;;  %v4142_v63 = vmul.f32 0.125, %v3944_v13 }
0x1977   : > { %4144 = vst [vmem:[%s7815_s0 + $0x8] sm:$0xff] %v4142_v63 }
0x1982   : > { %v4005_v0 = vpop.f32.mrb[112].mxu1 }
0x1983   : > { %v5579_v1 = vpop.f32.mrb[113].mxu1 }
0x1984   : > { %v4008_v41 = vpop.f32.mrb[114].mxu1 }
0x1985   : > { %v5580_v26 = vpop.f32.mrb[115].mxu1 }
0x1a48   : > { %v4069_v17 = vpop.f32.mrb[104].mxu0 }
0x1a49   : > { %v4075_v40 = vpack.c.bf16 %v4069_v17, %v4005_v0  ;;  %v5599_v7 = vpop.f32.mrb[105].mxu0 }
0x1a4a   : > { %v4072_v8 = vpop.f32.mrb[106].mxu0 }
0x1a4b   : > { %v5600_v20 = vpop.f32.mrb[107].mxu0  ;;  %5604 = vmatmul.mubr.msk.bf16.vlgmr.msra.gmra.mrb[116].mxu1 %vm1183_vm1, %v4075_v40 }
0x1a4c   : > { %6000 = shalt.err (!%p5997_p8)
}
0x1a4d   : > { %s6001_s30 = scalar_lea.hbm %s7841_s16, 256  ;;  %s6005_s13 = scalar_lea.hbm %s7982_s23, 512 }
0x1a4e   : > { %p6002_p11 = scmp.ne.s32.totalorder %s7841_s16, %s6001_s30  ;;  %p6006_p1 = scmp.lt.u32.totalorder %s7841_s16, %s7982_s23 }
0x1a4f   : > { %p6007_p2 = scmp.lt.u32.totalorder %s6005_s13, %s6001_s30  ;;  %p6009_p0 = scmp.lt.u32.totalorder %s6001_s30, %s7841_s16 }
0x1a50   : > { %p6003_p7 = pnand %p6002_p11, %p6357_p10 }
0x1a51   : > { %p6008_p13 = por %p6007_p2, %p6006_p1 }
0x1a52   : > { %p6004_p12 = pneg %p6003_p7 }
0x1a53   : > { %p6010_p4 = por %p6009_p0, %p6008_p13 }
0x1a55   : > { %p6011_p6 = pnand %p6010_p4, %p6004_p12 }
0x1a57   : > { %6014 = shalt.err (!%p6011_p6)
}
0x1a58   : > { %s6123_s25 = smov 128   ;;  %s6124_s28 = smov 8  }
0x1a59   : > { %5628 = dma.vmem_to_hbm [thread:$0]  (%p6357_p10), %s7844_s11, 256, %s7841_s16, %s4151_s12, %s6123_s25, %s6123_s25, %s6124_s28  }
0x1a5a   : > { %s7983_s14 = sld [smem:[#allocation29_spill]]  ;;  %s507_s2 = scalar_lea.vmem [#allocation13], %s6459_s15 }
0x1a5b   : > { %s4164_s30 = sshll.u32 %s507_s2, 4  ;;  %s7984_s12 = sld [smem:[#allocation30_spill]]  ;;  %s7879_s30 = int_to_ptr.vmem [resolvable:$true] %s4164_s30 }
0x1a5c   : > { %s4146_s15 = scalar_lea.sflag [#allocation4], %s6456_s6  ;;  %s6015_s10 = scalar_lea.vmem %s7879_s30, 256 }
0x1a5d   : > { %p6016_p3 = scmp.ne.s32.totalorder %s7879_s30, %s6015_s10  ;;  %s6125_s13 = smov [#allocation13]  }
0x1a5e   : > { %s6019_s26 = sshll.u32 %s6125_s13, 4  ;;  %s6020_s26 = int_to_ptr.vmem [resolvable:$false] %s6019_s26 }
0x1a5f   : > { %p6017_p5 = pnand %p6016_p3, %p6357_p10  ;;  %s6021_s0 = scalar_lea.vmem %s6020_s26, 512 }
0x1a60   : > { %v4428_v21 = vld [vmem:[%s7983_s14] ss:$0 sm:$0xff]  ;;  %p6022_p8 = scmp.lt.s32.totalorder %s7879_s30, %s6020_s26  ;;  %p6023_p11 = scmp.lt.s32.totalorder %s6021_s0, %s6015_s10 }
0x1a61   : > { %s7886_s29 = scalar_lea.hbm %s7984_s12, %s4440_s4  ;;  %p6018_p9 = pneg %p6017_p5 }
0x1a62   : > { %p6024_p7 = por %p6023_p11, %p6022_p8 }
0x1a64   : > { %p6025_p12 = pnand %p6024_p7, %p6018_p9 }
0x1b1e   : > { %v4121_v55 = vpop.f32.mrb[116].mxu1 }
0x1b1f   : > { %v4128_v37 = vadd.f32 %v4121_v55, %v7776_v18  ;;  %v5605_v38 = vpop.f32.mrb[117].mxu1 }
0x1b20   : > { %v4124_v54 = vpop.f32.mrb[118].mxu1 }
0x1b21   : > { %v4137_v9 = vadd.f32 %v4428_v21, %v4128_v37  ;;  %v4129_v3 = vadd.f32 %v4124_v54, %v7779_v25  ;;  %v5606_v43 = vpop.f32.mrb[119].mxu1 }
0x1b23   : > { %4139 = vst [vmem:[%s507_s2] sm:$0xff] %v4137_v9  ;;  %v4138_v57 = vadd.f32 %v4428_v21, %v4129_v3 }
0x1b25   : > { %4140 = vst [vmem:[%s507_s2 + $0x8] sm:$0xff] %v4138_v57 }
0x1b26   : > { %6028 = shalt.err (!%p6025_p12)
}
0x1b27   : > { %s6029_s21 = scalar_lea.hbm %s7886_s29, 256  ;;  %s6033_s9 = scalar_lea.hbm %s7984_s12, 512 }
0x1b28   : > { %p6030_p1 = scmp.ne.s32.totalorder %s7886_s29, %s6029_s21  ;;  %p6034_p0 = scmp.lt.u32.totalorder %s7886_s29, %s7984_s12 }
0x1b29   : > { %p6035_p4 = scmp.lt.u32.totalorder %s6033_s9, %s6029_s21  ;;  %p6037_p3 = scmp.lt.u32.totalorder %s6029_s21, %s7886_s29 }
0x1b2a   : > { %p6031_p2 = pnand %p6030_p1, %p6357_p10 }
0x1b2b   : > { %p6036_p6 = por %p6035_p4, %p6034_p0 }
0x1b2c   : > { %p6032_p13 = pneg %p6031_p2 }
0x1b2d   : > { %p6038_p5 = por %p6037_p3, %p6036_p6 }
0x1b2f   : > { %p6039_p9 = pnand %p6038_p5, %p6032_p13 }
0x1b31   : > { %6042 = shalt.err (!%p6039_p9)
}
0x1b32   : > { %5627 = dma.vmem_to_hbm [thread:$0]  (%p6357_p10), %s7879_s30, 256, %s7886_s29, %s4146_s15, %s6123_s25, %s6123_s25, %s6124_s28  }
0x1b33 PF: > { %s7985_s16 = sld [smem:[#allocation23_spill]]  ;;  %s7986_s11 = sld [smem:[#allocation24_spill]] }
0x1b34   : > { %p7988_p11 = scmp.ge.s32.totalorder %s6101_s20, 2 }
0x1b39   : > { %s4195_s10 = sand.u32 1, %s7985_s16   ;;  %p7987_p8 = scmp.ne.s32.totalorder %s7986_s11, 0 }
0x1b3a   : > { %s4196_s13 = scalar_lea.sflag [#allocation4], %s4195_s10 }
0x1b3b   : > { %p5652_p7 = pnand %p7988_p11, %p7987_p8 }
0x1b3d   : > { %6080 = dma.done.wait (!%p5652_p7), %s4196_s13, 256  }
0x1b3e   : > { %6082 = vsyncadd (!%p5652_p7), %s4196_s13, 4294967040  ;;  %s4205_s17 = scalar_lea.sflag [#allocation15], %s4195_s10 }
0x1b3f   : > { %6084 = dma.done.wait (!%p5652_p7), %s4205_s17, 256  }
0x1b40   : > { %6086 = vsyncadd (!%p5652_p7), %s4205_s17, 4294967040  ;;  %p33_p10 = scmp.ge.s32.totalorder %s6347_s24, 4   ;;  %s7989_s17 = smov %s6093_s18 }
0x1b41   : > { %s7990_s18 = smov %s6097_s19  ;;  %s7991_s19 = smov %s6363_s22 }
0x1b42   : > { %s7992_s20 = smov %s6347_s24  ;;  %35 = sbr.rel (!%p33_p10) target bundleno = 19 (0x13), region = 151 }
0x1b49   :  { %4210 = vsyncpa [#allocation3], 1 }
0x1b4a   :  { %4212 = vsyncpa [#allocation3 + $0x1], 1 }
0x1b4b   :  { %4213 = vsyncpa [#allocation6], 1 }
0x1b4c   :  { %4215 = vsyncpa [#allocation6 + $0x1], 1 }
0x1b4d   :  { %4216 = vsyncpa [#allocation9], 1 }
0x1b4e   :  { %4217 = vsyncpa [#allocation12], 1 }
0x1b4f   :  { %4218 = vsyncpa [#allocation4], 1 }
0x1b50   :  { %4220 = vsyncpa [#allocation4 + $0x1], 1 }
0x1b51   :  { %4221 = vsyncpa [#allocation15], 1 }
0x1b52   :  { %4223 = vsyncpa [#allocation15 + $0x1], 1 }

</bundles_post_ra>
